<compile_context>
chip_gen: v7x
topology: tpu7x:2x2x1
jax: 0.10.0
libtpu: 0.0.40
codegen_flags: <defaults>
</compile_context>

<pallas_src>
import functools

import jax
import jax.numpy as jnp
from jax.experimental import pallas as pl
from jax.experimental.pallas import tpu as pltpu

# ----------------------------- hyperparams -----------------------------------
EMBED = 32           # embed_size
HIDDEN = 32          # hidden_size
KEY = 100            # self.key_size (logical)
KEY_PAD = 128        # key_size zero-padded to the 128-lane boundary
V_SRC = 40           # len(vocab.src)
V_TGT = 50           # len(vocab.tgt) (logical)
V_TGT_PAD = 128      # tgt vocab padded to 128 lanes (masked before softmax)
B = 2                # batch
S = 8                # src length (equal for all examples)
T = 8                # tgt length (incl. <s> ... </s>)

# --------------------- packed-weight layout (static) --------------------------
W_LANES = 8 * HIDDEN                       # 256 lanes for the weight buffer

_W_LAYOUT = [                               # (name, rows, cols) in pack order
    ("enc_wih",     EMBED,          8 * HIDDEN),   # [fwd | bwd] input gates
    ("enc_whh",     2 * HIDDEN,     8 * HIDDEN),   # block-diag(fwd_hh, bwd_hh)
    ("dec_wih_emb", EMBED,          4 * HIDDEN),   # decoder W_ih embed rows
    ("dec_ch",      EMBED + HIDDEN, 4 * HIDDEN),   # [W_ih ctx rows ; W_hh]
    ("a_key",       HIDDEN,         KEY_PAD),
    ("q_kv",        2 * HIDDEN,     W_LANES),      # [:128]=q_key, [128:160]=q_val
    ("hc_tr",       4 * HIDDEN,     2 * HIDDEN),   # block-diag(hid_tr, cell_tr)
    ("out",         HIDDEN + EMBED, EMBED),
    ("wd",          EMBED,          V_TGT_PAD),
]


def _compute_w_offsets():
    offs, cur = {}, 0
    for name, r, c in _W_LAYOUT:
        offs[name] = (cur, r, c)
        cur += r                              # all row counts are multiples of 8
    return offs, cur


W_OFFS, W_ROWS = _compute_w_offsets()         # W_ROWS == 512

_B_ROWS = {                                   # bias row -> (row, width)
    "enc":   (0, 8 * HIDDEN),
    "dec":   (1, 4 * HIDDEN),
    "a_key": (2, KEY_PAD),
    "q_kv":  (3, W_LANES),
    "hc_tr": (4, 2 * HIDDEN),
    "out":   (5, EMBED),
    "wd":    (6, V_TGT_PAD),
}
B_SUBLANES = 8


# ----------------------------- fused kernel ----------------------------------
def _cell(gates, c, hidden):
    """PyTorch-convention LSTM cell math given precomputed gates (i,f,g,o)."""
    i = jax.nn.sigmoid(gates[:, 0 * hidden:1 * hidden])
    f = jax.nn.sigmoid(gates[:, 1 * hidden:2 * hidden])
    g = jnp.tanh(gates[:, 2 * hidden:3 * hidden])
    o = jax.nn.sigmoid(gates[:, 3 * hidden:4 * hidden])
    c_new = f * c + i * g
    return o * jnp.tanh(c_new), c_new


def _nmt_fused_kernel(
    src_emb_ref, tgt_emb_ref, mask_ref, tgt_next_ref, wmat_ref, bvec_ref,
    loss_ref, *, hidden, embed, s_len, t_len, v_tgt,
):
    f32 = jnp.float32
    bf16 = jnp.bfloat16
    neg_big = f32(-1e30)
    batch = mask_ref.shape[0]
    h4 = 4 * hidden

    def W(name):                                  # bf16 weight slice (load at use)
        off, r, c = W_OFFS[name]
        return wmat_ref[off:off + r, :c]

    def Bv(name):                                 # f32 bias row (1, width)
        row, c = _B_ROWS[name]
        return bvec_ref[row:row + 1, :c]

    # -------- encoder input gates for ALL timesteps & both directions --------
    src_bf = src_emb_ref[...].reshape(batch * s_len, embed).astype(bf16)
    gx = (jnp.dot(src_bf, W("enc_wih"), preferred_element_type=f32)
          + Bv("enc")).reshape(batch, s_len, 2 * h4)              # (B,S,8H)

    # ----- interleaved fwd/bwd recurrence; one block-diag W_hh push / step ----
    w_enc_whh = W("enc_whh")                                      # hot (S steps)
    zeros_h = jnp.zeros((batch, hidden), f32)
    h_f, c_f, h_b, c_b = zeros_h, zeros_h, zeros_h, zeros_h
    fwd = [None] * s_len
    bwd = [None] * s_len
    for t in range(s_len):                                        # unrolled (S=8)
        hh = jnp.dot(jnp.concatenate([h_f, h_b], axis=1).astype(bf16),
                     w_enc_whh, preferred_element_type=f32)       # (B,8H)
        h_f, c_f = _cell(gx[:, t, :h4] + hh[:, :h4], c_f, hidden)
        h_b, c_b = _cell(gx[:, s_len - 1 - t, h4:] + hh[:, h4:], c_b, hidden)
        fwd[t] = h_f
        bwd[s_len - 1 - t] = h_b

    # --------- init_hidden: one block-diag transform for (hidden, cell) ------
    hc_in = jnp.concatenate([h_f, h_b, c_f, c_b], axis=1).astype(bf16)   # (B,4H)
    hc = jnp.tanh(jnp.dot(hc_in, W("hc_tr"), preferred_element_type=f32)
                  + Bv("hc_tr"))                                         # (B,2H)
    dec_h = hc[:, :hidden]
    dec_c = hc[:, hidden:2 * hidden]

    # --------- q_key / q_value for ALL source positions in ONE matmul --------
    src_h = jnp.stack([jnp.concatenate([fwd[t], bwd[t]], axis=1)
                       for t in range(s_len)], axis=1)            # (B,S,2H)
    qkv = (jnp.dot(src_h.reshape(batch * s_len, 2 * hidden).astype(bf16),
                   W("q_kv"), preferred_element_type=f32) + Bv("q_kv"))
    q_key = qkv[:, :KEY_PAD].reshape(batch, s_len, KEY_PAD)       # (B,S,128)
    q_value = qkv[:, KEY_PAD:KEY_PAD + embed].reshape(batch, s_len, embed)

    # --------- decoder embedding-side input gates for ALL steps --------------
    tgt_bf = tgt_emb_ref[...].reshape(batch * t_len, embed).astype(bf16)
    dec_gx = (jnp.dot(tgt_bf, W("dec_wih_emb"), preferred_element_type=f32)
              + Bv("dec")).reshape(batch, t_len, h4)              # (B,T,4H)

    mask2 = mask_ref[...] > 0.5                                   # (B,S) bool
    w_a_key = W("a_key")                                          # hot (T-1 steps)
    b_a_key = Bv("a_key")
    w_dec_ch = W("dec_ch")

    # -------------------- decode loop (attention + LSTM only) ----------------
    feats = []
    for step in range(t_len - 1):                                 # unrolled (T-1)
        # global attention (masked softmax over source positions, lane-dense)
        a_key = (jnp.dot(dec_h.astype(bf16), w_a_key,
                         preferred_element_type=f32) + b_a_key)   # (B,128)
        energy = jnp.sum(q_key * a_key[:, None, :], axis=-1)      # (B,S)
        energy = jnp.where(mask2, energy, neg_big)
        m = jnp.max(energy, axis=1, keepdims=True)
        e = jnp.exp(energy - m)
        w = e * pl.reciprocal(jnp.sum(e, axis=1, keepdims=True), approx=True)
        ctx = jnp.sum(w[:, :, None] * q_value, axis=1)            # (B,E)

        # decoder LSTM cell: precomputed embed gates + [ctx|h] @ [Wih_ctx;Whh]
        ch = jnp.concatenate([ctx, dec_h], axis=1).astype(bf16)   # (B,E+H)
        gates = dec_gx[:, step, :] + jnp.dot(ch, w_dec_ch,
                                             preferred_element_type=f32)
        dec_h, dec_c = _cell(gates, dec_c, hidden)
        feats.append(jnp.concatenate([dec_h, ctx], axis=1))       # (B,H+E)

    # ------- batched output head + log-softmax + NLL (single dense pass) -----
    feats.append(jnp.zeros((batch, hidden + embed), f32))         # pad to T steps
    feat = jnp.stack(feats, axis=1).reshape(batch * t_len, hidden + embed)
    u = jnp.tanh(jnp.dot(feat.astype(bf16), W("out"),
                         preferred_element_type=f32) + Bv("out"))  # (B*T, E)
    logits = (jnp.dot(u.astype(bf16), W("wd"), preferred_element_type=f32)
              + Bv("wd"))                                          # (B*T, 128)
    rows = batch * t_len
    vocab_cols = jax.lax.broadcasted_iota(jnp.int32, (rows, V_TGT_PAD), 1)
    logits = jnp.where(vocab_cols < v_tgt, logits, neg_big)        # mask pad vocab
    lm = jnp.max(logits, axis=-1, keepdims=True)
    lse = jnp.log(jnp.sum(jnp.exp(logits - lm), axis=-1, keepdims=True)) + lm
    logp = logits - lse

    tgt_next = tgt_next_ref[...]                                   # (B*T,1) int32
    onehot = (vocab_cols == tgt_next).astype(f32)
    valid = (tgt_next != 0).astype(f32)                            # ignore_index=0
    loss = -jnp.sum(logp * onehot * valid)                         # one reduction
    loss_ref[...] = loss.reshape(1, 1)


# ----------------------------- parameters ------------------------------------
def init_params(key):
    def nrm(k, shape, scale=0.1):
        return scale * jax.random.normal(k, shape, dtype=jnp.float32)

    def pad_cols(a, n):
        # zero-pad the output dim to a lane-aligned width; zero columns
        # contribute 0 to every dot product, so the math is unchanged.
        return jnp.pad(a, ((0, 0), (0, n - a.shape[1])))

    ks = iter(jax.random.split(key, 40))
    p = {}
    # embeddings (padding_idx=0 -> zero row)
    p['src_embed'] = nrm(next(ks), (V_SRC, EMBED)).at[0].set(0.0)
    p['tgt_embed'] = nrm(next(ks), (V_TGT, EMBED)).at[0].set(0.0)
    # encoder bi-LSTM (forward / backward); b = b_ih + b_hh merged
    for d in ('f', 'b'):
        p[f'enc_{d}_wih'] = nrm(next(ks), (EMBED, 4 * HIDDEN))
        p[f'enc_{d}_whh'] = nrm(next(ks), (HIDDEN, 4 * HIDDEN))
        p[f'enc_{d}_b'] = nrm(next(ks), (1, 4 * HIDDEN))
    # decoder LSTM (input = 2*EMBED)
    p['dec_wih'] = nrm(next(ks), (2 * EMBED, 4 * HIDDEN))
    p['dec_whh'] = nrm(next(ks), (HIDDEN, 4 * HIDDEN))
    p['dec_b'] = nrm(next(ks), (1, 4 * HIDDEN))
    # attention / projections (key_size=100 and |V_tgt|=50 padded to 128 lanes)
    p['a_key_w'] = pad_cols(nrm(next(ks), (HIDDEN, KEY)), KEY_PAD)
    p['a_key_b'] = pad_cols(nrm(next(ks), (1, KEY)), KEY_PAD)
    p['q_key_w'] = pad_cols(nrm(next(ks), (2 * HIDDEN, KEY)), KEY_PAD)
    p['q_key_b'] = pad_cols(nrm(next(ks), (1, KEY)), KEY_PAD)
    p['q_val_w'] = nrm(next(ks), (2 * HIDDEN, EMBED))
    p['q_val_b'] = nrm(next(ks), (1, EMBED))
    p['hid_tr_w'] = nrm(next(ks), (2 * HIDDEN, HIDDEN))
    p['hid_tr_b'] = nrm(next(ks), (1, HIDDEN))
    p['cell_tr_w'] = nrm(next(ks), (2 * HIDDEN, HIDDEN))
    p['cell_tr_b'] = nrm(next(ks), (1, HIDDEN))
    p['out_w'] = nrm(next(ks), (HIDDEN + EMBED, EMBED))
    p['out_b'] = nrm(next(ks), (1, EMBED))
    p['wd_w'] = pad_cols(nrm(next(ks), (EMBED, V_TGT)), V_TGT_PAD)
    p['wd_b'] = pad_cols(nrm(next(ks), (1, V_TGT)), V_TGT_PAD)
    return p


def pack_params(p):
    """Pack all weights into one bf16 (512,256) buffer + one f32 (8,256) bias buffer."""
    f32 = jnp.float32

    # derived / fused matrices
    enc_wih = jnp.concatenate([p['enc_f_wih'], p['enc_b_wih']], axis=1)     # (E,8H)
    enc_whh = jnp.zeros((2 * HIDDEN, 8 * HIDDEN), f32)
    enc_whh = enc_whh.at[:HIDDEN, :4 * HIDDEN].set(p['enc_f_whh'])
    enc_whh = enc_whh.at[HIDDEN:, 4 * HIDDEN:].set(p['enc_b_whh'])
    dec_ch = jnp.concatenate([p['dec_wih'][EMBED:], p['dec_whh']], axis=0)  # (E+H,4H)
    q_kv = jnp.zeros((2 * HIDDEN, W_LANES), f32)
    q_kv = q_kv.at[:, :KEY_PAD].set(p['q_key_w'])
    q_kv = q_kv.at[:, KEY_PAD:KEY_PAD + EMBED].set(p['q_val_w'])
    hc_tr = jnp.zeros((4 * HIDDEN, 2 * HIDDEN), f32)
    hc_tr = hc_tr.at[:2 * HIDDEN, :HIDDEN].set(p['hid_tr_w'])
    hc_tr = hc_tr.at[2 * HIDDEN:, HIDDEN:].set(p['cell_tr_w'])

    mats = {
        "enc_wih": enc_wih,
        "enc_whh": enc_whh,
        "dec_wih_emb": p['dec_wih'][:EMBED],
        "dec_ch": dec_ch,
        "a_key": p['a_key_w'],
        "q_kv": q_kv,
        "hc_tr": hc_tr,
        "out": p['out_w'],
        "wd": p['wd_w'],
    }
    wmat = jnp.zeros((W_ROWS, W_LANES), f32)
    for name, _, _ in _W_LAYOUT:
        off, r, c = W_OFFS[name]
        a = mats[name]
        wmat = wmat.at[off:off + a.shape[0], :a.shape[1]].set(a)

    biases = {
        "enc": jnp.concatenate([p['enc_f_b'], p['enc_b_b']], axis=1),
        "dec": p['dec_b'],
        "a_key": p['a_key_b'],
        "q_kv": jnp.concatenate([p['q_key_b'], p['q_val_b']], axis=1),
        "hc_tr": jnp.concatenate([p['hid_tr_b'], p['cell_tr_b']], axis=1),
        "out": p['out_b'],
        "wd": p['wd_b'],
    }
    bvec = jnp.zeros((B_SUBLANES, W_LANES), f32)
    for name, (row, _) in _B_ROWS.items():
        a = biases[name]
        bvec = bvec.at[row:row + 1, :a.shape[1]].set(a)

    return wmat.astype(jnp.bfloat16), bvec


# ----------------------------- forward pass ----------------------------------
def _full_spec(arr):
    zeros = (0,) * arr.ndim
    return pl.BlockSpec(arr.shape, lambda i, _z=zeros: _z)


def nmt_forward(src_embed, tgt_embed, wmat, bvec, src_ind, tgt_ind, src_lengths):
    Bb, Sl = src_ind.shape
    Tl = tgt_ind.shape[1]

    # plain-JAX glue: embedding gathers, source-length mask, shifted targets
    src_emb = src_embed[src_ind]                                   # (B,S,E)
    tgt_emb = tgt_embed[tgt_ind]                                   # (B,T,E)
    q_mask = (jnp.arange(Sl)[None, :] <
              jnp.asarray(src_lengths)[:, None]).astype(jnp.float32)   # (B,S)
    tgt_next = jnp.concatenate(
        [tgt_ind[:, 1:], jnp.zeros((Bb, 1), tgt_ind.dtype)], axis=1)
    tgt_next = tgt_next.reshape(Bb * Tl, 1).astype(jnp.int32)      # (B*T,1)

    inputs = (src_emb, tgt_emb, q_mask, tgt_next, wmat, bvec)

    kern = functools.partial(_nmt_fused_kernel, hidden=HIDDEN, embed=EMBED,
                             s_len=Sl, t_len=Tl, v_tgt=V_TGT)

    loss = pl.pallas_call(
        kern,
        grid=(1,),
        out_shape=jax.ShapeDtypeStruct((1, 1), jnp.float32),
        in_specs=[_full_spec(a) for a in inputs],
        out_specs=pl.BlockSpec((1, 1), lambda i: (0, 0)),
        compiler_params=pltpu.CompilerParams(
            dimension_semantics=("arbitrary",)),
    )(*inputs)[0, 0]

    num_words = jnp.sum(tgt_ind[:, 1:] != 0)
    return loss, num_words


# ----------------------------- main -------------------------------------------
if __name__ == "__main__":
    key = jax.random.PRNGKey(0)
    pkey, skey, tkey = jax.random.split(key, 3)

    params = init_params(pkey)
    wmat, bvec = pack_params(params)

    # deterministic token indices (0 = <pad>, 1 = <s>, 2 = </s>)
    src_ind = jax.random.randint(skey, (B, S), 1, V_SRC, dtype=jnp.int32)
    src_lengths = jnp.full((B,), S, dtype=jnp.int32)  # equal lengths ("sorted")

    tgt_ind = jax.random.randint(tkey, (B, T), 3, V_TGT, dtype=jnp.int32)
    tgt_ind = tgt_ind.at[:, 0].set(1)          # <s>
    tgt_ind = tgt_ind.at[0, T - 1].set(2)      # </s>
    tgt_ind = tgt_ind.at[1, T - 2].set(2)      # shorter tgt, then padding
    tgt_ind = tgt_ind.at[1, T - 1].set(0)

    fwd_fn = jax.jit(nmt_forward)
    loss, num_words = fwd_fn(params['src_embed'], params['tgt_embed'],
                             wmat, bvec, src_ind, tgt_ind, src_lengths)
    loss = jax.block_until_ready(loss)
    num_words = jax.block_until_ready(num_words)
    assert jnp.isfinite(loss)
    print("KERNEL_OK")
</pallas_src>

<mosaic_0001>
module attributes {stable_mosaic.version = 11 : i64} {
  func.func @_nmt_fused_kernel(%arg0: i32, %arg1: memref<2x8x32xf32, #tpu.memory_space<vmem>>, %arg2: memref<2x8x32xf32, #tpu.memory_space<vmem>>, %arg3: memref<2x8xf32, #tpu.memory_space<vmem>>, %arg4: memref<16x1xi32, #tpu.memory_space<vmem>>, %arg5: memref<512x256xbf16, #tpu.memory_space<vmem>>, %arg6: memref<8x256xf32, #tpu.memory_space<vmem>>, %arg7: memref<1x1xf32, #tpu.memory_space<vmem>>) attributes {dimension_semantics = [#tpu.dimension_semantics<arbitrary>], iteration_bounds = array<i64: 1>, scalar_prefetch = 0 : i64, scratch_operands = 0 : i64, tpu.core_type = #tpu.core_type<tc>, window_params = [{pipeline_mode = #tpu.pipeline_mode<synchronous>, transform_indices = @transform_0, window_bounds = array<i64: 2, 8, 32>}, {pipeline_mode = #tpu.pipeline_mode<synchronous>, transform_indices = @transform_1, window_bounds = array<i64: 2, 8, 32>}, {pipeline_mode = #tpu.pipeline_mode<synchronous>, transform_indices = @transform_2, window_bounds = array<i64: 2, 8>}, {pipeline_mode = #tpu.pipeline_mode<synchronous>, transform_indices = @transform_3, window_bounds = array<i64: 16, 1>}, {pipeline_mode = #tpu.pipeline_mode<synchronous>, transform_indices = @transform_4, window_bounds = array<i64: 512, 256>}, {pipeline_mode = #tpu.pipeline_mode<synchronous>, transform_indices = @transform_5, window_bounds = array<i64: 8, 256>}, {pipeline_mode = #tpu.pipeline_mode<synchronous>, transform_indices = @transform_6, window_bounds = array<i64: 1, 1>}]} {
    %c0 = arith.constant 0 : index
    %c0_0 = arith.constant 0 : index
    %c0_1 = arith.constant 0 : index
    %0 = vector.load %arg1[%c0, %c0_0, %c0_1] : memref<2x8x32xf32, #tpu.memory_space<vmem>>, vector<2x8x32xf32>
    %1 = vector.shape_cast %0 : vector<2x8x32xf32> to vector<16x32xf32>
    %2 = arith.truncf %1 : vector<16x32xf32> to vector<16x32xbf16>
    %c0_2 = arith.constant 0 : index
    %c0_3 = arith.constant 0 : index
    %3 = vector.load %arg5[%c0_2, %c0_3] : memref<512x256xbf16, #tpu.memory_space<vmem>>, vector<32x256xbf16>
    %cst = arith.constant dense<0.000000e+00> : vector<16x256xf32>
    %4 = tpu.matmul %2, %3, %cst {dimension_numbers = #tpu.dot_dimension_numbers<[1], [0], [0], [1], [0, 0, 1, 1], [], []>} : vector<16x32xbf16>, vector<32x256xbf16>, vector<16x256xf32> -> vector<16x256xf32>
    %c0_4 = arith.constant 0 : index
    %c0_5 = arith.constant 0 : index
    %5 = vector.load %arg6[%c0_4, %c0_5] : memref<8x256xf32, #tpu.memory_space<vmem>>, vector<1x256xf32>
    %6 = vector.broadcast %5 : vector<1x256xf32> to vector<16x256xf32>
    %7 = arith.addf %4, %6 : vector<16x256xf32>
    %8 = vector.shape_cast %7 : vector<16x256xf32> to vector<2x8x256xf32>
    %c32 = arith.constant 32 : index
    %c0_6 = arith.constant 0 : index
    %9 = vector.load %arg5[%c32, %c0_6] : memref<512x256xbf16, #tpu.memory_space<vmem>>, vector<64x256xbf16>
    %cst_7 = arith.constant 0.000000e+00 : f32
    %10 = vector.broadcast %cst_7 : f32 to vector<2x32xf32>
    %11 = tpu.concatenate %10, %10 in 1 : vector<2x32xf32>, vector<2x32xf32> -> vector<2x64xf32>
    %12 = arith.truncf %11 : vector<2x64xf32> to vector<2x64xbf16>
    %cst_8 = arith.constant dense<0.000000e+00> : vector<2x256xf32>
    %13 = tpu.matmul %12, %9, %cst_8 {dimension_numbers = #tpu.dot_dimension_numbers<[1], [0], [0], [1], [0, 0, 1, 1], [], []>} : vector<2x64xbf16>, vector<64x256xbf16>, vector<2x256xf32> -> vector<2x256xf32>
    %14 = vector.extract_strided_slice %8 {offsets = [0, 0, 0], sizes = [2, 1, 128], strides = [1, 1, 1]} : vector<2x8x256xf32> to vector<2x1x128xf32>
    %15 = vector.shape_cast %14 : vector<2x1x128xf32> to vector<2x128xf32>
    %16 = vector.extract_strided_slice %13 {offsets = [0, 0], sizes = [2, 128], strides = [1, 1]} : vector<2x256xf32> to vector<2x128xf32>
    %17 = arith.addf %15, %16 : vector<2x128xf32>
    %18 = vector.extract_strided_slice %17 {offsets = [0, 0], sizes = [2, 32], strides = [1, 1]} : vector<2x128xf32> to vector<2x32xf32>
    %19 = arith.negf %18 : vector<2x32xf32>
    %20 = math.exp %19 : vector<2x32xf32>
    %cst_9 = arith.constant 1.000000e+00 : f32
    %21 = vector.broadcast %cst_9 : f32 to vector<2x32xf32>
    %22 = arith.addf %21, %20 : vector<2x32xf32>
    %23 = arith.divf %21, %22 : vector<2x32xf32>
    %24 = vector.extract_strided_slice %17 {offsets = [0, 32], sizes = [2, 32], strides = [1, 1]} : vector<2x128xf32> to vector<2x32xf32>
    %25 = arith.negf %24 : vector<2x32xf32>
    %26 = math.exp %25 : vector<2x32xf32>
    %cst_10 = arith.constant 1.000000e+00 : f32
    %27 = vector.broadcast %cst_10 : f32 to vector<2x32xf32>
    %28 = arith.addf %27, %26 : vector<2x32xf32>
    %29 = arith.divf %27, %28 : vector<2x32xf32>
    %30 = vector.extract_strided_slice %17 {offsets = [0, 64], sizes = [2, 32], strides = [1, 1]} : vector<2x128xf32> to vector<2x32xf32>
    %31 = math.tanh %30 : vector<2x32xf32>
    %32 = vector.extract_strided_slice %17 {offsets = [0, 96], sizes = [2, 32], strides = [1, 1]} : vector<2x128xf32> to vector<2x32xf32>
    %33 = arith.negf %32 : vector<2x32xf32>
    %34 = math.exp %33 : vector<2x32xf32>
    %cst_11 = arith.constant 1.000000e+00 : f32
    %35 = vector.broadcast %cst_11 : f32 to vector<2x32xf32>
    %36 = arith.addf %35, %34 : vector<2x32xf32>
    %37 = arith.divf %35, %36 : vector<2x32xf32>
    %38 = arith.mulf %29, %10 : vector<2x32xf32>
    %39 = arith.mulf %23, %31 : vector<2x32xf32>
    %40 = arith.addf %38, %39 : vector<2x32xf32>
    %41 = math.tanh %40 : vector<2x32xf32>
    %42 = arith.mulf %37, %41 : vector<2x32xf32>
    %43 = vector.extract_strided_slice %8 {offsets = [0, 7, 128], sizes = [2, 1, 128], strides = [1, 1, 1]} : vector<2x8x256xf32> to vector<2x1x128xf32>
    %44 = vector.shape_cast %43 : vector<2x1x128xf32> to vector<2x128xf32>
    %45 = vector.extract_strided_slice %13 {offsets = [0, 128], sizes = [2, 128], strides = [1, 1]} : vector<2x256xf32> to vector<2x128xf32>
    %46 = arith.addf %44, %45 : vector<2x128xf32>
    %47 = vector.extract_strided_slice %46 {offsets = [0, 0], sizes = [2, 32], strides = [1, 1]} : vector<2x128xf32> to vector<2x32xf32>
    %48 = arith.negf %47 : vector<2x32xf32>
    %49 = math.exp %48 : vector<2x32xf32>
    %cst_12 = arith.constant 1.000000e+00 : f32
    %50 = vector.broadcast %cst_12 : f32 to vector<2x32xf32>
    %51 = arith.addf %50, %49 : vector<2x32xf32>
    %52 = arith.divf %50, %51 : vector<2x32xf32>
    %53 = vector.extract_strided_slice %46 {offsets = [0, 32], sizes = [2, 32], strides = [1, 1]} : vector<2x128xf32> to vector<2x32xf32>
    %54 = arith.negf %53 : vector<2x32xf32>
    %55 = math.exp %54 : vector<2x32xf32>
    %cst_13 = arith.constant 1.000000e+00 : f32
    %56 = vector.broadcast %cst_13 : f32 to vector<2x32xf32>
    %57 = arith.addf %56, %55 : vector<2x32xf32>
    %58 = arith.divf %56, %57 : vector<2x32xf32>
    %59 = vector.extract_strided_slice %46 {offsets = [0, 64], sizes = [2, 32], strides = [1, 1]} : vector<2x128xf32> to vector<2x32xf32>
    %60 = math.tanh %59 : vector<2x32xf32>
    %61 = vector.extract_strided_slice %46 {offsets = [0, 96], sizes = [2, 32], strides = [1, 1]} : vector<2x128xf32> to vector<2x32xf32>
    %62 = arith.negf %61 : vector<2x32xf32>
    %63 = math.exp %62 : vector<2x32xf32>
    %cst_14 = arith.constant 1.000000e+00 : f32
    %64 = vector.broadcast %cst_14 : f32 to vector<2x32xf32>
    %65 = arith.addf %64, %63 : vector<2x32xf32>
    %66 = arith.divf %64, %65 : vector<2x32xf32>
    %67 = arith.mulf %58, %10 : vector<2x32xf32>
    %68 = arith.mulf %52, %60 : vector<2x32xf32>
    %69 = arith.addf %67, %68 : vector<2x32xf32>
    %70 = math.tanh %69 : vector<2x32xf32>
    %71 = arith.mulf %66, %70 : vector<2x32xf32>
    %72 = tpu.concatenate %42, %71 in 1 : vector<2x32xf32>, vector<2x32xf32> -> vector<2x64xf32>
    %73 = arith.truncf %72 : vector<2x64xf32> to vector<2x64xbf16>
    %cst_15 = arith.constant dense<0.000000e+00> : vector<2x256xf32>
    %74 = tpu.matmul %73, %9, %cst_15 {dimension_numbers = #tpu.dot_dimension_numbers<[1], [0], [0], [1], [0, 0, 1, 1], [], []>} : vector<2x64xbf16>, vector<64x256xbf16>, vector<2x256xf32> -> vector<2x256xf32>
    %75 = vector.extract_strided_slice %8 {offsets = [0, 1, 0], sizes = [2, 1, 128], strides = [1, 1, 1]} : vector<2x8x256xf32> to vector<2x1x128xf32>
    %76 = vector.shape_cast %75 : vector<2x1x128xf32> to vector<2x128xf32>
    %77 = vector.extract_strided_slice %74 {offsets = [0, 0], sizes = [2, 128], strides = [1, 1]} : vector<2x256xf32> to vector<2x128xf32>
    %78 = arith.addf %76, %77 : vector<2x128xf32>
    %79 = vector.extract_strided_slice %78 {offsets = [0, 0], sizes = [2, 32], strides = [1, 1]} : vector<2x128xf32> to vector<2x32xf32>
    %80 = arith.negf %79 : vector<2x32xf32>
    %81 = math.exp %80 : vector<2x32xf32>
    %cst_16 = arith.constant 1.000000e+00 : f32
    %82 = vector.broadcast %cst_16 : f32 to vector<2x32xf32>
    %83 = arith.addf %82, %81 : vector<2x32xf32>
    %84 = arith.divf %82, %83 : vector<2x32xf32>
    %85 = vector.extract_strided_slice %78 {offsets = [0, 32], sizes = [2, 32], strides = [1, 1]} : vector<2x128xf32> to vector<2x32xf32>
    %86 = arith.negf %85 : vector<2x32xf32>
    %87 = math.exp %86 : vector<2x32xf32>
    %cst_17 = arith.constant 1.000000e+00 : f32
    %88 = vector.broadcast %cst_17 : f32 to vector<2x32xf32>
    %89 = arith.addf %88, %87 : vector<2x32xf32>
    %90 = arith.divf %88, %89 : vector<2x32xf32>
    %91 = vector.extract_strided_slice %78 {offsets = [0, 64], sizes = [2, 32], strides = [1, 1]} : vector<2x128xf32> to vector<2x32xf32>
    %92 = math.tanh %91 : vector<2x32xf32>
    %93 = vector.extract_strided_slice %78 {offsets = [0, 96], sizes = [2, 32], strides = [1, 1]} : vector<2x128xf32> to vector<2x32xf32>
    %94 = arith.negf %93 : vector<2x32xf32>
    %95 = math.exp %94 : vector<2x32xf32>
    %cst_18 = arith.constant 1.000000e+00 : f32
    %96 = vector.broadcast %cst_18 : f32 to vector<2x32xf32>
    %97 = arith.addf %96, %95 : vector<2x32xf32>
    %98 = arith.divf %96, %97 : vector<2x32xf32>
    %99 = arith.mulf %90, %40 : vector<2x32xf32>
    %100 = arith.mulf %84, %92 : vector<2x32xf32>
    %101 = arith.addf %99, %100 : vector<2x32xf32>
    %102 = math.tanh %101 : vector<2x32xf32>
    %103 = arith.mulf %98, %102 : vector<2x32xf32>
    %104 = vector.extract_strided_slice %8 {offsets = [0, 6, 128], sizes = [2, 1, 128], strides = [1, 1, 1]} : vector<2x8x256xf32> to vector<2x1x128xf32>
    %105 = vector.shape_cast %104 : vector<2x1x128xf32> to vector<2x128xf32>
    %106 = vector.extract_strided_slice %74 {offsets = [0, 128], sizes = [2, 128], strides = [1, 1]} : vector<2x256xf32> to vector<2x128xf32>
    %107 = arith.addf %105, %106 : vector<2x128xf32>
    %108 = vector.extract_strided_slice %107 {offsets = [0, 0], sizes = [2, 32], strides = [1, 1]} : vector<2x128xf32> to vector<2x32xf32>
    %109 = arith.negf %108 : vector<2x32xf32>
    %110 = math.exp %109 : vector<2x32xf32>
    %cst_19 = arith.constant 1.000000e+00 : f32
    %111 = vector.broadcast %cst_19 : f32 to vector<2x32xf32>
    %112 = arith.addf %111, %110 : vector<2x32xf32>
    %113 = arith.divf %111, %112 : vector<2x32xf32>
    %114 = vector.extract_strided_slice %107 {offsets = [0, 32], sizes = [2, 32], strides = [1, 1]} : vector<2x128xf32> to vector<2x32xf32>
    %115 = arith.negf %114 : vector<2x32xf32>
    %116 = math.exp %115 : vector<2x32xf32>
    %cst_20 = arith.constant 1.000000e+00 : f32
    %117 = vector.broadcast %cst_20 : f32 to vector<2x32xf32>
    %118 = arith.addf %117, %116 : vector<2x32xf32>
    %119 = arith.divf %117, %118 : vector<2x32xf32>
    %120 = vector.extract_strided_slice %107 {offsets = [0, 64], sizes = [2, 32], strides = [1, 1]} : vector<2x128xf32> to vector<2x32xf32>
    %121 = math.tanh %120 : vector<2x32xf32>
    %122 = vector.extract_strided_slice %107 {offsets = [0, 96], sizes = [2, 32], strides = [1, 1]} : vector<2x128xf32> to vector<2x32xf32>
    %123 = arith.negf %122 : vector<2x32xf32>
    %124 = math.exp %123 : vector<2x32xf32>
    %cst_21 = arith.constant 1.000000e+00 : f32
    %125 = vector.broadcast %cst_21 : f32 to vector<2x32xf32>
    %126 = arith.addf %125, %124 : vector<2x32xf32>
    %127 = arith.divf %125, %126 : vector<2x32xf32>
    %128 = arith.mulf %119, %69 : vector<2x32xf32>
    %129 = arith.mulf %113, %121 : vector<2x32xf32>
    %130 = arith.addf %128, %129 : vector<2x32xf32>
    %131 = math.tanh %130 : vector<2x32xf32>
    %132 = arith.mulf %127, %131 : vector<2x32xf32>
    %133 = tpu.concatenate %103, %132 in 1 : vector<2x32xf32>, vector<2x32xf32> -> vector<2x64xf32>
    %134 = arith.truncf %133 : vector<2x64xf32> to vector<2x64xbf16>
    %cst_22 = arith.constant dense<0.000000e+00> : vector<2x256xf32>
    %135 = tpu.matmul %134, %9, %cst_22 {dimension_numbers = #tpu.dot_dimension_numbers<[1], [0], [0], [1], [0, 0, 1, 1], [], []>} : vector<2x64xbf16>, vector<64x256xbf16>, vector<2x256xf32> -> vector<2x256xf32>
    %136 = vector.extract_strided_slice %8 {offsets = [0, 2, 0], sizes = [2, 1, 128], strides = [1, 1, 1]} : vector<2x8x256xf32> to vector<2x1x128xf32>
    %137 = vector.shape_cast %136 : vector<2x1x128xf32> to vector<2x128xf32>
    %138 = vector.extract_strided_slice %135 {offsets = [0, 0], sizes = [2, 128], strides = [1, 1]} : vector<2x256xf32> to vector<2x128xf32>
    %139 = arith.addf %137, %138 : vector<2x128xf32>
    %140 = vector.extract_strided_slice %139 {offsets = [0, 0], sizes = [2, 32], strides = [1, 1]} : vector<2x128xf32> to vector<2x32xf32>
    %141 = arith.negf %140 : vector<2x32xf32>
    %142 = math.exp %141 : vector<2x32xf32>
    %cst_23 = arith.constant 1.000000e+00 : f32
    %143 = vector.broadcast %cst_23 : f32 to vector<2x32xf32>
    %144 = arith.addf %143, %142 : vector<2x32xf32>
    %145 = arith.divf %143, %144 : vector<2x32xf32>
    %146 = vector.extract_strided_slice %139 {offsets = [0, 32], sizes = [2, 32], strides = [1, 1]} : vector<2x128xf32> to vector<2x32xf32>
    %147 = arith.negf %146 : vector<2x32xf32>
    %148 = math.exp %147 : vector<2x32xf32>
    %cst_24 = arith.constant 1.000000e+00 : f32
    %149 = vector.broadcast %cst_24 : f32 to vector<2x32xf32>
    %150 = arith.addf %149, %148 : vector<2x32xf32>
    %151 = arith.divf %149, %150 : vector<2x32xf32>
    %152 = vector.extract_strided_slice %139 {offsets = [0, 64], sizes = [2, 32], strides = [1, 1]} : vector<2x128xf32> to vector<2x32xf32>
    %153 = math.tanh %152 : vector<2x32xf32>
    %154 = vector.extract_strided_slice %139 {offsets = [0, 96], sizes = [2, 32], strides = [1, 1]} : vector<2x128xf32> to vector<2x32xf32>
    %155 = arith.negf %154 : vector<2x32xf32>
    %156 = math.exp %155 : vector<2x32xf32>
    %cst_25 = arith.constant 1.000000e+00 : f32
    %157 = vector.broadcast %cst_25 : f32 to vector<2x32xf32>
    %158 = arith.addf %157, %156 : vector<2x32xf32>
    %159 = arith.divf %157, %158 : vector<2x32xf32>
    %160 = arith.mulf %151, %101 : vector<2x32xf32>
    %161 = arith.mulf %145, %153 : vector<2x32xf32>
    %162 = arith.addf %160, %161 : vector<2x32xf32>
    %163 = math.tanh %162 : vector<2x32xf32>
    %164 = arith.mulf %159, %163 : vector<2x32xf32>
    %165 = vector.extract_strided_slice %8 {offsets = [0, 5, 128], sizes = [2, 1, 128], strides = [1, 1, 1]} : vector<2x8x256xf32> to vector<2x1x128xf32>
    %166 = vector.shape_cast %165 : vector<2x1x128xf32> to vector<2x128xf32>
    %167 = vector.extract_strided_slice %135 {offsets = [0, 128], sizes = [2, 128], strides = [1, 1]} : vector<2x256xf32> to vector<2x128xf32>
    %168 = arith.addf %166, %167 : vector<2x128xf32>
    %169 = vector.extract_strided_slice %168 {offsets = [0, 0], sizes = [2, 32], strides = [1, 1]} : vector<2x128xf32> to vector<2x32xf32>
    %170 = arith.negf %169 : vector<2x32xf32>
    %171 = math.exp %170 : vector<2x32xf32>
    %cst_26 = arith.constant 1.000000e+00 : f32
    %172 = vector.broadcast %cst_26 : f32 to vector<2x32xf32>
    %173 = arith.addf %172, %171 : vector<2x32xf32>
    %174 = arith.divf %172, %173 : vector<2x32xf32>
    %175 = vector.extract_strided_slice %168 {offsets = [0, 32], sizes = [2, 32], strides = [1, 1]} : vector<2x128xf32> to vector<2x32xf32>
    %176 = arith.negf %175 : vector<2x32xf32>
    %177 = math.exp %176 : vector<2x32xf32>
    %cst_27 = arith.constant 1.000000e+00 : f32
    %178 = vector.broadcast %cst_27 : f32 to vector<2x32xf32>
    %179 = arith.addf %178, %177 : vector<2x32xf32>
    %180 = arith.divf %178, %179 : vector<2x32xf32>
    %181 = vector.extract_strided_slice %168 {offsets = [0, 64], sizes = [2, 32], strides = [1, 1]} : vector<2x128xf32> to vector<2x32xf32>
    %182 = math.tanh %181 : vector<2x32xf32>
    %183 = vector.extract_strided_slice %168 {offsets = [0, 96], sizes = [2, 32], strides = [1, 1]} : vector<2x128xf32> to vector<2x32xf32>
    %184 = arith.negf %183 : vector<2x32xf32>
    %185 = math.exp %184 : vector<2x32xf32>
    %cst_28 = arith.constant 1.000000e+00 : f32
    %186 = vector.broadcast %cst_28 : f32 to vector<2x32xf32>
    %187 = arith.addf %186, %185 : vector<2x32xf32>
    %188 = arith.divf %186, %187 : vector<2x32xf32>
    %189 = arith.mulf %180, %130 : vector<2x32xf32>
    %190 = arith.mulf %174, %182 : vector<2x32xf32>
    %191 = arith.addf %189, %190 : vector<2x32xf32>
    %192 = math.tanh %191 : vector<2x32xf32>
    %193 = arith.mulf %188, %192 : vector<2x32xf32>
    %194 = tpu.concatenate %164, %193 in 1 : vector<2x32xf32>, vector<2x32xf32> -> vector<2x64xf32>
    %195 = arith.truncf %194 : vector<2x64xf32> to vector<2x64xbf16>
    %cst_29 = arith.constant dense<0.000000e+00> : vector<2x256xf32>
    %196 = tpu.matmul %195, %9, %cst_29 {dimension_numbers = #tpu.dot_dimension_numbers<[1], [0], [0], [1], [0, 0, 1, 1], [], []>} : vector<2x64xbf16>, vector<64x256xbf16>, vector<2x256xf32> -> vector<2x256xf32>
    %197 = vector.extract_strided_slice %8 {offsets = [0, 3, 0], sizes = [2, 1, 128], strides = [1, 1, 1]} : vector<2x8x256xf32> to vector<2x1x128xf32>
    %198 = vector.shape_cast %197 : vector<2x1x128xf32> to vector<2x128xf32>
    %199 = vector.extract_strided_slice %196 {offsets = [0, 0], sizes = [2, 128], strides = [1, 1]} : vector<2x256xf32> to vector<2x128xf32>
    %200 = arith.addf %198, %199 : vector<2x128xf32>
    %201 = vector.extract_strided_slice %200 {offsets = [0, 0], sizes = [2, 32], strides = [1, 1]} : vector<2x128xf32> to vector<2x32xf32>
    %202 = arith.negf %201 : vector<2x32xf32>
    %203 = math.exp %202 : vector<2x32xf32>
    %cst_30 = arith.constant 1.000000e+00 : f32
    %204 = vector.broadcast %cst_30 : f32 to vector<2x32xf32>
    %205 = arith.addf %204, %203 : vector<2x32xf32>
    %206 = arith.divf %204, %205 : vector<2x32xf32>
    %207 = vector.extract_strided_slice %200 {offsets = [0, 32], sizes = [2, 32], strides = [1, 1]} : vector<2x128xf32> to vector<2x32xf32>
    %208 = arith.negf %207 : vector<2x32xf32>
    %209 = math.exp %208 : vector<2x32xf32>
    %cst_31 = arith.constant 1.000000e+00 : f32
    %210 = vector.broadcast %cst_31 : f32 to vector<2x32xf32>
    %211 = arith.addf %210, %209 : vector<2x32xf32>
    %212 = arith.divf %210, %211 : vector<2x32xf32>
    %213 = vector.extract_strided_slice %200 {offsets = [0, 64], sizes = [2, 32], strides = [1, 1]} : vector<2x128xf32> to vector<2x32xf32>
    %214 = math.tanh %213 : vector<2x32xf32>
    %215 = vector.extract_strided_slice %200 {offsets = [0, 96], sizes = [2, 32], strides = [1, 1]} : vector<2x128xf32> to vector<2x32xf32>
    %216 = arith.negf %215 : vector<2x32xf32>
    %217 = math.exp %216 : vector<2x32xf32>
    %cst_32 = arith.constant 1.000000e+00 : f32
    %218 = vector.broadcast %cst_32 : f32 to vector<2x32xf32>
    %219 = arith.addf %218, %217 : vector<2x32xf32>
    %220 = arith.divf %218, %219 : vector<2x32xf32>
    %221 = arith.mulf %212, %162 : vector<2x32xf32>
    %222 = arith.mulf %206, %214 : vector<2x32xf32>
    %223 = arith.addf %221, %222 : vector<2x32xf32>
    %224 = math.tanh %223 : vector<2x32xf32>
    %225 = arith.mulf %220, %224 : vector<2x32xf32>
    %226 = vector.extract_strided_slice %8 {offsets = [0, 4, 128], sizes = [2, 1, 128], strides = [1, 1, 1]} : vector<2x8x256xf32> to vector<2x1x128xf32>
    %227 = vector.shape_cast %226 : vector<2x1x128xf32> to vector<2x128xf32>
    %228 = vector.extract_strided_slice %196 {offsets = [0, 128], sizes = [2, 128], strides = [1, 1]} : vector<2x256xf32> to vector<2x128xf32>
    %229 = arith.addf %227, %228 : vector<2x128xf32>
    %230 = vector.extract_strided_slice %229 {offsets = [0, 0], sizes = [2, 32], strides = [1, 1]} : vector<2x128xf32> to vector<2x32xf32>
    %231 = arith.negf %230 : vector<2x32xf32>
    %232 = math.exp %231 : vector<2x32xf32>
    %cst_33 = arith.constant 1.000000e+00 : f32
    %233 = vector.broadcast %cst_33 : f32 to vector<2x32xf32>
    %234 = arith.addf %233, %232 : vector<2x32xf32>
    %235 = arith.divf %233, %234 : vector<2x32xf32>
    %236 = vector.extract_strided_slice %229 {offsets = [0, 32], sizes = [2, 32], strides = [1, 1]} : vector<2x128xf32> to vector<2x32xf32>
    %237 = arith.negf %236 : vector<2x32xf32>
    %238 = math.exp %237 : vector<2x32xf32>
    %cst_34 = arith.constant 1.000000e+00 : f32
    %239 = vector.broadcast %cst_34 : f32 to vector<2x32xf32>
    %240 = arith.addf %239, %238 : vector<2x32xf32>
    %241 = arith.divf %239, %240 : vector<2x32xf32>
    %242 = vector.extract_strided_slice %229 {offsets = [0, 64], sizes = [2, 32], strides = [1, 1]} : vector<2x128xf32> to vector<2x32xf32>
    %243 = math.tanh %242 : vector<2x32xf32>
    %244 = vector.extract_strided_slice %229 {offsets = [0, 96], sizes = [2, 32], strides = [1, 1]} : vector<2x128xf32> to vector<2x32xf32>
    %245 = arith.negf %244 : vector<2x32xf32>
    %246 = math.exp %245 : vector<2x32xf32>
    %cst_35 = arith.constant 1.000000e+00 : f32
    %247 = vector.broadcast %cst_35 : f32 to vector<2x32xf32>
    %248 = arith.addf %247, %246 : vector<2x32xf32>
    %249 = arith.divf %247, %248 : vector<2x32xf32>
    %250 = arith.mulf %241, %191 : vector<2x32xf32>
    %251 = arith.mulf %235, %243 : vector<2x32xf32>
    %252 = arith.addf %250, %251 : vector<2x32xf32>
    %253 = math.tanh %252 : vector<2x32xf32>
    %254 = arith.mulf %249, %253 : vector<2x32xf32>
    %255 = tpu.concatenate %225, %254 in 1 : vector<2x32xf32>, vector<2x32xf32> -> vector<2x64xf32>
    %256 = arith.truncf %255 : vector<2x64xf32> to vector<2x64xbf16>
    %cst_36 = arith.constant dense<0.000000e+00> : vector<2x256xf32>
    %257 = tpu.matmul %256, %9, %cst_36 {dimension_numbers = #tpu.dot_dimension_numbers<[1], [0], [0], [1], [0, 0, 1, 1], [], []>} : vector<2x64xbf16>, vector<64x256xbf16>, vector<2x256xf32> -> vector<2x256xf32>
    %258 = vector.extract_strided_slice %8 {offsets = [0, 4, 0], sizes = [2, 1, 128], strides = [1, 1, 1]} : vector<2x8x256xf32> to vector<2x1x128xf32>
    %259 = vector.shape_cast %258 : vector<2x1x128xf32> to vector<2x128xf32>
    %260 = vector.extract_strided_slice %257 {offsets = [0, 0], sizes = [2, 128], strides = [1, 1]} : vector<2x256xf32> to vector<2x128xf32>
    %261 = arith.addf %259, %260 : vector<2x128xf32>
    %262 = vector.extract_strided_slice %261 {offsets = [0, 0], sizes = [2, 32], strides = [1, 1]} : vector<2x128xf32> to vector<2x32xf32>
    %263 = arith.negf %262 : vector<2x32xf32>
    %264 = math.exp %263 : vector<2x32xf32>
    %cst_37 = arith.constant 1.000000e+00 : f32
    %265 = vector.broadcast %cst_37 : f32 to vector<2x32xf32>
    %266 = arith.addf %265, %264 : vector<2x32xf32>
    %267 = arith.divf %265, %266 : vector<2x32xf32>
    %268 = vector.extract_strided_slice %261 {offsets = [0, 32], sizes = [2, 32], strides = [1, 1]} : vector<2x128xf32> to vector<2x32xf32>
    %269 = arith.negf %268 : vector<2x32xf32>
    %270 = math.exp %269 : vector<2x32xf32>
    %cst_38 = arith.constant 1.000000e+00 : f32
    %271 = vector.broadcast %cst_38 : f32 to vector<2x32xf32>
    %272 = arith.addf %271, %270 : vector<2x32xf32>
    %273 = arith.divf %271, %272 : vector<2x32xf32>
    %274 = vector.extract_strided_slice %261 {offsets = [0, 64], sizes = [2, 32], strides = [1, 1]} : vector<2x128xf32> to vector<2x32xf32>
    %275 = math.tanh %274 : vector<2x32xf32>
    %276 = vector.extract_strided_slice %261 {offsets = [0, 96], sizes = [2, 32], strides = [1, 1]} : vector<2x128xf32> to vector<2x32xf32>
    %277 = arith.negf %276 : vector<2x32xf32>
    %278 = math.exp %277 : vector<2x32xf32>
    %cst_39 = arith.constant 1.000000e+00 : f32
    %279 = vector.broadcast %cst_39 : f32 to vector<2x32xf32>
    %280 = arith.addf %279, %278 : vector<2x32xf32>
    %281 = arith.divf %279, %280 : vector<2x32xf32>
    %282 = arith.mulf %273, %223 : vector<2x32xf32>
    %283 = arith.mulf %267, %275 : vector<2x32xf32>
    %284 = arith.addf %282, %283 : vector<2x32xf32>
    %285 = math.tanh %284 : vector<2x32xf32>
    %286 = arith.mulf %281, %285 : vector<2x32xf32>
    %287 = vector.extract_strided_slice %8 {offsets = [0, 3, 128], sizes = [2, 1, 128], strides = [1, 1, 1]} : vector<2x8x256xf32> to vector<2x1x128xf32>
    %288 = vector.shape_cast %287 : vector<2x1x128xf32> to vector<2x128xf32>
    %289 = vector.extract_strided_slice %257 {offsets = [0, 128], sizes = [2, 128], strides = [1, 1]} : vector<2x256xf32> to vector<2x128xf32>
    %290 = arith.addf %288, %289 : vector<2x128xf32>
    %291 = vector.extract_strided_slice %290 {offsets = [0, 0], sizes = [2, 32], strides = [1, 1]} : vector<2x128xf32> to vector<2x32xf32>
    %292 = arith.negf %291 : vector<2x32xf32>
    %293 = math.exp %292 : vector<2x32xf32>
    %cst_40 = arith.constant 1.000000e+00 : f32
    %294 = vector.broadcast %cst_40 : f32 to vector<2x32xf32>
    %295 = arith.addf %294, %293 : vector<2x32xf32>
    %296 = arith.divf %294, %295 : vector<2x32xf32>
    %297 = vector.extract_strided_slice %290 {offsets = [0, 32], sizes = [2, 32], strides = [1, 1]} : vector<2x128xf32> to vector<2x32xf32>
    %298 = arith.negf %297 : vector<2x32xf32>
    %299 = math.exp %298 : vector<2x32xf32>
    %cst_41 = arith.constant 1.000000e+00 : f32
    %300 = vector.broadcast %cst_41 : f32 to vector<2x32xf32>
    %301 = arith.addf %300, %299 : vector<2x32xf32>
    %302 = arith.divf %300, %301 : vector<2x32xf32>
    %303 = vector.extract_strided_slice %290 {offsets = [0, 64], sizes = [2, 32], strides = [1, 1]} : vector<2x128xf32> to vector<2x32xf32>
    %304 = math.tanh %303 : vector<2x32xf32>
    %305 = vector.extract_strided_slice %290 {offsets = [0, 96], sizes = [2, 32], strides = [1, 1]} : vector<2x128xf32> to vector<2x32xf32>
    %306 = arith.negf %305 : vector<2x32xf32>
    %307 = math.exp %306 : vector<2x32xf32>
    %cst_42 = arith.constant 1.000000e+00 : f32
    %308 = vector.broadcast %cst_42 : f32 to vector<2x32xf32>
    %309 = arith.addf %308, %307 : vector<2x32xf32>
    %310 = arith.divf %308, %309 : vector<2x32xf32>
    %311 = arith.mulf %302, %252 : vector<2x32xf32>
    %312 = arith.mulf %296, %304 : vector<2x32xf32>
    %313 = arith.addf %311, %312 : vector<2x32xf32>
    %314 = math.tanh %313 : vector<2x32xf32>
    %315 = arith.mulf %310, %314 : vector<2x32xf32>
    %316 = tpu.concatenate %286, %315 in 1 : vector<2x32xf32>, vector<2x32xf32> -> vector<2x64xf32>
    %317 = arith.truncf %316 : vector<2x64xf32> to vector<2x64xbf16>
    %cst_43 = arith.constant dense<0.000000e+00> : vector<2x256xf32>
    %318 = tpu.matmul %317, %9, %cst_43 {dimension_numbers = #tpu.dot_dimension_numbers<[1], [0], [0], [1], [0, 0, 1, 1], [], []>} : vector<2x64xbf16>, vector<64x256xbf16>, vector<2x256xf32> -> vector<2x256xf32>
    %319 = vector.extract_strided_slice %8 {offsets = [0, 5, 0], sizes = [2, 1, 128], strides = [1, 1, 1]} : vector<2x8x256xf32> to vector<2x1x128xf32>
    %320 = vector.shape_cast %319 : vector<2x1x128xf32> to vector<2x128xf32>
    %321 = vector.extract_strided_slice %318 {offsets = [0, 0], sizes = [2, 128], strides = [1, 1]} : vector<2x256xf32> to vector<2x128xf32>
    %322 = arith.addf %320, %321 : vector<2x128xf32>
    %323 = vector.extract_strided_slice %322 {offsets = [0, 0], sizes = [2, 32], strides = [1, 1]} : vector<2x128xf32> to vector<2x32xf32>
    %324 = arith.negf %323 : vector<2x32xf32>
    %325 = math.exp %324 : vector<2x32xf32>
    %cst_44 = arith.constant 1.000000e+00 : f32
    %326 = vector.broadcast %cst_44 : f32 to vector<2x32xf32>
    %327 = arith.addf %326, %325 : vector<2x32xf32>
    %328 = arith.divf %326, %327 : vector<2x32xf32>
    %329 = vector.extract_strided_slice %322 {offsets = [0, 32], sizes = [2, 32], strides = [1, 1]} : vector<2x128xf32> to vector<2x32xf32>
    %330 = arith.negf %329 : vector<2x32xf32>
    %331 = math.exp %330 : vector<2x32xf32>
    %cst_45 = arith.constant 1.000000e+00 : f32
    %332 = vector.broadcast %cst_45 : f32 to vector<2x32xf32>
    %333 = arith.addf %332, %331 : vector<2x32xf32>
    %334 = arith.divf %332, %333 : vector<2x32xf32>
    %335 = vector.extract_strided_slice %322 {offsets = [0, 64], sizes = [2, 32], strides = [1, 1]} : vector<2x128xf32> to vector<2x32xf32>
    %336 = math.tanh %335 : vector<2x32xf32>
    %337 = vector.extract_strided_slice %322 {offsets = [0, 96], sizes = [2, 32], strides = [1, 1]} : vector<2x128xf32> to vector<2x32xf32>
    %338 = arith.negf %337 : vector<2x32xf32>
    %339 = math.exp %338 : vector<2x32xf32>
    %cst_46 = arith.constant 1.000000e+00 : f32
    %340 = vector.broadcast %cst_46 : f32 to vector<2x32xf32>
    %341 = arith.addf %340, %339 : vector<2x32xf32>
    %342 = arith.divf %340, %341 : vector<2x32xf32>
    %343 = arith.mulf %334, %284 : vector<2x32xf32>
    %344 = arith.mulf %328, %336 : vector<2x32xf32>
    %345 = arith.addf %343, %344 : vector<2x32xf32>
    %346 = math.tanh %345 : vector<2x32xf32>
    %347 = arith.mulf %342, %346 : vector<2x32xf32>
    %348 = vector.extract_strided_slice %8 {offsets = [0, 2, 128], sizes = [2, 1, 128], strides = [1, 1, 1]} : vector<2x8x256xf32> to vector<2x1x128xf32>
    %349 = vector.shape_cast %348 : vector<2x1x128xf32> to vector<2x128xf32>
    %350 = vector.extract_strided_slice %318 {offsets = [0, 128], sizes = [2, 128], strides = [1, 1]} : vector<2x256xf32> to vector<2x128xf32>
    %351 = arith.addf %349, %350 : vector<2x128xf32>
    %352 = vector.extract_strided_slice %351 {offsets = [0, 0], sizes = [2, 32], strides = [1, 1]} : vector<2x128xf32> to vector<2x32xf32>
    %353 = arith.negf %352 : vector<2x32xf32>
    %354 = math.exp %353 : vector<2x32xf32>
    %cst_47 = arith.constant 1.000000e+00 : f32
    %355 = vector.broadcast %cst_47 : f32 to vector<2x32xf32>
    %356 = arith.addf %355, %354 : vector<2x32xf32>
    %357 = arith.divf %355, %356 : vector<2x32xf32>
    %358 = vector.extract_strided_slice %351 {offsets = [0, 32], sizes = [2, 32], strides = [1, 1]} : vector<2x128xf32> to vector<2x32xf32>
    %359 = arith.negf %358 : vector<2x32xf32>
    %360 = math.exp %359 : vector<2x32xf32>
    %cst_48 = arith.constant 1.000000e+00 : f32
    %361 = vector.broadcast %cst_48 : f32 to vector<2x32xf32>
    %362 = arith.addf %361, %360 : vector<2x32xf32>
    %363 = arith.divf %361, %362 : vector<2x32xf32>
    %364 = vector.extract_strided_slice %351 {offsets = [0, 64], sizes = [2, 32], strides = [1, 1]} : vector<2x128xf32> to vector<2x32xf32>
    %365 = math.tanh %364 : vector<2x32xf32>
    %366 = vector.extract_strided_slice %351 {offsets = [0, 96], sizes = [2, 32], strides = [1, 1]} : vector<2x128xf32> to vector<2x32xf32>
    %367 = arith.negf %366 : vector<2x32xf32>
    %368 = math.exp %367 : vector<2x32xf32>
    %cst_49 = arith.constant 1.000000e+00 : f32
    %369 = vector.broadcast %cst_49 : f32 to vector<2x32xf32>
    %370 = arith.addf %369, %368 : vector<2x32xf32>
    %371 = arith.divf %369, %370 : vector<2x32xf32>
    %372 = arith.mulf %363, %313 : vector<2x32xf32>
    %373 = arith.mulf %357, %365 : vector<2x32xf32>
    %374 = arith.addf %372, %373 : vector<2x32xf32>
    %375 = math.tanh %374 : vector<2x32xf32>
    %376 = arith.mulf %371, %375 : vector<2x32xf32>
    %377 = tpu.concatenate %347, %376 in 1 : vector<2x32xf32>, vector<2x32xf32> -> vector<2x64xf32>
    %378 = arith.truncf %377 : vector<2x64xf32> to vector<2x64xbf16>
    %cst_50 = arith.constant dense<0.000000e+00> : vector<2x256xf32>
    %379 = tpu.matmul %378, %9, %cst_50 {dimension_numbers = #tpu.dot_dimension_numbers<[1], [0], [0], [1], [0, 0, 1, 1], [], []>} : vector<2x64xbf16>, vector<64x256xbf16>, vector<2x256xf32> -> vector<2x256xf32>
    %380 = vector.extract_strided_slice %8 {offsets = [0, 6, 0], sizes = [2, 1, 128], strides = [1, 1, 1]} : vector<2x8x256xf32> to vector<2x1x128xf32>
    %381 = vector.shape_cast %380 : vector<2x1x128xf32> to vector<2x128xf32>
    %382 = vector.extract_strided_slice %379 {offsets = [0, 0], sizes = [2, 128], strides = [1, 1]} : vector<2x256xf32> to vector<2x128xf32>
    %383 = arith.addf %381, %382 : vector<2x128xf32>
    %384 = vector.extract_strided_slice %383 {offsets = [0, 0], sizes = [2, 32], strides = [1, 1]} : vector<2x128xf32> to vector<2x32xf32>
    %385 = arith.negf %384 : vector<2x32xf32>
    %386 = math.exp %385 : vector<2x32xf32>
    %cst_51 = arith.constant 1.000000e+00 : f32
    %387 = vector.broadcast %cst_51 : f32 to vector<2x32xf32>
    %388 = arith.addf %387, %386 : vector<2x32xf32>
    %389 = arith.divf %387, %388 : vector<2x32xf32>
    %390 = vector.extract_strided_slice %383 {offsets = [0, 32], sizes = [2, 32], strides = [1, 1]} : vector<2x128xf32> to vector<2x32xf32>
    %391 = arith.negf %390 : vector<2x32xf32>
    %392 = math.exp %391 : vector<2x32xf32>
    %cst_52 = arith.constant 1.000000e+00 : f32
    %393 = vector.broadcast %cst_52 : f32 to vector<2x32xf32>
    %394 = arith.addf %393, %392 : vector<2x32xf32>
    %395 = arith.divf %393, %394 : vector<2x32xf32>
    %396 = vector.extract_strided_slice %383 {offsets = [0, 64], sizes = [2, 32], strides = [1, 1]} : vector<2x128xf32> to vector<2x32xf32>
    %397 = math.tanh %396 : vector<2x32xf32>
    %398 = vector.extract_strided_slice %383 {offsets = [0, 96], sizes = [2, 32], strides = [1, 1]} : vector<2x128xf32> to vector<2x32xf32>
    %399 = arith.negf %398 : vector<2x32xf32>
    %400 = math.exp %399 : vector<2x32xf32>
    %cst_53 = arith.constant 1.000000e+00 : f32
    %401 = vector.broadcast %cst_53 : f32 to vector<2x32xf32>
    %402 = arith.addf %401, %400 : vector<2x32xf32>
    %403 = arith.divf %401, %402 : vector<2x32xf32>
    %404 = arith.mulf %395, %345 : vector<2x32xf32>
    %405 = arith.mulf %389, %397 : vector<2x32xf32>
    %406 = arith.addf %404, %405 : vector<2x32xf32>
    %407 = math.tanh %406 : vector<2x32xf32>
    %408 = arith.mulf %403, %407 : vector<2x32xf32>
    %409 = vector.extract_strided_slice %8 {offsets = [0, 1, 128], sizes = [2, 1, 128], strides = [1, 1, 1]} : vector<2x8x256xf32> to vector<2x1x128xf32>
    %410 = vector.shape_cast %409 : vector<2x1x128xf32> to vector<2x128xf32>
    %411 = vector.extract_strided_slice %379 {offsets = [0, 128], sizes = [2, 128], strides = [1, 1]} : vector<2x256xf32> to vector<2x128xf32>
    %412 = arith.addf %410, %411 : vector<2x128xf32>
    %413 = vector.extract_strided_slice %412 {offsets = [0, 0], sizes = [2, 32], strides = [1, 1]} : vector<2x128xf32> to vector<2x32xf32>
    %414 = arith.negf %413 : vector<2x32xf32>
    %415 = math.exp %414 : vector<2x32xf32>
    %cst_54 = arith.constant 1.000000e+00 : f32
    %416 = vector.broadcast %cst_54 : f32 to vector<2x32xf32>
    %417 = arith.addf %416, %415 : vector<2x32xf32>
    %418 = arith.divf %416, %417 : vector<2x32xf32>
    %419 = vector.extract_strided_slice %412 {offsets = [0, 32], sizes = [2, 32], strides = [1, 1]} : vector<2x128xf32> to vector<2x32xf32>
    %420 = arith.negf %419 : vector<2x32xf32>
    %421 = math.exp %420 : vector<2x32xf32>
    %cst_55 = arith.constant 1.000000e+00 : f32
    %422 = vector.broadcast %cst_55 : f32 to vector<2x32xf32>
    %423 = arith.addf %422, %421 : vector<2x32xf32>
    %424 = arith.divf %422, %423 : vector<2x32xf32>
    %425 = vector.extract_strided_slice %412 {offsets = [0, 64], sizes = [2, 32], strides = [1, 1]} : vector<2x128xf32> to vector<2x32xf32>
    %426 = math.tanh %425 : vector<2x32xf32>
    %427 = vector.extract_strided_slice %412 {offsets = [0, 96], sizes = [2, 32], strides = [1, 1]} : vector<2x128xf32> to vector<2x32xf32>
    %428 = arith.negf %427 : vector<2x32xf32>
    %429 = math.exp %428 : vector<2x32xf32>
    %cst_56 = arith.constant 1.000000e+00 : f32
    %430 = vector.broadcast %cst_56 : f32 to vector<2x32xf32>
    %431 = arith.addf %430, %429 : vector<2x32xf32>
    %432 = arith.divf %430, %431 : vector<2x32xf32>
    %433 = arith.mulf %424, %374 : vector<2x32xf32>
    %434 = arith.mulf %418, %426 : vector<2x32xf32>
    %435 = arith.addf %433, %434 : vector<2x32xf32>
    %436 = math.tanh %435 : vector<2x32xf32>
    %437 = arith.mulf %432, %436 : vector<2x32xf32>
    %438 = tpu.concatenate %408, %437 in 1 : vector<2x32xf32>, vector<2x32xf32> -> vector<2x64xf32>
    %439 = arith.truncf %438 : vector<2x64xf32> to vector<2x64xbf16>
    %cst_57 = arith.constant dense<0.000000e+00> : vector<2x256xf32>
    %440 = tpu.matmul %439, %9, %cst_57 {dimension_numbers = #tpu.dot_dimension_numbers<[1], [0], [0], [1], [0, 0, 1, 1], [], []>} : vector<2x64xbf16>, vector<64x256xbf16>, vector<2x256xf32> -> vector<2x256xf32>
    %441 = vector.extract_strided_slice %8 {offsets = [0, 7, 0], sizes = [2, 1, 128], strides = [1, 1, 1]} : vector<2x8x256xf32> to vector<2x1x128xf32>
    %442 = vector.shape_cast %441 : vector<2x1x128xf32> to vector<2x128xf32>
    %443 = vector.extract_strided_slice %440 {offsets = [0, 0], sizes = [2, 128], strides = [1, 1]} : vector<2x256xf32> to vector<2x128xf32>
    %444 = arith.addf %442, %443 : vector<2x128xf32>
    %445 = vector.extract_strided_slice %444 {offsets = [0, 0], sizes = [2, 32], strides = [1, 1]} : vector<2x128xf32> to vector<2x32xf32>
    %446 = arith.negf %445 : vector<2x32xf32>
    %447 = math.exp %446 : vector<2x32xf32>
    %cst_58 = arith.constant 1.000000e+00 : f32
    %448 = vector.broadcast %cst_58 : f32 to vector<2x32xf32>
    %449 = arith.addf %448, %447 : vector<2x32xf32>
    %450 = arith.divf %448, %449 : vector<2x32xf32>
    %451 = vector.extract_strided_slice %444 {offsets = [0, 32], sizes = [2, 32], strides = [1, 1]} : vector<2x128xf32> to vector<2x32xf32>
    %452 = arith.negf %451 : vector<2x32xf32>
    %453 = math.exp %452 : vector<2x32xf32>
    %cst_59 = arith.constant 1.000000e+00 : f32
    %454 = vector.broadcast %cst_59 : f32 to vector<2x32xf32>
    %455 = arith.addf %454, %453 : vector<2x32xf32>
    %456 = arith.divf %454, %455 : vector<2x32xf32>
    %457 = vector.extract_strided_slice %444 {offsets = [0, 64], sizes = [2, 32], strides = [1, 1]} : vector<2x128xf32> to vector<2x32xf32>
    %458 = math.tanh %457 : vector<2x32xf32>
    %459 = vector.extract_strided_slice %444 {offsets = [0, 96], sizes = [2, 32], strides = [1, 1]} : vector<2x128xf32> to vector<2x32xf32>
    %460 = arith.negf %459 : vector<2x32xf32>
    %461 = math.exp %460 : vector<2x32xf32>
    %cst_60 = arith.constant 1.000000e+00 : f32
    %462 = vector.broadcast %cst_60 : f32 to vector<2x32xf32>
    %463 = arith.addf %462, %461 : vector<2x32xf32>
    %464 = arith.divf %462, %463 : vector<2x32xf32>
    %465 = arith.mulf %456, %406 : vector<2x32xf32>
    %466 = arith.mulf %450, %458 : vector<2x32xf32>
    %467 = arith.addf %465, %466 : vector<2x32xf32>
    %468 = math.tanh %467 : vector<2x32xf32>
    %469 = arith.mulf %464, %468 : vector<2x32xf32>
    %470 = vector.extract_strided_slice %8 {offsets = [0, 0, 128], sizes = [2, 1, 128], strides = [1, 1, 1]} : vector<2x8x256xf32> to vector<2x1x128xf32>
    %471 = vector.shape_cast %470 : vector<2x1x128xf32> to vector<2x128xf32>
    %472 = vector.extract_strided_slice %440 {offsets = [0, 128], sizes = [2, 128], strides = [1, 1]} : vector<2x256xf32> to vector<2x128xf32>
    %473 = arith.addf %471, %472 : vector<2x128xf32>
    %474 = vector.extract_strided_slice %473 {offsets = [0, 0], sizes = [2, 32], strides = [1, 1]} : vector<2x128xf32> to vector<2x32xf32>
    %475 = arith.negf %474 : vector<2x32xf32>
    %476 = math.exp %475 : vector<2x32xf32>
    %cst_61 = arith.constant 1.000000e+00 : f32
    %477 = vector.broadcast %cst_61 : f32 to vector<2x32xf32>
    %478 = arith.addf %477, %476 : vector<2x32xf32>
    %479 = arith.divf %477, %478 : vector<2x32xf32>
    %480 = vector.extract_strided_slice %473 {offsets = [0, 32], sizes = [2, 32], strides = [1, 1]} : vector<2x128xf32> to vector<2x32xf32>
    %481 = arith.negf %480 : vector<2x32xf32>
    %482 = math.exp %481 : vector<2x32xf32>
    %cst_62 = arith.constant 1.000000e+00 : f32
    %483 = vector.broadcast %cst_62 : f32 to vector<2x32xf32>
    %484 = arith.addf %483, %482 : vector<2x32xf32>
    %485 = arith.divf %483, %484 : vector<2x32xf32>
    %486 = vector.extract_strided_slice %473 {offsets = [0, 64], sizes = [2, 32], strides = [1, 1]} : vector<2x128xf32> to vector<2x32xf32>
    %487 = math.tanh %486 : vector<2x32xf32>
    %488 = vector.extract_strided_slice %473 {offsets = [0, 96], sizes = [2, 32], strides = [1, 1]} : vector<2x128xf32> to vector<2x32xf32>
    %489 = arith.negf %488 : vector<2x32xf32>
    %490 = math.exp %489 : vector<2x32xf32>
    %cst_63 = arith.constant 1.000000e+00 : f32
    %491 = vector.broadcast %cst_63 : f32 to vector<2x32xf32>
    %492 = arith.addf %491, %490 : vector<2x32xf32>
    %493 = arith.divf %491, %492 : vector<2x32xf32>
    %494 = arith.mulf %485, %435 : vector<2x32xf32>
    %495 = arith.mulf %479, %487 : vector<2x32xf32>
    %496 = arith.addf %494, %495 : vector<2x32xf32>
    %497 = math.tanh %496 : vector<2x32xf32>
    %498 = arith.mulf %493, %497 : vector<2x32xf32>
    %499 = tpu.concatenate %469, %498, %467, %496 in 1 : vector<2x32xf32>, vector<2x32xf32>, vector<2x32xf32>, vector<2x32xf32> -> vector<2x128xf32>
    %500 = arith.truncf %499 : vector<2x128xf32> to vector<2x128xbf16>
    %c288 = arith.constant 288 : index
    %c0_64 = arith.constant 0 : index
    %501 = vector.load %arg5[%c288, %c0_64] : memref<512x256xbf16, #tpu.memory_space<vmem>>, vector<128x64xbf16>
    %cst_65 = arith.constant dense<0.000000e+00> : vector<2x64xf32>
    %502 = tpu.matmul %500, %501, %cst_65 {dimension_numbers = #tpu.dot_dimension_numbers<[1], [0], [0], [1], [0, 0, 1, 1], [], []>} : vector<2x128xbf16>, vector<128x64xbf16>, vector<2x64xf32> -> vector<2x64xf32>
    %c4 = arith.constant 4 : index
    %c0_66 = arith.constant 0 : index
    %503 = vector.load %arg6[%c4, %c0_66] : memref<8x256xf32, #tpu.memory_space<vmem>>, vector<1x64xf32>
    %504 = vector.broadcast %503 : vector<1x64xf32> to vector<2x64xf32>
    %505 = arith.addf %502, %504 : vector<2x64xf32>
    %506 = math.tanh %505 : vector<2x64xf32>
    %507 = vector.extract_strided_slice %506 {offsets = [0, 0], sizes = [2, 32], strides = [1, 1]} : vector<2x64xf32> to vector<2x32xf32>
    %508 = vector.extract_strided_slice %506 {offsets = [0, 32], sizes = [2, 32], strides = [1, 1]} : vector<2x64xf32> to vector<2x32xf32>
    %509 = tpu.concatenate %42, %498 in 1 : vector<2x32xf32>, vector<2x32xf32> -> vector<2x64xf32>
    %510 = tpu.concatenate %103, %437 in 1 : vector<2x32xf32>, vector<2x32xf32> -> vector<2x64xf32>
    %511 = tpu.concatenate %164, %376 in 1 : vector<2x32xf32>, vector<2x32xf32> -> vector<2x64xf32>
    %512 = tpu.concatenate %225, %315 in 1 : vector<2x32xf32>, vector<2x32xf32> -> vector<2x64xf32>
    %513 = tpu.concatenate %286, %254 in 1 : vector<2x32xf32>, vector<2x32xf32> -> vector<2x64xf32>
    %514 = tpu.concatenate %347, %193 in 1 : vector<2x32xf32>, vector<2x32xf32> -> vector<2x64xf32>
    %515 = tpu.concatenate %408, %132 in 1 : vector<2x32xf32>, vector<2x32xf32> -> vector<2x64xf32>
    %516 = tpu.concatenate %469, %71 in 1 : vector<2x32xf32>, vector<2x32xf32> -> vector<2x64xf32>
    %517 = vector.shape_cast %509 : vector<2x64xf32> to vector<2x1x64xf32>
    %518 = vector.shape_cast %510 : vector<2x64xf32> to vector<2x1x64xf32>
    %519 = vector.shape_cast %511 : vector<2x64xf32> to vector<2x1x64xf32>
    %520 = vector.shape_cast %512 : vector<2x64xf32> to vector<2x1x64xf32>
    %521 = vector.shape_cast %513 : vector<2x64xf32> to vector<2x1x64xf32>
    %522 = vector.shape_cast %514 : vector<2x64xf32> to vector<2x1x64xf32>
    %523 = vector.shape_cast %515 : vector<2x64xf32> to vector<2x1x64xf32>
    %524 = vector.shape_cast %516 : vector<2x64xf32> to vector<2x1x64xf32>
    %525 = tpu.concatenate %517, %518, %519, %520, %521, %522, %523, %524 in 1 : vector<2x1x64xf32>, vector<2x1x64xf32>, vector<2x1x64xf32>, vector<2x1x64xf32>, vector<2x1x64xf32>, vector<2x1x64xf32>, vector<2x1x64xf32>, vector<2x1x64xf32> -> vector<2x8x64xf32>
    %526 = vector.shape_cast %525 : vector<2x8x64xf32> to vector<16x64xf32>
    %527 = arith.truncf %526 : vector<16x64xf32> to vector<16x64xbf16>
    %c224 = arith.constant 224 : index
    %c0_67 = arith.constant 0 : index
    %528 = vector.load %arg5[%c224, %c0_67] : memref<512x256xbf16, #tpu.memory_space<vmem>>, vector<64x256xbf16>
    %cst_68 = arith.constant dense<0.000000e+00> : vector<16x256xf32>
    %529 = tpu.matmul %527, %528, %cst_68 {dimension_numbers = #tpu.dot_dimension_numbers<[1], [0], [0], [1], [0, 0, 1, 1], [], []>} : vector<16x64xbf16>, vector<64x256xbf16>, vector<16x256xf32> -> vector<16x256xf32>
    %c3 = arith.constant 3 : index
    %c0_69 = arith.constant 0 : index
    %530 = vector.load %arg6[%c3, %c0_69] : memref<8x256xf32, #tpu.memory_space<vmem>>, vector<1x256xf32>
    %531 = vector.broadcast %530 : vector<1x256xf32> to vector<16x256xf32>
    %532 = arith.addf %529, %531 : vector<16x256xf32>
    %533 = vector.extract_strided_slice %532 {offsets = [0, 0], sizes = [16, 128], strides = [1, 1]} : vector<16x256xf32> to vector<16x128xf32>
    %534 = vector.shape_cast %533 : vector<16x128xf32> to vector<2x8x128xf32>
    %535 = vector.extract_strided_slice %532 {offsets = [0, 128], sizes = [16, 32], strides = [1, 1]} : vector<16x256xf32> to vector<16x32xf32>
    %536 = vector.shape_cast %535 : vector<16x32xf32> to vector<2x8x32xf32>
    %c0_70 = arith.constant 0 : index
    %c0_71 = arith.constant 0 : index
    %c0_72 = arith.constant 0 : index
    %537 = vector.load %arg2[%c0_70, %c0_71, %c0_72] : memref<2x8x32xf32, #tpu.memory_space<vmem>>, vector<2x8x32xf32>
    %538 = vector.shape_cast %537 : vector<2x8x32xf32> to vector<16x32xf32>
    %539 = arith.truncf %538 : vector<16x32xf32> to vector<16x32xbf16>
    %c96 = arith.constant 96 : index
    %c0_73 = arith.constant 0 : index
    %540 = vector.load %arg5[%c96, %c0_73] : memref<512x256xbf16, #tpu.memory_space<vmem>>, vector<32x128xbf16>
    %cst_74 = arith.constant dense<0.000000e+00> : vector<16x128xf32>
    %541 = tpu.matmul %539, %540, %cst_74 {dimension_numbers = #tpu.dot_dimension_numbers<[1], [0], [0], [1], [0, 0, 1, 1], [], []>} : vector<16x32xbf16>, vector<32x128xbf16>, vector<16x128xf32> -> vector<16x128xf32>
    %c1 = arith.constant 1 : index
    %c0_75 = arith.constant 0 : index
    %542 = vector.load %arg6[%c1, %c0_75] : memref<8x256xf32, #tpu.memory_space<vmem>>, vector<1x128xf32>
    %543 = vector.broadcast %542 : vector<1x128xf32> to vector<16x128xf32>
    %544 = arith.addf %541, %543 : vector<16x128xf32>
    %545 = vector.shape_cast %544 : vector<16x128xf32> to vector<2x8x128xf32>
    %c0_76 = arith.constant 0 : index
    %c0_77 = arith.constant 0 : index
    %546 = vector.load %arg3[%c0_76, %c0_77] : memref<2x8xf32, #tpu.memory_space<vmem>>, vector<2x8xf32>
    %cst_78 = arith.constant 5.000000e-01 : f32
    %547 = vector.broadcast %cst_78 : f32 to vector<2x8xf32>
    %548 = arith.cmpf ogt, %546, %547 : vector<2x8xf32>
    %c192 = arith.constant 192 : index
    %c0_79 = arith.constant 0 : index
    %549 = vector.load %arg5[%c192, %c0_79] : memref<512x256xbf16, #tpu.memory_space<vmem>>, vector<32x128xbf16>
    %c2 = arith.constant 2 : index
    %c0_80 = arith.constant 0 : index
    %550 = vector.load %arg6[%c2, %c0_80] : memref<8x256xf32, #tpu.memory_space<vmem>>, vector<1x128xf32>
    %c128 = arith.constant 128 : index
    %c0_81 = arith.constant 0 : index
    %551 = vector.load %arg5[%c128, %c0_81] : memref<512x256xbf16, #tpu.memory_space<vmem>>, vector<64x128xbf16>
    %552 = arith.truncf %507 : vector<2x32xf32> to vector<2x32xbf16>
    %cst_82 = arith.constant dense<0.000000e+00> : vector<2x128xf32>
    %553 = tpu.matmul %552, %549, %cst_82 {dimension_numbers = #tpu.dot_dimension_numbers<[1], [0], [0], [1], [0, 0, 1, 1], [], []>} : vector<2x32xbf16>, vector<32x128xbf16>, vector<2x128xf32> -> vector<2x128xf32>
    %554 = vector.broadcast %550 : vector<1x128xf32> to vector<2x128xf32>
    %555 = arith.addf %553, %554 : vector<2x128xf32>
    %556 = vector.shape_cast %555 : vector<2x128xf32> to vector<2x1x128xf32>
    %557 = vector.broadcast %556 : vector<2x1x128xf32> to vector<2x8x128xf32>
    %558 = arith.mulf %534, %557 : vector<2x8x128xf32>
    %cst_83 = arith.constant dense<0.000000e+00> : vector<2x8xf32>
    %559 = vector.multi_reduction <add>, %558, %cst_83 [2] : vector<2x8x128xf32> to vector<2x8xf32>
    %cst_84 = arith.constant -1.000000e+30 : f32
    %560 = vector.broadcast %cst_84 : f32 to vector<2x8xf32>
    %561 = arith.select %548, %559, %560 : vector<2x8xi1>, vector<2x8xf32>
    %cst_85 = arith.constant dense<0xFF800000> : vector<2xf32>
    %562 = vector.multi_reduction <maximumf>, %561, %cst_85 [1] : vector<2x8xf32> to vector<2xf32>
    %563 = vector.shape_cast %562 : vector<2xf32> to vector<2x1xf32>
    %564 = vector.broadcast %563 : vector<2x1xf32> to vector<2x8xf32>
    %565 = arith.subf %561, %564 : vector<2x8xf32>
    %566 = math.exp %565 : vector<2x8xf32>
    %cst_86 = arith.constant dense<0.000000e+00> : vector<2xf32>
    %567 = vector.multi_reduction <add>, %566, %cst_86 [1] : vector<2x8xf32> to vector<2xf32>
    %568 = vector.shape_cast %567 : vector<2xf32> to vector<2x1xf32>
    %569 = tpu.reciprocal %568 {approx = true} : vector<2x1xf32> -> vector<2x1xf32>
    %570 = vector.broadcast %569 : vector<2x1xf32> to vector<2x8xf32>
    %571 = arith.mulf %566, %570 : vector<2x8xf32>
    %572 = vector.shape_cast %571 : vector<2x8xf32> to vector<2x8x1xf32>
    %573 = vector.broadcast %572 : vector<2x8x1xf32> to vector<2x8x32xf32>
    %574 = arith.mulf %573, %536 : vector<2x8x32xf32>
    %cst_87 = arith.constant dense<0.000000e+00> : vector<2x32xf32>
    %575 = vector.multi_reduction <add>, %574, %cst_87 [1] : vector<2x8x32xf32> to vector<2x32xf32>
    %576 = tpu.concatenate %575, %507 in 1 : vector<2x32xf32>, vector<2x32xf32> -> vector<2x64xf32>
    %577 = arith.truncf %576 : vector<2x64xf32> to vector<2x64xbf16>
    %578 = vector.extract_strided_slice %545 {offsets = [0, 0, 0], sizes = [2, 1, 128], strides = [1, 1, 1]} : vector<2x8x128xf32> to vector<2x1x128xf32>
    %579 = vector.shape_cast %578 : vector<2x1x128xf32> to vector<2x128xf32>
    %cst_88 = arith.constant dense<0.000000e+00> : vector<2x128xf32>
    %580 = tpu.matmul %577, %551, %cst_88 {dimension_numbers = #tpu.dot_dimension_numbers<[1], [0], [0], [1], [0, 0, 1, 1], [], []>} : vector<2x64xbf16>, vector<64x128xbf16>, vector<2x128xf32> -> vector<2x128xf32>
    %581 = arith.addf %579, %580 : vector<2x128xf32>
    %582 = vector.extract_strided_slice %581 {offsets = [0, 0], sizes = [2, 32], strides = [1, 1]} : vector<2x128xf32> to vector<2x32xf32>
    %583 = arith.negf %582 : vector<2x32xf32>
    %584 = math.exp %583 : vector<2x32xf32>
    %cst_89 = arith.constant 1.000000e+00 : f32
    %585 = vector.broadcast %cst_89 : f32 to vector<2x32xf32>
    %586 = arith.addf %585, %584 : vector<2x32xf32>
    %587 = arith.divf %585, %586 : vector<2x32xf32>
    %588 = vector.extract_strided_slice %581 {offsets = [0, 32], sizes = [2, 32], strides = [1, 1]} : vector<2x128xf32> to vector<2x32xf32>
    %589 = arith.negf %588 : vector<2x32xf32>
    %590 = math.exp %589 : vector<2x32xf32>
    %cst_90 = arith.constant 1.000000e+00 : f32
    %591 = vector.broadcast %cst_90 : f32 to vector<2x32xf32>
    %592 = arith.addf %591, %590 : vector<2x32xf32>
    %593 = arith.divf %591, %592 : vector<2x32xf32>
    %594 = vector.extract_strided_slice %581 {offsets = [0, 64], sizes = [2, 32], strides = [1, 1]} : vector<2x128xf32> to vector<2x32xf32>
    %595 = math.tanh %594 : vector<2x32xf32>
    %596 = vector.extract_strided_slice %581 {offsets = [0, 96], sizes = [2, 32], strides = [1, 1]} : vector<2x128xf32> to vector<2x32xf32>
    %597 = arith.negf %596 : vector<2x32xf32>
    %598 = math.exp %597 : vector<2x32xf32>
    %cst_91 = arith.constant 1.000000e+00 : f32
    %599 = vector.broadcast %cst_91 : f32 to vector<2x32xf32>
    %600 = arith.addf %599, %598 : vector<2x32xf32>
    %601 = arith.divf %599, %600 : vector<2x32xf32>
    %602 = arith.mulf %593, %508 : vector<2x32xf32>
    %603 = arith.mulf %587, %595 : vector<2x32xf32>
    %604 = arith.addf %602, %603 : vector<2x32xf32>
    %605 = math.tanh %604 : vector<2x32xf32>
    %606 = arith.mulf %601, %605 : vector<2x32xf32>
    %607 = tpu.concatenate %606, %575 in 1 : vector<2x32xf32>, vector<2x32xf32> -> vector<2x64xf32>
    %608 = arith.truncf %606 : vector<2x32xf32> to vector<2x32xbf16>
    %cst_92 = arith.constant dense<0.000000e+00> : vector<2x128xf32>
    %609 = tpu.matmul %608, %549, %cst_92 {dimension_numbers = #tpu.dot_dimension_numbers<[1], [0], [0], [1], [0, 0, 1, 1], [], []>} : vector<2x32xbf16>, vector<32x128xbf16>, vector<2x128xf32> -> vector<2x128xf32>
    %610 = vector.broadcast %550 : vector<1x128xf32> to vector<2x128xf32>
    %611 = arith.addf %609, %610 : vector<2x128xf32>
    %612 = vector.shape_cast %611 : vector<2x128xf32> to vector<2x1x128xf32>
    %613 = vector.broadcast %612 : vector<2x1x128xf32> to vector<2x8x128xf32>
    %614 = arith.mulf %534, %613 : vector<2x8x128xf32>
    %cst_93 = arith.constant dense<0.000000e+00> : vector<2x8xf32>
    %615 = vector.multi_reduction <add>, %614, %cst_93 [2] : vector<2x8x128xf32> to vector<2x8xf32>
    %cst_94 = arith.constant -1.000000e+30 : f32
    %616 = vector.broadcast %cst_94 : f32 to vector<2x8xf32>
    %617 = arith.select %548, %615, %616 : vector<2x8xi1>, vector<2x8xf32>
    %cst_95 = arith.constant dense<0xFF800000> : vector<2xf32>
    %618 = vector.multi_reduction <maximumf>, %617, %cst_95 [1] : vector<2x8xf32> to vector<2xf32>
    %619 = vector.shape_cast %618 : vector<2xf32> to vector<2x1xf32>
    %620 = vector.broadcast %619 : vector<2x1xf32> to vector<2x8xf32>
    %621 = arith.subf %617, %620 : vector<2x8xf32>
    %622 = math.exp %621 : vector<2x8xf32>
    %cst_96 = arith.constant dense<0.000000e+00> : vector<2xf32>
    %623 = vector.multi_reduction <add>, %622, %cst_96 [1] : vector<2x8xf32> to vector<2xf32>
    %624 = vector.shape_cast %623 : vector<2xf32> to vector<2x1xf32>
    %625 = tpu.reciprocal %624 {approx = true} : vector<2x1xf32> -> vector<2x1xf32>
    %626 = vector.broadcast %625 : vector<2x1xf32> to vector<2x8xf32>
    %627 = arith.mulf %622, %626 : vector<2x8xf32>
    %628 = vector.shape_cast %627 : vector<2x8xf32> to vector<2x8x1xf32>
    %629 = vector.broadcast %628 : vector<2x8x1xf32> to vector<2x8x32xf32>
    %630 = arith.mulf %629, %536 : vector<2x8x32xf32>
    %cst_97 = arith.constant dense<0.000000e+00> : vector<2x32xf32>
    %631 = vector.multi_reduction <add>, %630, %cst_97 [1] : vector<2x8x32xf32> to vector<2x32xf32>
    %632 = tpu.concatenate %631, %606 in 1 : vector<2x32xf32>, vector<2x32xf32> -> vector<2x64xf32>
    %633 = arith.truncf %632 : vector<2x64xf32> to vector<2x64xbf16>
    %634 = vector.extract_strided_slice %545 {offsets = [0, 1, 0], sizes = [2, 1, 128], strides = [1, 1, 1]} : vector<2x8x128xf32> to vector<2x1x128xf32>
    %635 = vector.shape_cast %634 : vector<2x1x128xf32> to vector<2x128xf32>
    %cst_98 = arith.constant dense<0.000000e+00> : vector<2x128xf32>
    %636 = tpu.matmul %633, %551, %cst_98 {dimension_numbers = #tpu.dot_dimension_numbers<[1], [0], [0], [1], [0, 0, 1, 1], [], []>} : vector<2x64xbf16>, vector<64x128xbf16>, vector<2x128xf32> -> vector<2x128xf32>
    %637 = arith.addf %635, %636 : vector<2x128xf32>
    %638 = vector.extract_strided_slice %637 {offsets = [0, 0], sizes = [2, 32], strides = [1, 1]} : vector<2x128xf32> to vector<2x32xf32>
    %639 = arith.negf %638 : vector<2x32xf32>
    %640 = math.exp %639 : vector<2x32xf32>
    %cst_99 = arith.constant 1.000000e+00 : f32
    %641 = vector.broadcast %cst_99 : f32 to vector<2x32xf32>
    %642 = arith.addf %641, %640 : vector<2x32xf32>
    %643 = arith.divf %641, %642 : vector<2x32xf32>
    %644 = vector.extract_strided_slice %637 {offsets = [0, 32], sizes = [2, 32], strides = [1, 1]} : vector<2x128xf32> to vector<2x32xf32>
    %645 = arith.negf %644 : vector<2x32xf32>
    %646 = math.exp %645 : vector<2x32xf32>
    %cst_100 = arith.constant 1.000000e+00 : f32
    %647 = vector.broadcast %cst_100 : f32 to vector<2x32xf32>
    %648 = arith.addf %647, %646 : vector<2x32xf32>
    %649 = arith.divf %647, %648 : vector<2x32xf32>
    %650 = vector.extract_strided_slice %637 {offsets = [0, 64], sizes = [2, 32], strides = [1, 1]} : vector<2x128xf32> to vector<2x32xf32>
    %651 = math.tanh %650 : vector<2x32xf32>
    %652 = vector.extract_strided_slice %637 {offsets = [0, 96], sizes = [2, 32], strides = [1, 1]} : vector<2x128xf32> to vector<2x32xf32>
    %653 = arith.negf %652 : vector<2x32xf32>
    %654 = math.exp %653 : vector<2x32xf32>
    %cst_101 = arith.constant 1.000000e+00 : f32
    %655 = vector.broadcast %cst_101 : f32 to vector<2x32xf32>
    %656 = arith.addf %655, %654 : vector<2x32xf32>
    %657 = arith.divf %655, %656 : vector<2x32xf32>
    %658 = arith.mulf %649, %604 : vector<2x32xf32>
    %659 = arith.mulf %643, %651 : vector<2x32xf32>
    %660 = arith.addf %658, %659 : vector<2x32xf32>
    %661 = math.tanh %660 : vector<2x32xf32>
    %662 = arith.mulf %657, %661 : vector<2x32xf32>
    %663 = tpu.concatenate %662, %631 in 1 : vector<2x32xf32>, vector<2x32xf32> -> vector<2x64xf32>
    %664 = arith.truncf %662 : vector<2x32xf32> to vector<2x32xbf16>
    %cst_102 = arith.constant dense<0.000000e+00> : vector<2x128xf32>
    %665 = tpu.matmul %664, %549, %cst_102 {dimension_numbers = #tpu.dot_dimension_numbers<[1], [0], [0], [1], [0, 0, 1, 1], [], []>} : vector<2x32xbf16>, vector<32x128xbf16>, vector<2x128xf32> -> vector<2x128xf32>
    %666 = vector.broadcast %550 : vector<1x128xf32> to vector<2x128xf32>
    %667 = arith.addf %665, %666 : vector<2x128xf32>
    %668 = vector.shape_cast %667 : vector<2x128xf32> to vector<2x1x128xf32>
    %669 = vector.broadcast %668 : vector<2x1x128xf32> to vector<2x8x128xf32>
    %670 = arith.mulf %534, %669 : vector<2x8x128xf32>
    %cst_103 = arith.constant dense<0.000000e+00> : vector<2x8xf32>
    %671 = vector.multi_reduction <add>, %670, %cst_103 [2] : vector<2x8x128xf32> to vector<2x8xf32>
    %cst_104 = arith.constant -1.000000e+30 : f32
    %672 = vector.broadcast %cst_104 : f32 to vector<2x8xf32>
    %673 = arith.select %548, %671, %672 : vector<2x8xi1>, vector<2x8xf32>
    %cst_105 = arith.constant dense<0xFF800000> : vector<2xf32>
    %674 = vector.multi_reduction <maximumf>, %673, %cst_105 [1] : vector<2x8xf32> to vector<2xf32>
    %675 = vector.shape_cast %674 : vector<2xf32> to vector<2x1xf32>
    %676 = vector.broadcast %675 : vector<2x1xf32> to vector<2x8xf32>
    %677 = arith.subf %673, %676 : vector<2x8xf32>
    %678 = math.exp %677 : vector<2x8xf32>
    %cst_106 = arith.constant dense<0.000000e+00> : vector<2xf32>
    %679 = vector.multi_reduction <add>, %678, %cst_106 [1] : vector<2x8xf32> to vector<2xf32>
    %680 = vector.shape_cast %679 : vector<2xf32> to vector<2x1xf32>
    %681 = tpu.reciprocal %680 {approx = true} : vector<2x1xf32> -> vector<2x1xf32>
    %682 = vector.broadcast %681 : vector<2x1xf32> to vector<2x8xf32>
    %683 = arith.mulf %678, %682 : vector<2x8xf32>
    %684 = vector.shape_cast %683 : vector<2x8xf32> to vector<2x8x1xf32>
    %685 = vector.broadcast %684 : vector<2x8x1xf32> to vector<2x8x32xf32>
    %686 = arith.mulf %685, %536 : vector<2x8x32xf32>
    %cst_107 = arith.constant dense<0.000000e+00> : vector<2x32xf32>
    %687 = vector.multi_reduction <add>, %686, %cst_107 [1] : vector<2x8x32xf32> to vector<2x32xf32>
    %688 = tpu.concatenate %687, %662 in 1 : vector<2x32xf32>, vector<2x32xf32> -> vector<2x64xf32>
    %689 = arith.truncf %688 : vector<2x64xf32> to vector<2x64xbf16>
    %690 = vector.extract_strided_slice %545 {offsets = [0, 2, 0], sizes = [2, 1, 128], strides = [1, 1, 1]} : vector<2x8x128xf32> to vector<2x1x128xf32>
    %691 = vector.shape_cast %690 : vector<2x1x128xf32> to vector<2x128xf32>
    %cst_108 = arith.constant dense<0.000000e+00> : vector<2x128xf32>
    %692 = tpu.matmul %689, %551, %cst_108 {dimension_numbers = #tpu.dot_dimension_numbers<[1], [0], [0], [1], [0, 0, 1, 1], [], []>} : vector<2x64xbf16>, vector<64x128xbf16>, vector<2x128xf32> -> vector<2x128xf32>
    %693 = arith.addf %691, %692 : vector<2x128xf32>
    %694 = vector.extract_strided_slice %693 {offsets = [0, 0], sizes = [2, 32], strides = [1, 1]} : vector<2x128xf32> to vector<2x32xf32>
    %695 = arith.negf %694 : vector<2x32xf32>
    %696 = math.exp %695 : vector<2x32xf32>
    %cst_109 = arith.constant 1.000000e+00 : f32
    %697 = vector.broadcast %cst_109 : f32 to vector<2x32xf32>
    %698 = arith.addf %697, %696 : vector<2x32xf32>
    %699 = arith.divf %697, %698 : vector<2x32xf32>
    %700 = vector.extract_strided_slice %693 {offsets = [0, 32], sizes = [2, 32], strides = [1, 1]} : vector<2x128xf32> to vector<2x32xf32>
    %701 = arith.negf %700 : vector<2x32xf32>
    %702 = math.exp %701 : vector<2x32xf32>
    %cst_110 = arith.constant 1.000000e+00 : f32
    %703 = vector.broadcast %cst_110 : f32 to vector<2x32xf32>
    %704 = arith.addf %703, %702 : vector<2x32xf32>
    %705 = arith.divf %703, %704 : vector<2x32xf32>
    %706 = vector.extract_strided_slice %693 {offsets = [0, 64], sizes = [2, 32], strides = [1, 1]} : vector<2x128xf32> to vector<2x32xf32>
    %707 = math.tanh %706 : vector<2x32xf32>
    %708 = vector.extract_strided_slice %693 {offsets = [0, 96], sizes = [2, 32], strides = [1, 1]} : vector<2x128xf32> to vector<2x32xf32>
    %709 = arith.negf %708 : vector<2x32xf32>
    %710 = math.exp %709 : vector<2x32xf32>
    %cst_111 = arith.constant 1.000000e+00 : f32
    %711 = vector.broadcast %cst_111 : f32 to vector<2x32xf32>
    %712 = arith.addf %711, %710 : vector<2x32xf32>
    %713 = arith.divf %711, %712 : vector<2x32xf32>
    %714 = arith.mulf %705, %660 : vector<2x32xf32>
    %715 = arith.mulf %699, %707 : vector<2x32xf32>
    %716 = arith.addf %714, %715 : vector<2x32xf32>
    %717 = math.tanh %716 : vector<2x32xf32>
    %718 = arith.mulf %713, %717 : vector<2x32xf32>
    %719 = tpu.concatenate %718, %687 in 1 : vector<2x32xf32>, vector<2x32xf32> -> vector<2x64xf32>
    %720 = arith.truncf %718 : vector<2x32xf32> to vector<2x32xbf16>
    %cst_112 = arith.constant dense<0.000000e+00> : vector<2x128xf32>
    %721 = tpu.matmul %720, %549, %cst_112 {dimension_numbers = #tpu.dot_dimension_numbers<[1], [0], [0], [1], [0, 0, 1, 1], [], []>} : vector<2x32xbf16>, vector<32x128xbf16>, vector<2x128xf32> -> vector<2x128xf32>
    %722 = vector.broadcast %550 : vector<1x128xf32> to vector<2x128xf32>
    %723 = arith.addf %721, %722 : vector<2x128xf32>
    %724 = vector.shape_cast %723 : vector<2x128xf32> to vector<2x1x128xf32>
    %725 = vector.broadcast %724 : vector<2x1x128xf32> to vector<2x8x128xf32>
    %726 = arith.mulf %534, %725 : vector<2x8x128xf32>
    %cst_113 = arith.constant dense<0.000000e+00> : vector<2x8xf32>
    %727 = vector.multi_reduction <add>, %726, %cst_113 [2] : vector<2x8x128xf32> to vector<2x8xf32>
    %cst_114 = arith.constant -1.000000e+30 : f32
    %728 = vector.broadcast %cst_114 : f32 to vector<2x8xf32>
    %729 = arith.select %548, %727, %728 : vector<2x8xi1>, vector<2x8xf32>
    %cst_115 = arith.constant dense<0xFF800000> : vector<2xf32>
    %730 = vector.multi_reduction <maximumf>, %729, %cst_115 [1] : vector<2x8xf32> to vector<2xf32>
    %731 = vector.shape_cast %730 : vector<2xf32> to vector<2x1xf32>
    %732 = vector.broadcast %731 : vector<2x1xf32> to vector<2x8xf32>
    %733 = arith.subf %729, %732 : vector<2x8xf32>
    %734 = math.exp %733 : vector<2x8xf32>
    %cst_116 = arith.constant dense<0.000000e+00> : vector<2xf32>
    %735 = vector.multi_reduction <add>, %734, %cst_116 [1] : vector<2x8xf32> to vector<2xf32>
    %736 = vector.shape_cast %735 : vector<2xf32> to vector<2x1xf32>
    %737 = tpu.reciprocal %736 {approx = true} : vector<2x1xf32> -> vector<2x1xf32>
    %738 = vector.broadcast %737 : vector<2x1xf32> to vector<2x8xf32>
    %739 = arith.mulf %734, %738 : vector<2x8xf32>
    %740 = vector.shape_cast %739 : vector<2x8xf32> to vector<2x8x1xf32>
    %741 = vector.broadcast %740 : vector<2x8x1xf32> to vector<2x8x32xf32>
    %742 = arith.mulf %741, %536 : vector<2x8x32xf32>
    %cst_117 = arith.constant dense<0.000000e+00> : vector<2x32xf32>
    %743 = vector.multi_reduction <add>, %742, %cst_117 [1] : vector<2x8x32xf32> to vector<2x32xf32>
    %744 = tpu.concatenate %743, %718 in 1 : vector<2x32xf32>, vector<2x32xf32> -> vector<2x64xf32>
    %745 = arith.truncf %744 : vector<2x64xf32> to vector<2x64xbf16>
    %746 = vector.extract_strided_slice %545 {offsets = [0, 3, 0], sizes = [2, 1, 128], strides = [1, 1, 1]} : vector<2x8x128xf32> to vector<2x1x128xf32>
    %747 = vector.shape_cast %746 : vector<2x1x128xf32> to vector<2x128xf32>
    %cst_118 = arith.constant dense<0.000000e+00> : vector<2x128xf32>
    %748 = tpu.matmul %745, %551, %cst_118 {dimension_numbers = #tpu.dot_dimension_numbers<[1], [0], [0], [1], [0, 0, 1, 1], [], []>} : vector<2x64xbf16>, vector<64x128xbf16>, vector<2x128xf32> -> vector<2x128xf32>
    %749 = arith.addf %747, %748 : vector<2x128xf32>
    %750 = vector.extract_strided_slice %749 {offsets = [0, 0], sizes = [2, 32], strides = [1, 1]} : vector<2x128xf32> to vector<2x32xf32>
    %751 = arith.negf %750 : vector<2x32xf32>
    %752 = math.exp %751 : vector<2x32xf32>
    %cst_119 = arith.constant 1.000000e+00 : f32
    %753 = vector.broadcast %cst_119 : f32 to vector<2x32xf32>
    %754 = arith.addf %753, %752 : vector<2x32xf32>
    %755 = arith.divf %753, %754 : vector<2x32xf32>
    %756 = vector.extract_strided_slice %749 {offsets = [0, 32], sizes = [2, 32], strides = [1, 1]} : vector<2x128xf32> to vector<2x32xf32>
    %757 = arith.negf %756 : vector<2x32xf32>
    %758 = math.exp %757 : vector<2x32xf32>
    %cst_120 = arith.constant 1.000000e+00 : f32
    %759 = vector.broadcast %cst_120 : f32 to vector<2x32xf32>
    %760 = arith.addf %759, %758 : vector<2x32xf32>
    %761 = arith.divf %759, %760 : vector<2x32xf32>
    %762 = vector.extract_strided_slice %749 {offsets = [0, 64], sizes = [2, 32], strides = [1, 1]} : vector<2x128xf32> to vector<2x32xf32>
    %763 = math.tanh %762 : vector<2x32xf32>
    %764 = vector.extract_strided_slice %749 {offsets = [0, 96], sizes = [2, 32], strides = [1, 1]} : vector<2x128xf32> to vector<2x32xf32>
    %765 = arith.negf %764 : vector<2x32xf32>
    %766 = math.exp %765 : vector<2x32xf32>
    %cst_121 = arith.constant 1.000000e+00 : f32
    %767 = vector.broadcast %cst_121 : f32 to vector<2x32xf32>
    %768 = arith.addf %767, %766 : vector<2x32xf32>
    %769 = arith.divf %767, %768 : vector<2x32xf32>
    %770 = arith.mulf %761, %716 : vector<2x32xf32>
    %771 = arith.mulf %755, %763 : vector<2x32xf32>
    %772 = arith.addf %770, %771 : vector<2x32xf32>
    %773 = math.tanh %772 : vector<2x32xf32>
    %774 = arith.mulf %769, %773 : vector<2x32xf32>
    %775 = tpu.concatenate %774, %743 in 1 : vector<2x32xf32>, vector<2x32xf32> -> vector<2x64xf32>
    %776 = arith.truncf %774 : vector<2x32xf32> to vector<2x32xbf16>
    %cst_122 = arith.constant dense<0.000000e+00> : vector<2x128xf32>
    %777 = tpu.matmul %776, %549, %cst_122 {dimension_numbers = #tpu.dot_dimension_numbers<[1], [0], [0], [1], [0, 0, 1, 1], [], []>} : vector<2x32xbf16>, vector<32x128xbf16>, vector<2x128xf32> -> vector<2x128xf32>
    %778 = vector.broadcast %550 : vector<1x128xf32> to vector<2x128xf32>
    %779 = arith.addf %777, %778 : vector<2x128xf32>
    %780 = vector.shape_cast %779 : vector<2x128xf32> to vector<2x1x128xf32>
    %781 = vector.broadcast %780 : vector<2x1x128xf32> to vector<2x8x128xf32>
    %782 = arith.mulf %534, %781 : vector<2x8x128xf32>
    %cst_123 = arith.constant dense<0.000000e+00> : vector<2x8xf32>
    %783 = vector.multi_reduction <add>, %782, %cst_123 [2] : vector<2x8x128xf32> to vector<2x8xf32>
    %cst_124 = arith.constant -1.000000e+30 : f32
    %784 = vector.broadcast %cst_124 : f32 to vector<2x8xf32>
    %785 = arith.select %548, %783, %784 : vector<2x8xi1>, vector<2x8xf32>
    %cst_125 = arith.constant dense<0xFF800000> : vector<2xf32>
    %786 = vector.multi_reduction <maximumf>, %785, %cst_125 [1] : vector<2x8xf32> to vector<2xf32>
    %787 = vector.shape_cast %786 : vector<2xf32> to vector<2x1xf32>
    %788 = vector.broadcast %787 : vector<2x1xf32> to vector<2x8xf32>
    %789 = arith.subf %785, %788 : vector<2x8xf32>
    %790 = math.exp %789 : vector<2x8xf32>
    %cst_126 = arith.constant dense<0.000000e+00> : vector<2xf32>
    %791 = vector.multi_reduction <add>, %790, %cst_126 [1] : vector<2x8xf32> to vector<2xf32>
    %792 = vector.shape_cast %791 : vector<2xf32> to vector<2x1xf32>
    %793 = tpu.reciprocal %792 {approx = true} : vector<2x1xf32> -> vector<2x1xf32>
    %794 = vector.broadcast %793 : vector<2x1xf32> to vector<2x8xf32>
    %795 = arith.mulf %790, %794 : vector<2x8xf32>
    %796 = vector.shape_cast %795 : vector<2x8xf32> to vector<2x8x1xf32>
    %797 = vector.broadcast %796 : vector<2x8x1xf32> to vector<2x8x32xf32>
    %798 = arith.mulf %797, %536 : vector<2x8x32xf32>
    %cst_127 = arith.constant dense<0.000000e+00> : vector<2x32xf32>
    %799 = vector.multi_reduction <add>, %798, %cst_127 [1] : vector<2x8x32xf32> to vector<2x32xf32>
    %800 = tpu.concatenate %799, %774 in 1 : vector<2x32xf32>, vector<2x32xf32> -> vector<2x64xf32>
    %801 = arith.truncf %800 : vector<2x64xf32> to vector<2x64xbf16>
    %802 = vector.extract_strided_slice %545 {offsets = [0, 4, 0], sizes = [2, 1, 128], strides = [1, 1, 1]} : vector<2x8x128xf32> to vector<2x1x128xf32>
    %803 = vector.shape_cast %802 : vector<2x1x128xf32> to vector<2x128xf32>
    %cst_128 = arith.constant dense<0.000000e+00> : vector<2x128xf32>
    %804 = tpu.matmul %801, %551, %cst_128 {dimension_numbers = #tpu.dot_dimension_numbers<[1], [0], [0], [1], [0, 0, 1, 1], [], []>} : vector<2x64xbf16>, vector<64x128xbf16>, vector<2x128xf32> -> vector<2x128xf32>
    %805 = arith.addf %803, %804 : vector<2x128xf32>
    %806 = vector.extract_strided_slice %805 {offsets = [0, 0], sizes = [2, 32], strides = [1, 1]} : vector<2x128xf32> to vector<2x32xf32>
    %807 = arith.negf %806 : vector<2x32xf32>
    %808 = math.exp %807 : vector<2x32xf32>
    %cst_129 = arith.constant 1.000000e+00 : f32
    %809 = vector.broadcast %cst_129 : f32 to vector<2x32xf32>
    %810 = arith.addf %809, %808 : vector<2x32xf32>
    %811 = arith.divf %809, %810 : vector<2x32xf32>
    %812 = vector.extract_strided_slice %805 {offsets = [0, 32], sizes = [2, 32], strides = [1, 1]} : vector<2x128xf32> to vector<2x32xf32>
    %813 = arith.negf %812 : vector<2x32xf32>
    %814 = math.exp %813 : vector<2x32xf32>
    %cst_130 = arith.constant 1.000000e+00 : f32
    %815 = vector.broadcast %cst_130 : f32 to vector<2x32xf32>
    %816 = arith.addf %815, %814 : vector<2x32xf32>
    %817 = arith.divf %815, %816 : vector<2x32xf32>
    %818 = vector.extract_strided_slice %805 {offsets = [0, 64], sizes = [2, 32], strides = [1, 1]} : vector<2x128xf32> to vector<2x32xf32>
    %819 = math.tanh %818 : vector<2x32xf32>
    %820 = vector.extract_strided_slice %805 {offsets = [0, 96], sizes = [2, 32], strides = [1, 1]} : vector<2x128xf32> to vector<2x32xf32>
    %821 = arith.negf %820 : vector<2x32xf32>
    %822 = math.exp %821 : vector<2x32xf32>
    %cst_131 = arith.constant 1.000000e+00 : f32
    %823 = vector.broadcast %cst_131 : f32 to vector<2x32xf32>
    %824 = arith.addf %823, %822 : vector<2x32xf32>
    %825 = arith.divf %823, %824 : vector<2x32xf32>
    %826 = arith.mulf %817, %772 : vector<2x32xf32>
    %827 = arith.mulf %811, %819 : vector<2x32xf32>
    %828 = arith.addf %826, %827 : vector<2x32xf32>
    %829 = math.tanh %828 : vector<2x32xf32>
    %830 = arith.mulf %825, %829 : vector<2x32xf32>
    %831 = tpu.concatenate %830, %799 in 1 : vector<2x32xf32>, vector<2x32xf32> -> vector<2x64xf32>
    %832 = arith.truncf %830 : vector<2x32xf32> to vector<2x32xbf16>
    %cst_132 = arith.constant dense<0.000000e+00> : vector<2x128xf32>
    %833 = tpu.matmul %832, %549, %cst_132 {dimension_numbers = #tpu.dot_dimension_numbers<[1], [0], [0], [1], [0, 0, 1, 1], [], []>} : vector<2x32xbf16>, vector<32x128xbf16>, vector<2x128xf32> -> vector<2x128xf32>
    %834 = vector.broadcast %550 : vector<1x128xf32> to vector<2x128xf32>
    %835 = arith.addf %833, %834 : vector<2x128xf32>
    %836 = vector.shape_cast %835 : vector<2x128xf32> to vector<2x1x128xf32>
    %837 = vector.broadcast %836 : vector<2x1x128xf32> to vector<2x8x128xf32>
    %838 = arith.mulf %534, %837 : vector<2x8x128xf32>
    %cst_133 = arith.constant dense<0.000000e+00> : vector<2x8xf32>
    %839 = vector.multi_reduction <add>, %838, %cst_133 [2] : vector<2x8x128xf32> to vector<2x8xf32>
    %cst_134 = arith.constant -1.000000e+30 : f32
    %840 = vector.broadcast %cst_134 : f32 to vector<2x8xf32>
    %841 = arith.select %548, %839, %840 : vector<2x8xi1>, vector<2x8xf32>
    %cst_135 = arith.constant dense<0xFF800000> : vector<2xf32>
    %842 = vector.multi_reduction <maximumf>, %841, %cst_135 [1] : vector<2x8xf32> to vector<2xf32>
    %843 = vector.shape_cast %842 : vector<2xf32> to vector<2x1xf32>
    %844 = vector.broadcast %843 : vector<2x1xf32> to vector<2x8xf32>
    %845 = arith.subf %841, %844 : vector<2x8xf32>
    %846 = math.exp %845 : vector<2x8xf32>
    %cst_136 = arith.constant dense<0.000000e+00> : vector<2xf32>
    %847 = vector.multi_reduction <add>, %846, %cst_136 [1] : vector<2x8xf32> to vector<2xf32>
    %848 = vector.shape_cast %847 : vector<2xf32> to vector<2x1xf32>
    %849 = tpu.reciprocal %848 {approx = true} : vector<2x1xf32> -> vector<2x1xf32>
    %850 = vector.broadcast %849 : vector<2x1xf32> to vector<2x8xf32>
    %851 = arith.mulf %846, %850 : vector<2x8xf32>
    %852 = vector.shape_cast %851 : vector<2x8xf32> to vector<2x8x1xf32>
    %853 = vector.broadcast %852 : vector<2x8x1xf32> to vector<2x8x32xf32>
    %854 = arith.mulf %853, %536 : vector<2x8x32xf32>
    %cst_137 = arith.constant dense<0.000000e+00> : vector<2x32xf32>
    %855 = vector.multi_reduction <add>, %854, %cst_137 [1] : vector<2x8x32xf32> to vector<2x32xf32>
    %856 = tpu.concatenate %855, %830 in 1 : vector<2x32xf32>, vector<2x32xf32> -> vector<2x64xf32>
    %857 = arith.truncf %856 : vector<2x64xf32> to vector<2x64xbf16>
    %858 = vector.extract_strided_slice %545 {offsets = [0, 5, 0], sizes = [2, 1, 128], strides = [1, 1, 1]} : vector<2x8x128xf32> to vector<2x1x128xf32>
    %859 = vector.shape_cast %858 : vector<2x1x128xf32> to vector<2x128xf32>
    %cst_138 = arith.constant dense<0.000000e+00> : vector<2x128xf32>
    %860 = tpu.matmul %857, %551, %cst_138 {dimension_numbers = #tpu.dot_dimension_numbers<[1], [0], [0], [1], [0, 0, 1, 1], [], []>} : vector<2x64xbf16>, vector<64x128xbf16>, vector<2x128xf32> -> vector<2x128xf32>
    %861 = arith.addf %859, %860 : vector<2x128xf32>
    %862 = vector.extract_strided_slice %861 {offsets = [0, 0], sizes = [2, 32], strides = [1, 1]} : vector<2x128xf32> to vector<2x32xf32>
    %863 = arith.negf %862 : vector<2x32xf32>
    %864 = math.exp %863 : vector<2x32xf32>
    %cst_139 = arith.constant 1.000000e+00 : f32
    %865 = vector.broadcast %cst_139 : f32 to vector<2x32xf32>
    %866 = arith.addf %865, %864 : vector<2x32xf32>
    %867 = arith.divf %865, %866 : vector<2x32xf32>
    %868 = vector.extract_strided_slice %861 {offsets = [0, 32], sizes = [2, 32], strides = [1, 1]} : vector<2x128xf32> to vector<2x32xf32>
    %869 = arith.negf %868 : vector<2x32xf32>
    %870 = math.exp %869 : vector<2x32xf32>
    %cst_140 = arith.constant 1.000000e+00 : f32
    %871 = vector.broadcast %cst_140 : f32 to vector<2x32xf32>
    %872 = arith.addf %871, %870 : vector<2x32xf32>
    %873 = arith.divf %871, %872 : vector<2x32xf32>
    %874 = vector.extract_strided_slice %861 {offsets = [0, 64], sizes = [2, 32], strides = [1, 1]} : vector<2x128xf32> to vector<2x32xf32>
    %875 = math.tanh %874 : vector<2x32xf32>
    %876 = vector.extract_strided_slice %861 {offsets = [0, 96], sizes = [2, 32], strides = [1, 1]} : vector<2x128xf32> to vector<2x32xf32>
    %877 = arith.negf %876 : vector<2x32xf32>
    %878 = math.exp %877 : vector<2x32xf32>
    %cst_141 = arith.constant 1.000000e+00 : f32
    %879 = vector.broadcast %cst_141 : f32 to vector<2x32xf32>
    %880 = arith.addf %879, %878 : vector<2x32xf32>
    %881 = arith.divf %879, %880 : vector<2x32xf32>
    %882 = arith.mulf %873, %828 : vector<2x32xf32>
    %883 = arith.mulf %867, %875 : vector<2x32xf32>
    %884 = arith.addf %882, %883 : vector<2x32xf32>
    %885 = math.tanh %884 : vector<2x32xf32>
    %886 = arith.mulf %881, %885 : vector<2x32xf32>
    %887 = tpu.concatenate %886, %855 in 1 : vector<2x32xf32>, vector<2x32xf32> -> vector<2x64xf32>
    %888 = arith.truncf %886 : vector<2x32xf32> to vector<2x32xbf16>
    %cst_142 = arith.constant dense<0.000000e+00> : vector<2x128xf32>
    %889 = tpu.matmul %888, %549, %cst_142 {dimension_numbers = #tpu.dot_dimension_numbers<[1], [0], [0], [1], [0, 0, 1, 1], [], []>} : vector<2x32xbf16>, vector<32x128xbf16>, vector<2x128xf32> -> vector<2x128xf32>
    %890 = vector.broadcast %550 : vector<1x128xf32> to vector<2x128xf32>
    %891 = arith.addf %889, %890 : vector<2x128xf32>
    %892 = vector.shape_cast %891 : vector<2x128xf32> to vector<2x1x128xf32>
    %893 = vector.broadcast %892 : vector<2x1x128xf32> to vector<2x8x128xf32>
    %894 = arith.mulf %534, %893 : vector<2x8x128xf32>
    %cst_143 = arith.constant dense<0.000000e+00> : vector<2x8xf32>
    %895 = vector.multi_reduction <add>, %894, %cst_143 [2] : vector<2x8x128xf32> to vector<2x8xf32>
    %cst_144 = arith.constant -1.000000e+30 : f32
    %896 = vector.broadcast %cst_144 : f32 to vector<2x8xf32>
    %897 = arith.select %548, %895, %896 : vector<2x8xi1>, vector<2x8xf32>
    %cst_145 = arith.constant dense<0xFF800000> : vector<2xf32>
    %898 = vector.multi_reduction <maximumf>, %897, %cst_145 [1] : vector<2x8xf32> to vector<2xf32>
    %899 = vector.shape_cast %898 : vector<2xf32> to vector<2x1xf32>
    %900 = vector.broadcast %899 : vector<2x1xf32> to vector<2x8xf32>
    %901 = arith.subf %897, %900 : vector<2x8xf32>
    %902 = math.exp %901 : vector<2x8xf32>
    %cst_146 = arith.constant dense<0.000000e+00> : vector<2xf32>
    %903 = vector.multi_reduction <add>, %902, %cst_146 [1] : vector<2x8xf32> to vector<2xf32>
    %904 = vector.shape_cast %903 : vector<2xf32> to vector<2x1xf32>
    %905 = tpu.reciprocal %904 {approx = true} : vector<2x1xf32> -> vector<2x1xf32>
    %906 = vector.broadcast %905 : vector<2x1xf32> to vector<2x8xf32>
    %907 = arith.mulf %902, %906 : vector<2x8xf32>
    %908 = vector.shape_cast %907 : vector<2x8xf32> to vector<2x8x1xf32>
    %909 = vector.broadcast %908 : vector<2x8x1xf32> to vector<2x8x32xf32>
    %910 = arith.mulf %909, %536 : vector<2x8x32xf32>
    %cst_147 = arith.constant dense<0.000000e+00> : vector<2x32xf32>
    %911 = vector.multi_reduction <add>, %910, %cst_147 [1] : vector<2x8x32xf32> to vector<2x32xf32>
    %912 = tpu.concatenate %911, %886 in 1 : vector<2x32xf32>, vector<2x32xf32> -> vector<2x64xf32>
    %913 = arith.truncf %912 : vector<2x64xf32> to vector<2x64xbf16>
    %914 = vector.extract_strided_slice %545 {offsets = [0, 6, 0], sizes = [2, 1, 128], strides = [1, 1, 1]} : vector<2x8x128xf32> to vector<2x1x128xf32>
    %915 = vector.shape_cast %914 : vector<2x1x128xf32> to vector<2x128xf32>
    %cst_148 = arith.constant dense<0.000000e+00> : vector<2x128xf32>
    %916 = tpu.matmul %913, %551, %cst_148 {dimension_numbers = #tpu.dot_dimension_numbers<[1], [0], [0], [1], [0, 0, 1, 1], [], []>} : vector<2x64xbf16>, vector<64x128xbf16>, vector<2x128xf32> -> vector<2x128xf32>
    %917 = arith.addf %915, %916 : vector<2x128xf32>
    %918 = vector.extract_strided_slice %917 {offsets = [0, 0], sizes = [2, 32], strides = [1, 1]} : vector<2x128xf32> to vector<2x32xf32>
    %919 = arith.negf %918 : vector<2x32xf32>
    %920 = math.exp %919 : vector<2x32xf32>
    %cst_149 = arith.constant 1.000000e+00 : f32
    %921 = vector.broadcast %cst_149 : f32 to vector<2x32xf32>
    %922 = arith.addf %921, %920 : vector<2x32xf32>
    %923 = arith.divf %921, %922 : vector<2x32xf32>
    %924 = vector.extract_strided_slice %917 {offsets = [0, 32], sizes = [2, 32], strides = [1, 1]} : vector<2x128xf32> to vector<2x32xf32>
    %925 = arith.negf %924 : vector<2x32xf32>
    %926 = math.exp %925 : vector<2x32xf32>
    %cst_150 = arith.constant 1.000000e+00 : f32
    %927 = vector.broadcast %cst_150 : f32 to vector<2x32xf32>
    %928 = arith.addf %927, %926 : vector<2x32xf32>
    %929 = arith.divf %927, %928 : vector<2x32xf32>
    %930 = vector.extract_strided_slice %917 {offsets = [0, 64], sizes = [2, 32], strides = [1, 1]} : vector<2x128xf32> to vector<2x32xf32>
    %931 = math.tanh %930 : vector<2x32xf32>
    %932 = vector.extract_strided_slice %917 {offsets = [0, 96], sizes = [2, 32], strides = [1, 1]} : vector<2x128xf32> to vector<2x32xf32>
    %933 = arith.negf %932 : vector<2x32xf32>
    %934 = math.exp %933 : vector<2x32xf32>
    %cst_151 = arith.constant 1.000000e+00 : f32
    %935 = vector.broadcast %cst_151 : f32 to vector<2x32xf32>
    %936 = arith.addf %935, %934 : vector<2x32xf32>
    %937 = arith.divf %935, %936 : vector<2x32xf32>
    %938 = arith.mulf %929, %884 : vector<2x32xf32>
    %939 = arith.mulf %923, %931 : vector<2x32xf32>
    %940 = arith.addf %938, %939 : vector<2x32xf32>
    %941 = math.tanh %940 : vector<2x32xf32>
    %942 = arith.mulf %937, %941 : vector<2x32xf32>
    %943 = tpu.concatenate %942, %911 in 1 : vector<2x32xf32>, vector<2x32xf32> -> vector<2x64xf32>
    %cst_152 = arith.constant 0.000000e+00 : f32
    %944 = vector.broadcast %cst_152 : f32 to vector<2x64xf32>
    %945 = vector.shape_cast %607 : vector<2x64xf32> to vector<2x1x64xf32>
    %946 = vector.shape_cast %663 : vector<2x64xf32> to vector<2x1x64xf32>
    %947 = vector.shape_cast %719 : vector<2x64xf32> to vector<2x1x64xf32>
    %948 = vector.shape_cast %775 : vector<2x64xf32> to vector<2x1x64xf32>
    %949 = vector.shape_cast %831 : vector<2x64xf32> to vector<2x1x64xf32>
    %950 = vector.shape_cast %887 : vector<2x64xf32> to vector<2x1x64xf32>
    %951 = vector.shape_cast %943 : vector<2x64xf32> to vector<2x1x64xf32>
    %952 = vector.shape_cast %944 : vector<2x64xf32> to vector<2x1x64xf32>
    %953 = tpu.concatenate %945, %946, %947, %948, %949, %950, %951, %952 in 1 : vector<2x1x64xf32>, vector<2x1x64xf32>, vector<2x1x64xf32>, vector<2x1x64xf32>, vector<2x1x64xf32>, vector<2x1x64xf32>, vector<2x1x64xf32>, vector<2x1x64xf32> -> vector<2x8x64xf32>
    %954 = vector.shape_cast %953 : vector<2x8x64xf32> to vector<16x64xf32>
    %955 = arith.truncf %954 : vector<16x64xf32> to vector<16x64xbf16>
    %c416 = arith.constant 416 : index
    %c0_153 = arith.constant 0 : index
    %956 = vector.load %arg5[%c416, %c0_153] : memref<512x256xbf16, #tpu.memory_space<vmem>>, vector<64x32xbf16>
    %cst_154 = arith.constant dense<0.000000e+00> : vector<16x32xf32>
    %957 = tpu.matmul %955, %956, %cst_154 {dimension_numbers = #tpu.dot_dimension_numbers<[1], [0], [0], [1], [0, 0, 1, 1], [], []>} : vector<16x64xbf16>, vector<64x32xbf16>, vector<16x32xf32> -> vector<16x32xf32>
    %c5 = arith.constant 5 : index
    %c0_155 = arith.constant 0 : index
    %958 = vector.load %arg6[%c5, %c0_155] : memref<8x256xf32, #tpu.memory_space<vmem>>, vector<1x32xf32>
    %959 = vector.broadcast %958 : vector<1x32xf32> to vector<16x32xf32>
    %960 = arith.addf %957, %959 : vector<16x32xf32>
    %961 = math.tanh %960 : vector<16x32xf32>
    %962 = arith.truncf %961 : vector<16x32xf32> to vector<16x32xbf16>
    %c480 = arith.constant 480 : index
    %c0_156 = arith.constant 0 : index
    %963 = vector.load %arg5[%c480, %c0_156] : memref<512x256xbf16, #tpu.memory_space<vmem>>, vector<32x128xbf16>
    %cst_157 = arith.constant dense<0.000000e+00> : vector<16x128xf32>
    %964 = tpu.matmul %962, %963, %cst_157 {dimension_numbers = #tpu.dot_dimension_numbers<[1], [0], [0], [1], [0, 0, 1, 1], [], []>} : vector<16x32xbf16>, vector<32x128xbf16>, vector<16x128xf32> -> vector<16x128xf32>
    %c6 = arith.constant 6 : index
    %c0_158 = arith.constant 0 : index
    %965 = vector.load %arg6[%c6, %c0_158] : memref<8x256xf32, #tpu.memory_space<vmem>>, vector<1x128xf32>
    %966 = vector.broadcast %965 : vector<1x128xf32> to vector<16x128xf32>
    %967 = arith.addf %964, %966 : vector<16x128xf32>
    %968 = tpu.iota {dimensions = array<i32: 1>} : vector<16x128xi32>
    %c50_i32 = arith.constant 50 : i32
    %969 = vector.broadcast %c50_i32 : i32 to vector<16x128xi32>
    %970 = arith.cmpi slt, %968, %969 : vector<16x128xi32>
    %cst_159 = arith.constant -1.000000e+30 : f32
    %971 = vector.broadcast %cst_159 : f32 to vector<16x128xf32>
    %972 = arith.select %970, %967, %971 : vector<16x128xi1>, vector<16x128xf32>
    %cst_160 = arith.constant dense<0xFF800000> : vector<16xf32>
    %973 = vector.multi_reduction <maximumf>, %972, %cst_160 [1] : vector<16x128xf32> to vector<16xf32>
    %974 = vector.shape_cast %973 : vector<16xf32> to vector<16x1xf32>
    %975 = vector.broadcast %974 : vector<16x1xf32> to vector<16x128xf32>
    %976 = arith.subf %972, %975 : vector<16x128xf32>
    %977 = math.exp %976 : vector<16x128xf32>
    %cst_161 = arith.constant dense<0.000000e+00> : vector<16xf32>
    %978 = vector.multi_reduction <add>, %977, %cst_161 [1] : vector<16x128xf32> to vector<16xf32>
    %979 = vector.shape_cast %978 : vector<16xf32> to vector<16x1xf32>
    %980 = math.log %979 : vector<16x1xf32>
    %981 = arith.addf %980, %974 : vector<16x1xf32>
    %982 = vector.broadcast %981 : vector<16x1xf32> to vector<16x128xf32>
    %983 = arith.subf %972, %982 : vector<16x128xf32>
    %c0_162 = arith.constant 0 : index
    %c0_163 = arith.constant 0 : index
    %984 = vector.load %arg4[%c0_162, %c0_163] : memref<16x1xi32, #tpu.memory_space<vmem>>, vector<16x1xi32>
    %985 = vector.broadcast %984 : vector<16x1xi32> to vector<16x128xi32>
    %986 = arith.cmpi eq, %968, %985 : vector<16x128xi32>
    %987 = arith.extui %986 : vector<16x128xi1> to vector<16x128xi32>
    %988 = arith.sitofp %987 : vector<16x128xi32> to vector<16x128xf32>
    %c0_i32 = arith.constant 0 : i32
    %989 = vector.broadcast %c0_i32 : i32 to vector<16x1xi32>
    %990 = arith.cmpi ne, %984, %989 : vector<16x1xi32>
    %991 = arith.extui %990 : vector<16x1xi1> to vector<16x1xi32>
    %992 = arith.sitofp %991 : vector<16x1xi32> to vector<16x1xf32>
    %993 = arith.mulf %983, %988 : vector<16x128xf32>
    %994 = vector.broadcast %992 : vector<16x1xf32> to vector<16x128xf32>
    %995 = arith.mulf %993, %994 : vector<16x128xf32>
    %996 = vector.shape_cast %995 : vector<16x128xf32> to vector<1x16x128xf32>
    %cst_164 = arith.constant dense<0.000000e+00> : vector<1xf32>
    %997 = vector.multi_reduction <add>, %996, %cst_164 [1, 2] : vector<1x16x128xf32> to vector<1xf32>
    %998 = vector.shape_cast %997 : vector<1xf32> to vector<1x1x1xf32>
    %999 = vector.extract %998[0, 0, 0] : f32 from vector<1x1x1xf32>
    %cst_165 = arith.constant 0.000000e+00 : f32
    %1000 = arith.subf %cst_165, %999 : f32
    %1001 = vector.broadcast %1000 : f32 to vector<1x1xf32>
    %c0_166 = arith.constant 0 : index
    %c0_167 = arith.constant 0 : index
    %1002 = vector.load %arg7[%c0_166, %c0_167] : memref<1x1xf32, #tpu.memory_space<vmem>>, vector<1x1xf32>
    tpu.vector_store %arg7[%c0_166, %c0_167], %1001 {strides = array<i32>} : memref<1x1xf32, #tpu.memory_space<vmem>>, vector<1x1xf32>,
    return
  }
  func.func @transform_0(%arg0: i32) -> (i32, i32, i32) {
    %c0_i32 = arith.constant 0 : i32
    %c0_i32_0 = arith.constant 0 : i32
    %c0_i32_1 = arith.constant 0 : i32
    %c0_i32_2 = arith.constant 0 : i32
    return %c0_i32, %c0_i32_0, %c0_i32_1 : i32, i32, i32
  }
  func.func @transform_1(%arg0: i32) -> (i32, i32, i32) {
    %c0_i32 = arith.constant 0 : i32
    %c0_i32_0 = arith.constant 0 : i32
    %c0_i32_1 = arith.constant 0 : i32
    %c0_i32_2 = arith.constant 0 : i32
    return %c0_i32, %c0_i32_0, %c0_i32_1 : i32, i32, i32
  }
  func.func @transform_2(%arg0: i32) -> (i32, i32) {
    %c0_i32 = arith.constant 0 : i32
    %c0_i32_0 = arith.constant 0 : i32
    %c0_i32_1 = arith.constant 0 : i32
    return %c0_i32, %c0_i32_0 : i32, i32
  }
  func.func @transform_3(%arg0: i32) -> (i32, i32) {
    %c0_i32 = arith.constant 0 : i32
    %c0_i32_0 = arith.constant 0 : i32
    %c0_i32_1 = arith.constant 0 : i32
    return %c0_i32, %c0_i32_0 : i32, i32
  }
  func.func @transform_4(%arg0: i32) -> (i32, i32) {
    %c0_i32 = arith.constant 0 : i32
    %c0_i32_0 = arith.constant 0 : i32
    %c0_i32_1 = arith.constant 0 : i32
    return %c0_i32, %c0_i32_0 : i32, i32
  }
  func.func @transform_5(%arg0: i32) -> (i32, i32) {
    %c0_i32 = arith.constant 0 : i32
    %c0_i32_0 = arith.constant 0 : i32
    %c0_i32_1 = arith.constant 0 : i32
    return %c0_i32, %c0_i32_0 : i32, i32
  }
  func.func @transform_6(%arg0: i32) -> (i32, i32) {
    %c0_i32 = arith.constant 0 : i32
    %c0_i32_0 = arith.constant 0 : i32
    %c0_i32_1 = arith.constant 0 : i32
    return %c0_i32, %c0_i32_0 : i32, i32
  }
}

</mosaic_0001>

<bundles_post_ra>
// kernel: nmt_forward.1
= control target key start
LH: loop header
LB: loop body
LE: loop exit
PB: predicated region body
PF: predicated region fallthrough
CT: control target
= control target key end

     0   :  { %v5674_v2 = vmov 0   ;;  %vm64_vm0 = vcmask 261120   ;;  %v5675_v16 = vmov 0.0|0.0   ;;  %s7154_s0 = inlined_call_operand.vmem [shape: f32[2,8,32], index: 0, kind: input, shape index: {}]   ;;  %s7155_s1 = inlined_call_operand.vmem [shape: f32[2,8,32], index: 1, kind: input, shape index: {}]   ;;  %s7156_s2 = inlined_call_operand.vmem [shape: f32[2,8], index: 2, kind: input, shape index: {}]   ;;  %s7157_s3 = inlined_call_operand.vmem [shape: s32[16,1], index: 3, kind: input, shape index: {}]   ;;  %s7158_s4 = inlined_call_operand.vmem [shape: bf16[512,256], index: 4, kind: input, shape index: {}]   ;;  %s7159_s5 = inlined_call_operand.vmem [shape: f32[8,256], index: 5, kind: input, shape index: {}]   ;;  %s7160_s6 = inlined_call_operand.hbm [shape: f32[1,1], index: 6, kind: output, shape index: {}]  }
   0x1   :  { %v5720_v0 = vld [vmem:[%s7158_s4 + $0x24] ss:$8 sps:$4 sm:$0xff]   ;;  %v5725_v1 = vld [vmem:[%s7158_s4 + $0x20] ss:$8 sps:$4 sm:$0xff]   ;;  %100 = vmatprep.mubr.bf16.mxu0 %v5674_v2  ;;  %196 = vmatprep.mubr.bf16.mxu1 %v5674_v2  ;;  %v5741_v5 = vld [vmem:[%s7158_s4 + $0x34] ss:$8 sps:$4 sm:$0xff]  }
   0x2   :  { %164 = vmatprep.subr.bf16.mxu1 %v5720_v0  ;;  %v5177_v3 = vld [vmem:[%s7158_s4 + $0x4] ss:$8 sps:$4 sm:$0xff]   ;;  %v5179_v4 = vld [vmem:[%s7158_s4] ss:$8 sps:$4 sm:$0xff]   ;;  %5168 = vset.pattern.permute.xlu1 %v5674_v2  ;;  %v5746_v6 = vld [vmem:[%s7158_s4 + $0x30] ss:$8 sps:$4 sm:$0xff]  }
   0x3   :  { %165 = vmatpush1.bf16.msra.mxu1 %v5725_v1  ;;  %5167 = vset.pattern.permute.xlu0 %v5674_v2  ;;  %v5183_v7 = vld [vmem:[%s7158_s4 + $0x14] ss:$8 sps:$4 sm:$0xff]   ;;  %v5185_v8 = vld [vmem:[%s7158_s4 + $0x10] ss:$8 sps:$4 sm:$0xff]   ;;  %v5759_v9 = vld [vmem:[%s7158_s4 + $0x44] ss:$8 sps:$4 sm:$0xff]  }
   0x4   :  { %68 = vmatprep.subr.bf16.mxu0 %v5177_v3  ;;  %166 = vmatprep.subr.bf16.mxu1 %v5741_v5  ;;  %v5764_v10 = vld [vmem:[%s7158_s4 + $0x40] ss:$8 sps:$4 sm:$0xff]   ;;  %v5777_v14 = vld [vmem:[%s7158_s4 + $0x54] ss:$8 sps:$4 sm:$0xff]   ;;  %v5782_v15 = vld [vmem:[%s7158_s4 + $0x50] ss:$8 sps:$4 sm:$0xff]  }
   0x5   :  { %69 = vmatpush1.bf16.msra.mxu0 %v5179_v4  ;;  %v25_v11 = vld [vmem:[%s7154_s0] sm:$0xff]  ;;  %v26_v12 = vld [vmem:[%s7154_s0 + $0x8] sm:$0xff] }
   0x6   :  { %70 = vmatprep.subr.bf16.mxu0 %v5183_v7  ;;  %v27_v13 = vpack.c.bf16 %v26_v12, %v25_v11 }
   0x7   :  { %167 = vmatpush1.bf16.msra.mxu1 %v5746_v6 }
   0x8   :  { %168 = vmatprep.subr.bf16.mxu1 %v5759_v9 }
   0x9   :  { %71 = vmatpush1.bf16.msra.mxu0 %v5185_v8 }
   0xa   :  { %335 = vmatprep.subr.bf16.mxu0 %v5720_v0 }
   0xb   :  { %169 = vmatpush1.bf16.msra.mxu1 %v5764_v10 }
   0xc   :  { %4763 = vmatmul.mubr.msk.bf16.vlgmr.msra.gmra.mrb[0].mxu0 %vm64_vm0, %v27_v13  ;;  %170 = vmatprep.subr.bf16.mxu1 %v5777_v14 }
   0xd   :  { %336 = vmatpush1.bf16.msra.mxu0 %v5725_v1  ;;  %367 = vmatprep.mubr.bf16.mxu0 %v5674_v2 }
   0xe   :  { %337 = vmatprep.subr.bf16.mxu0 %v5741_v5 }
   0xf   :  { %171 = vmatpush1.bf16.msra.mxu1 %v5782_v15 }
  0x10   :  { %525 = vmatprep.subr.bf16.mxu1 %v5720_v0 }
  0x11   :  { %338 = vmatpush1.bf16.msra.mxu0 %v5746_v6 }
  0x12   :  { %197 = vmatmul.mubr.bf16.vlgmr.msra.gmra.mrb[0].mxu1 %v5675_v16  ;;  %339 = vmatprep.subr.bf16.mxu0 %v5759_v9 }
  0x13   :  { %526 = vmatpush1.bf16.msra.mxu1 %v5725_v1  ;;  %557 = vmatprep.mubr.bf16.mxu1 %v5674_v2 }
  0x14   :  { %527 = vmatprep.subr.bf16.mxu1 %v5741_v5 }
  0x15   :  { %340 = vmatpush1.bf16.msra.mxu0 %v5764_v10 }
  0x16   :  { %341 = vmatprep.subr.bf16.mxu0 %v5777_v14 }
  0x17   :  { %528 = vmatpush1.bf16.msra.mxu1 %v5746_v6 }
  0x18   :  { %529 = vmatprep.subr.bf16.mxu1 %v5759_v9 }
  0x19   :  { %342 = vmatpush1.bf16.msra.mxu0 %v5782_v15 }
  0x1a   :  { %711 = vmatprep.subr.bf16.mxu0 %v5720_v0 }
  0x1b   :  { %11 = vsyncpa [#allocation3], 0  ;;  %530 = vmatpush1.bf16.msra.mxu1 %v5764_v10  ;;  %v34_v17 = vlaneseq  ;;  %v32_v20 = vld [vmem:[%s7159_s5] ss:$8 sm:$0x3]  ;;  %s5676_s26 = smov 64  }
  0x1c   :  { %531 = vmatprep.subr.bf16.mxu1 %v5777_v14  ;;  %s5677_s27 = smov 32   ;;  %vm317_vm1 = vcmask 1041409   ;;  %vm160_vm2 = vcmask 523264   ;;  %vm500_vm3 = vcmask 1042434   ;;  %vm1445_vm4 = vcmask 1047559  }
  0x1d   :  { %v5809_v18 = vshrl.u32 %v34_v17, 7  ;;  %vm691_vm5 = vcmask 1043459   ;;  %vm1254_vm6 = vcmask 1046534   ;;  %vm877_vm7 = vcmask 1044484  }
  0x1e   :  { %vm1068_vm8 = vcmask 1045509   ;;  %vm5679_vm9 = vmmov 0   ;;  %vm1667_vm10 = vcmask 785408   ;;  %vm2121_vm11 = vcmask 1040384  }
  0x1f   :  { %532 = vmatpush1.bf16.msra.mxu1 %v5782_v15  ;;  %v5812_v19 = vsub.s32 0, %v5809_v18  ;;  %v5818_v23 = vsub.s32 1, %v5809_v18  ;;  %vm2124_vm12 = vcmask 1041408   ;;  %vm7161_vm13 = vcmask 1042432  }
  0x20   :  { %902 = vmatprep.subr.bf16.mxu1 %v5720_v0  ;;  %vm2130_vm14 = vcmask 1043456   ;;  %vm2133_vm15 = vcmask 1044480  }
  0x21   :  { %v37_v25 = vrot.slane %v32_v20, %v5812_v19  ;;  %v41_v27 = vrot.slane %v32_v20, %v5818_v23 }
  0xdf   :  { %v102_v21 = vpop.f32.mrb[0].mxu0 }
  0xe0   :  { %v104_v22 = vpop.f32.mrb[1].mxu0  ;;  %v5830_v40 = vadd.f32 %v102_v21, %v37_v25 }
  0xe1   :  { %v106_v24 = vpop.f32.mrb[2].mxu0  ;;  %v5825_v37 = vadd.f32 %v104_v22, %v41_v27 }
  0xe2   :  { %v108_v26 = vpop.f32.mrb[3].mxu0  ;;  %v5822_v29 = vadd.f32 %v106_v24, %v37_v25 }
  0xe3   :  { %v5827_v38 = vadd.f32 %v108_v26, %v41_v27 }
  0xe5   :  { %v198_v28 = vpop.f32.mrb[0].mxu1 }
  0xe6   :  { %v206_v30 = vrot.slane %v198_v28, 1  ;;  %v200_v31 = vpop.f32.mrb[1].mxu1  ;;  %v209_v42 = vadd.f32 %v198_v28, %v5830_v40 }
  0xe7   :  { %v260_v32 = vrot.slane %v200_v31, 1  ;;  %v202_v33 = vpop.f32.mrb[2].mxu1  ;;  %v261_v35 = vrot.slane %v200_v31, 2 }
  0xe8   :  { %v210_v34 = vadd.f32 %v206_v30, %v5822_v29  ;;  %v203_v36 = vpop.f32.mrb[3].mxu1  ;;  %v4772_v50 = vmul.f32 -1.442695, %v209_v42 }
  0xe9   :  { %v264_v39 = vadd.f32 %v260_v32, %v5825_v37  ;;  %v265_v41 = vadd.f32 %v261_v35, %v5827_v38 }
  0xea   :  { %5226 = vtanh.f32 %v210_v34  ;;  %v4773_v47 = vmul.f32 -1.442695, %v210_v34 }
  0xeb   :  { %5228 = vtanh.f32 %v264_v39  ;;  %v4774_v48 = vmul.f32 -1.442695, %v264_v39  ;;  %v4775_v49 = vmul.f32 -1.442695, %v265_v41 }
  0xec   :  { %5230 = vtanh.f32 %v265_v41 }
  0xed   :  { %5232 = vtanh.f32 %v209_v42 }
  0xee   :  { %5234 = vpow2.f32 %v4773_v47 }
  0xef   :  { %5236 = vpow2.f32 %v4774_v48 }
  0xf0   :  { %5238 = vpow2.f32 %v4775_v49 }
  0xf1   :  { %5240 = vpow2.f32 %v4772_v50 }
  0xf4   :  { %v5227_v43 = vpop.eup %5226 }
  0xf5   :  { %231 = vrot.lane.b32.xlu0 %v5227_v43, %s5676_s26  ;;  %v5229_v44 = vpop.eup %5228 }
  0xf6   :  { %v5231_v45 = vpop.eup %5230 }
  0xf7   :  { %286 = vrot.lane.b32.xlu1 %v5231_v45, %s5676_s26  ;;  %v5233_v46 = vpop.eup %5232 }
  0xf8   :  { %v5235_v51 = vpop.eup %5234 }
  0xf9   :  { %284 = vrot.lane.b32.xlu0 %v5229_v44, %s5676_s26  ;;  %v218_v52 = vadd.f32 1.0, %v5235_v51  ;;  %v5237_v53 = vpop.eup %5236 }
  0xfa   :  { %v5239_v54 = vpop.eup %5238  ;;  %v272_v55 = vadd.f32 1.0, %v5237_v53 }
  0xfb   :  { %229 = vrot.lane.b32.xlu1 %v5233_v46, %s5676_s26  ;;  %5242 = vrcp.f32 %v218_v52  ;;  %v273_v56 = vadd.f32 1.0, %v5239_v54  ;;  %v5241_v57 = vpop.eup %5240 }
  0xfc   :  { %5244 = vrcp.f32 %v272_v55  ;;  %v217_v58 = vadd.f32 1.0, %v5241_v57 }
  0xfd   :  { %5246 = vrcp.f32 %v273_v56 }
  0xfe   :  { %5248 = vrcp.f32 %v217_v58 }
 0x105   :  { %v5243_v59 = vpop.eup %5242 }
 0x106   :  { %v5245_v62 = vpop.eup %5244  ;;  %v226_v16 = vmul.f32 0.0, %v5243_v59 }
 0x107   :  { %v5247_v3 = vpop.eup %5246  ;;  %v280_v22 = vmul.f32 0.0, %v5245_v62 }
 0x108   :  { %v5249_v11 = vpop.eup %5248  ;;  %v281_v24 = vmul.f32 0.0, %v5247_v3 }
 0x109   :  { %v225_v30 = vmul.f32 0.0, %v5249_v11 }
 0x167   :  { %v232_v60 = vpop.permute.xlu0 %231 }
 0x168   :  { %v236_v61 = vmul.f32 %v5243_v59, %v232_v60 }
 0x169   :  { %v287_v4 = vpop.permute.xlu1 %286 }
 0x16a   :  { %241 = vrot.lane.b32.xlu0 %v236_v61, %s5677_s27  ;;  %v291_v8 = vmul.f32 %v5247_v3, %v287_v4 }
 0x16b   :  { %v285_v63 = vpop.permute.xlu0 %284 }
 0x16c   :  { %v290_v7 = vmul.f32 %v5245_v62, %v285_v63 }
 0x16d   :  { %v230_v12 = vpop.permute.xlu1 %229 }
 0x16e   :  { %294 = vrot.lane.b32.xlu1 %v290_v7, %s5677_s27  ;;  %296 = vrot.lane.b32.xlu0 %v291_v8, %s5677_s27  ;;  %v235_v13 = vmul.f32 %v5249_v11, %v230_v12 }
 0x172   :  { %239 = vrot.lane.b32.xlu1 %v235_v13, %s5677_s27 }
 0x1dc   :  { %v242_v20 = vpop.permute.xlu0 %241 }
 0x1dd   :  { %v5842_v21 = vadd.f32 %v242_v20, %v226_v16 }
 0x1df   :  { %5250 = vtanh.f32 %v5842_v21 }
 0x1e0   :  { %v295_v25 = vpop.permute.xlu1 %294  ;;  %v297_v26 = vpop.permute.xlu0 %296 }
 0x1e1   :  { %v5845_v27 = vadd.f32 %v295_v25, %v280_v22  ;;  %v5847_v28 = vadd.f32 %v297_v26, %v281_v24 }
 0x1e3   :  { %5252 = vtanh.f32 %v5845_v27 }
 0x1e4   :  { %5254 = vtanh.f32 %v5847_v28  ;;  %v240_v31 = vpop.permute.xlu1 %239 }
 0x1e5   :  { %v5851_v32 = vadd.f32 %v240_v31, %v225_v30 }
 0x1e7   :  { %5256 = vtanh.f32 %v5851_v32 }
 0x1e9   :  { %v5251_v33 = vpop.eup %5250 }
 0x1ea   :  { %253 = vrot.lane.b32.xlu0 %v5251_v33, %s5676_s26 }
 0x1ed   :  { %v5253_v34 = vpop.eup %5252 }
 0x1ee   :  { %v5255_v35 = vpop.eup %5254  ;;  %306 = vrot.lane.b32.xlu1 %v5253_v34, %s5676_s26 }
 0x1ef   :  { %308 = vrot.lane.b32.xlu0 %v5255_v35, %s5676_s26 }
 0x1f1   :  { %v5257_v36 = vpop.eup %5256 }
 0x1f2   :  { %251 = vrot.lane.b32.xlu1 %v5257_v36, %s5676_s26 }
 0x25c   :  { %v254_v39 = vpop.permute.xlu0 %253 }
 0x25d   :  { %v258_v44 = vmul.f32 %v5243_v59, %v254_v39 }
 0x25f   :  { %v316_v49 = vrot.slane %v258_v44, 7 }
 0x260   :  { %v307_v41 = vpop.permute.xlu1 %306 }
 0x261   :  { %v309_v42 = vpop.permute.xlu0 %308  ;;  %v5858_v43 = vmul.f32 %v5245_v62, %v307_v41 }
 0x262   :  { %v5860_v45 = vmul.f32 %v5247_v3, %v309_v42 }
 0x263   :  { %v324_v46 = vrot.slane %v5858_v43, 7 }
 0x264   :  { %v325_v47 = vrot.slane %v5860_v45, 6  ;;  %v252_v48 = vpop.permute.xlu1 %251 }
 0x265   :  { %v257_v50 = vmul.f32 %v5249_v11, %v252_v48 }
 0x266   :  { %v326_v51 = vsel %vm317_vm1, %v325_v47, %v324_v46 }
 0x267   :  { %327 = vrot.lane.b32.xlu1 %v326_v51, %s5676_s26  ;;  %v318_v52 = vsel %vm317_vm1, %v316_v49, %v257_v50 }
 0x268   :  { %319 = vrot.lane.b32.xlu0 %v318_v52, %s5677_s27 }
 0x2d9   :  { %v328_v53 = vpop.permute.xlu1 %327 }
 0x2da   :  { %v5868_v54 = vpop.permute.xlu0 %319 }
 0x2db   :  { %v330_v55 = vsel %vm64_vm0, %v5868_v54, %v328_v53 }
 0x2dc   :  { %v331_v56 = vpack.c.bf16 %v330_v55, %v330_v55 }
 0x2de   :  { %4776 = vmatmul.mubr.msk.bf16.vlgmr.msra.gmra.mrb[4].mxu0 %vm160_vm2, %v331_v56  ;;  %v399_v56 = vrot.slane %v5842_v21, 7 }
 0x2df   :  { %712 = vmatpush1.bf16.msra.mxu0 %v5725_v1  ;;  %743 = vmatprep.mubr.bf16.mxu0 %v5674_v2 }
 0x2e0   :  { %713 = vmatprep.subr.bf16.mxu0 %v5741_v5 }
 0x2e3   :  { %714 = vmatpush1.bf16.msra.mxu0 %v5746_v6 }
 0x2e4   :  { %715 = vmatprep.subr.bf16.mxu0 %v5759_v9 }
 0x2e7   :  { %716 = vmatpush1.bf16.msra.mxu0 %v5764_v10 }
 0x2e8   :  { %717 = vmatprep.subr.bf16.mxu0 %v5777_v14 }
 0x2eb   :  { %718 = vmatpush1.bf16.msra.mxu0 %v5782_v15 }
 0x2ec   :  { %1088 = vmatprep.subr.bf16.mxu0 %v5720_v0 }
 0x3b1   :  { %v369_v57 = vpop.f32.mrb[4].mxu0 }
 0x3b2   :  { %v381_v58 = vadd.f32 %v369_v57, %v5822_v29  ;;  %v371_v59 = vpop.f32.mrb[5].mxu0  ;;  %v377_v3 = vrot.slane %v369_v57, 7 }
 0x3b3   :  { %v437_v60 = vrot.slane %v371_v59, 2  ;;  %v373_v61 = vpop.f32.mrb[6].mxu0  ;;  %v438_v62 = vrot.slane %v371_v59, 3 }
 0x3b4   :  { %5258 = vtanh.f32 %v381_v58  ;;  %v374_v63 = vpop.f32.mrb[7].mxu0  ;;  %v380_v8 = vadd.f32 %v377_v3, %v5830_v40  ;;  %v4778_v20 = vmul.f32 -1.442695, %v381_v58  ;;  %v460_v61 = vrot.slane %v5847_v28, 1 }
 0x3b5   :  { %v441_v4 = vadd.f32 %v437_v60, %v5825_v37  ;;  %v442_v7 = vadd.f32 %v438_v62, %v5827_v38  ;;  %v459_v60 = vrot.slane %v5845_v27, 1 }
 0x3b6   :  { %v4777_v25 = vmul.f32 -1.442695, %v380_v8 }
 0x3b7   :  { %5260 = vtanh.f32 %v441_v4  ;;  %v4779_v22 = vmul.f32 -1.442695, %v441_v4  ;;  %v4780_v24 = vmul.f32 -1.442695, %v442_v7  ;;  %v398_v4 = vrot.slane %v5851_v32, 7 }
 0x3b8   :  { %5262 = vtanh.f32 %v442_v7 }
 0x3b9   :  { %5264 = vtanh.f32 %v380_v8 }
 0x3ba   :  { %5266 = vpow2.f32 %v4778_v20 }
 0x3bb   :  { %5268 = vpow2.f32 %v4779_v22 }
 0x3bc   :  { %5270 = vpow2.f32 %v4780_v24 }
 0x3bd   :  { %5272 = vpow2.f32 %v4777_v25 }
 0x3be   :  { %v5259_v11 = vpop.eup %5258 }
 0x3bf   :  { %408 = vrot.lane.b32.xlu0 %v5259_v11, %s5676_s26 }
 0x3c1   :  { %v5261_v12 = vpop.eup %5260 }
 0x3c2   :  { %v5263_v13 = vpop.eup %5262  ;;  %467 = vrot.lane.b32.xlu1 %v5261_v12, %s5676_s26 }
 0x3c3   :  { %469 = vrot.lane.b32.xlu0 %v5263_v13, %s5676_s26  ;;  %v5265_v16 = vpop.eup %5264 }
 0x3c4   :  { %v5267_v26 = vpop.eup %5266 }
 0x3c5   :  { %v389_v30 = vadd.f32 1.0, %v5267_v26  ;;  %v5269_v31 = vpop.eup %5268 }
 0x3c6   :  { %406 = vrot.lane.b32.xlu1 %v5265_v16, %s5676_s26  ;;  %v5271_v33 = vpop.eup %5270  ;;  %v449_v34 = vadd.f32 1.0, %v5269_v31 }
 0x3c7   :  { %5274 = vrcp.f32 %v389_v30  ;;  %v5273_v35 = vpop.eup %5272  ;;  %v450_v36 = vadd.f32 1.0, %v5271_v33 }
 0x3c8   :  { %v388_v39 = vadd.f32 1.0, %v5273_v35  ;;  %5276 = vrcp.f32 %v449_v34 }
 0x3c9   :  { %5278 = vrcp.f32 %v450_v36 }
 0x3ca   :  { %5280 = vrcp.f32 %v388_v39 }
 0x3d1   :  { %v5275_v41 = vpop.eup %5274 }
 0x3d2   :  { %v5277_v46 = vpop.eup %5276  ;;  %v403_v57 = vmul.f32 %v5275_v41, %v399_v56 }
 0x3d3   :  { %v5279_v48 = vpop.eup %5278  ;;  %v463_v62 = vmul.f32 %v5277_v46, %v459_v60 }
 0x3d4   :  { %v5281_v52 = vpop.eup %5280  ;;  %v464_v3 = vmul.f32 %v5279_v48, %v460_v61 }
 0x3d5   :  { %v402_v21 = vmul.f32 %v5281_v52, %v398_v4 }
 0x431   :  { %v409_v42 = vpop.permute.xlu0 %408 }
 0x432   :  { %v413_v44 = vmul.f32 %v5275_v41, %v409_v42 }
 0x434   :  { %418 = vrot.lane.b32.xlu0 %v413_v44, %s5677_s27  ;;  %v468_v47 = vpop.permute.xlu1 %467 }
 0x435   :  { %v473_v49 = vmul.f32 %v5277_v46, %v468_v47  ;;  %v470_v50 = vpop.permute.xlu0 %469 }
 0x436   :  { %v474_v51 = vmul.f32 %v5279_v48, %v470_v50 }
 0x437   :  { %477 = vrot.lane.b32.xlu1 %v473_v49, %s5677_s27 }
 0x438   :  { %479 = vrot.lane.b32.xlu0 %v474_v51, %s5677_s27  ;;  %v407_v53 = vpop.permute.xlu1 %406 }
 0x439   :  { %v412_v55 = vmul.f32 %v5281_v52, %v407_v53 }
 0x43b   :  { %416 = vrot.lane.b32.xlu1 %v412_v55, %s5677_s27 }
 0x4a6   :  { %v419_v58 = vpop.permute.xlu0 %418 }
 0x4a7   :  { %v5895_v59 = vadd.f32 %v419_v58, %v403_v57 }
 0x4a9   :  { %5282 = vtanh.f32 %v5895_v59  ;;  %v478_v63 = vpop.permute.xlu1 %477 }
 0x4aa   :  { %v5901_v7 = vadd.f32 %v478_v63, %v463_v62  ;;  %v480_v8 = vpop.permute.xlu0 %479 }
 0x4ab   :  { %v5903_v11 = vadd.f32 %v480_v8, %v464_v3 }
 0x4ac   :  { %5284 = vtanh.f32 %v5901_v7 }
 0x4ad   :  { %5286 = vtanh.f32 %v5903_v11  ;;  %v417_v12 = vpop.permute.xlu1 %416 }
 0x4ae   :  { %v5907_v13 = vadd.f32 %v417_v12, %v402_v21 }
 0x4b0   :  { %5288 = vtanh.f32 %v5907_v13 }
 0x4b3   :  { %v5283_v27 = vpop.eup %5282 }
 0x4b4   :  { %430 = vrot.lane.b32.xlu0 %v5283_v27, %s5676_s26 }
 0x4b6   :  { %v5285_v28 = vpop.eup %5284 }
 0x4b7   :  { %v5287_v32 = vpop.eup %5286  ;;  %489 = vrot.lane.b32.xlu1 %v5285_v28, %s5676_s26 }
 0x4b8   :  { %491 = vrot.lane.b32.xlu0 %v5287_v32, %s5676_s26 }
 0x4ba   :  { %v5289_v16 = vpop.eup %5288 }
 0x4bb   :  { %428 = vrot.lane.b32.xlu1 %v5289_v16, %s5676_s26 }
 0x526   :  { %v431_v20 = vpop.permute.xlu0 %430 }
 0x527   :  { %v435_v24 = vmul.f32 %v5275_v41, %v431_v20 }
 0x529   :  { %v490_v22 = vpop.permute.xlu1 %489  ;;  %v499_v36 = vrot.slane %v435_v24, 7 }
 0x52a   :  { %v495_v25 = vmul.f32 %v5277_v46, %v490_v22  ;;  %v492_v26 = vpop.permute.xlu0 %491 }
 0x52b   :  { %v496_v30 = vmul.f32 %v5279_v48, %v492_v26 }
 0x52c   :  { %v507_v31 = vrot.slane %v495_v25, 5 }
 0x52d   :  { %v508_v33 = vrot.slane %v496_v30, 4  ;;  %v1822_v34 = vrot.slane %v496_v30, 7  ;;  %v429_v35 = vpop.permute.xlu1 %428 }
 0x52e   :  { %v434_v39 = vmul.f32 %v5281_v52, %v429_v35 }
 0x52f   :  { %v509_v42 = vsel %vm500_vm3, %v508_v33, %v507_v31  ;;  %v5916_v44 = vsel %vm1445_vm4, %v1822_v34, %v495_v25 }
 0x530   :  { %510 = vrot.lane.b32.xlu1 %v509_v42, %s5676_s26  ;;  %v501_v41 = vsel %vm500_vm3, %v499_v36, %v434_v39 }
 0x531   :  { %502 = vrot.lane.b32.xlu0 %v501_v41, %s5677_s27 }
 0x5a2   :  { %v511_v46 = vpop.permute.xlu1 %510 }
 0x5a3   :  { %v5921_v47 = vpop.permute.xlu0 %502 }
 0x5a4   :  { %v513_v48 = vsel %vm64_vm0, %v5921_v47, %v511_v46 }
 0x5a5   :  { %v514_v49 = vpack.c.bf16 %v513_v48, %v513_v48 }
 0x5a7   :  { %v518_v50 = vshll.u32 %v514_v49, 16  ;;  %v516_v51 = vshrl.u32 %v514_v49, 16 }
 0x5a9   :  { %v520_v52 = vrot.slane %v518_v50, 1 }
 0x5ab   :  { %v521_v53 = vor.u32 %v520_v52, %v516_v51 }
 0x5ad   :  { %4781 = vmatmul.mubr.msk.bf16.vlgmr.msra.gmra.mrb[4].mxu1 %vm160_vm2, %v521_v53 }
 0x5ae   :  { %903 = vmatpush1.bf16.msra.mxu1 %v5725_v1  ;;  %934 = vmatprep.mubr.bf16.mxu1 %v5674_v2 }
 0x5af   :  { %904 = vmatprep.subr.bf16.mxu1 %v5741_v5 }
 0x5b2   :  { %905 = vmatpush1.bf16.msra.mxu1 %v5746_v6 }
 0x5b3   :  { %906 = vmatprep.subr.bf16.mxu1 %v5759_v9 }
 0x5b6   :  { %907 = vmatpush1.bf16.msra.mxu1 %v5764_v10 }
 0x5b7   :  { %908 = vmatprep.subr.bf16.mxu1 %v5777_v14 }
 0x5ba   :  { %909 = vmatpush1.bf16.msra.mxu1 %v5782_v15 }
 0x5bb   :  { %1280 = vmatprep.subr.bf16.mxu1 %v5720_v0 }
 0x680   :  { %v559_v55 = vpop.f32.mrb[4].mxu1 }
 0x681   :  { %v568_v56 = vrot.slane %v559_v55, 7  ;;  %v561_v57 = vpop.f32.mrb[5].mxu1  ;;  %v567_v3 = vrot.slane %v559_v55, 6 }
 0x682   :  { %v563_v58 = vpop.f32.mrb[6].mxu1  ;;  %v628_v61 = vrot.slane %v561_v57, 3  ;;  %v629_v63 = vrot.slane %v561_v57, 4  ;;  %v590_v57 = vrot.slane %v5895_v59, 7 }
 0x683   :  { %v572_v60 = vadd.f32 %v568_v56, %v5822_v29  ;;  %v564_v62 = vpop.f32.mrb[7].mxu1  ;;  %v571_v21 = vadd.f32 %v567_v3, %v5830_v40 }
 0x684   :  { %v632_v4 = vadd.f32 %v628_v61, %v5825_v37  ;;  %v633_v8 = vadd.f32 %v629_v63, %v5827_v38  ;;  %v650_v62 = vrot.slane %v5901_v7, 1  ;;  %v651_v63 = vrot.slane %v5903_v11, 1 }
 0x685   :  { %5290 = vtanh.f32 %v572_v60  ;;  %v4783_v16 = vmul.f32 -1.442695, %v572_v60  ;;  %v4782_v24 = vmul.f32 -1.442695, %v571_v21 }
 0x686   :  { %5292 = vtanh.f32 %v632_v4  ;;  %v4784_v20 = vmul.f32 -1.442695, %v632_v4  ;;  %v4785_v22 = vmul.f32 -1.442695, %v633_v8 }
 0x687   :  { %5294 = vtanh.f32 %v633_v8 }
 0x688   :  { %5296 = vtanh.f32 %v571_v21  ;;  %v589_v21 = vrot.slane %v5907_v13, 7 }
 0x689   :  { %5298 = vpow2.f32 %v4783_v16 }
 0x68a   :  { %5300 = vpow2.f32 %v4784_v20 }
 0x68b   :  { %5302 = vpow2.f32 %v4785_v22 }
 0x68c   :  { %5304 = vpow2.f32 %v4782_v24 }
 0x68f   :  { %v5291_v12 = vpop.eup %5290 }
 0x690   :  { %599 = vrot.lane.b32.xlu0 %v5291_v12, %s5676_s26  ;;  %v5293_v27 = vpop.eup %5292 }
 0x691   :  { %v5295_v28 = vpop.eup %5294  ;;  %658 = vrot.lane.b32.xlu1 %v5293_v27, %s5676_s26 }
 0x692   :  { %v5297_v32 = vpop.eup %5296 }
 0x693   :  { %v5299_v25 = vpop.eup %5298 }
 0x694   :  { %660 = vrot.lane.b32.xlu0 %v5295_v28, %s5676_s26  ;;  %v580_v26 = vadd.f32 1.0, %v5299_v25  ;;  %v5301_v30 = vpop.eup %5300 }
 0x695   :  { %597 = vrot.lane.b32.xlu1 %v5297_v32, %s5676_s26  ;;  %v5303_v31 = vpop.eup %5302  ;;  %v640_v33 = vadd.f32 1.0, %v5301_v30 }
 0x696   :  { %5306 = vrcp.f32 %v580_v26  ;;  %v5305_v34 = vpop.eup %5304  ;;  %v641_v35 = vadd.f32 1.0, %v5303_v31 }
 0x697   :  { %v579_v36 = vadd.f32 1.0, %v5305_v34  ;;  %5308 = vrcp.f32 %v640_v33 }
 0x698   :  { %5310 = vrcp.f32 %v641_v35 }
 0x699   :  { %5312 = vrcp.f32 %v579_v36 }
 0x6a0   :  { %v5307_v39 = vpop.eup %5306 }
 0x6a1   :  { %v5309_v46 = vpop.eup %5308  ;;  %v594_v58 = vmul.f32 %v5307_v39, %v590_v57 }
 0x6a2   :  { %v5311_v49 = vpop.eup %5310  ;;  %v654_v3 = vmul.f32 %v5309_v46, %v650_v62 }
 0x6a3   :  { %v5313_v53 = vpop.eup %5312  ;;  %v655_v8 = vmul.f32 %v5311_v49, %v651_v63 }
 0x6a4   :  { %v593_v59 = vmul.f32 %v5313_v53, %v589_v21 }
 0x702   :  { %v600_v42 = vpop.permute.xlu0 %599 }
 0x703   :  { %v604_v41 = vmul.f32 %v5307_v39, %v600_v42  ;;  %v659_v48 = vpop.permute.xlu1 %658 }
 0x704   :  { %v664_v50 = vmul.f32 %v5309_v46, %v659_v48 }
 0x705   :  { %609 = vrot.lane.b32.xlu0 %v604_v41, %s5677_s27 }
 0x706   :  { %v661_v51 = vpop.permute.xlu0 %660  ;;  %668 = vrot.lane.b32.xlu1 %v664_v50, %s5677_s27 }
 0x707   :  { %v665_v52 = vmul.f32 %v5311_v49, %v661_v51  ;;  %v598_v55 = vpop.permute.xlu1 %597 }
 0x708   :  { %v603_v56 = vmul.f32 %v5313_v53, %v598_v55 }
 0x709   :  { %670 = vrot.lane.b32.xlu0 %v665_v52, %s5677_s27 }
 0x70a   :  { %607 = vrot.lane.b32.xlu1 %v603_v56, %s5677_s27 }
 0x777   :  { %v610_v60 = vpop.permute.xlu0 %609 }
 0x778   :  { %v5948_v61 = vadd.f32 %v610_v60, %v594_v58  ;;  %v669_v4 = vpop.permute.xlu1 %668 }
 0x779   :  { %v5954_v12 = vadd.f32 %v669_v4, %v654_v3 }
 0x77a   :  { %5314 = vtanh.f32 %v5948_v61 }
 0x77b   :  { %v671_v27 = vpop.permute.xlu0 %670  ;;  %5316 = vtanh.f32 %v5954_v12 }
 0x77c   :  { %v5956_v28 = vadd.f32 %v671_v27, %v655_v8  ;;  %v608_v7 = vpop.permute.xlu1 %607 }
 0x77d   :  { %v5960_v32 = vadd.f32 %v608_v7, %v593_v59 }
 0x77e   :  { %5318 = vtanh.f32 %v5956_v28 }
 0x77f   :  { %5320 = vtanh.f32 %v5960_v32 }
 0x784   :  { %v5315_v11 = vpop.eup %5314 }
 0x785   :  { %621 = vrot.lane.b32.xlu0 %v5315_v11, %s5676_s26  ;;  %v5317_v16 = vpop.eup %5316 }
 0x786   :  { %680 = vrot.lane.b32.xlu1 %v5317_v16, %s5676_s26 }
 0x788   :  { %v5319_v13 = vpop.eup %5318 }
 0x789   :  { %682 = vrot.lane.b32.xlu0 %v5319_v13, %s5676_s26  ;;  %v5321_v20 = vpop.eup %5320 }
 0x78a   :  { %619 = vrot.lane.b32.xlu1 %v5321_v20, %s5676_s26 }
 0x7f7   :  { %v622_v22 = vpop.permute.xlu0 %621 }
 0x7f8   :  { %v681_v24 = vpop.permute.xlu1 %680  ;;  %v626_v25 = vmul.f32 %v5307_v39, %v622_v22 }
 0x7f9   :  { %v686_v26 = vmul.f32 %v5309_v46, %v681_v24 }
 0x7fa   :  { %v690_v42 = vrot.slane %v626_v25, 7 }
 0x7fb   :  { %v683_v30 = vpop.permute.xlu0 %682  ;;  %v698_v33 = vrot.slane %v686_v26, 3 }
 0x7fc   :  { %v687_v31 = vmul.f32 %v5311_v49, %v683_v30  ;;  %v620_v36 = vpop.permute.xlu1 %619 }
 0x7fd   :  { %v625_v41 = vmul.f32 %v5313_v53, %v620_v36 }
 0x7fe   :  { %v699_v34 = vrot.slane %v687_v31, 2  ;;  %v1816_v35 = vrot.slane %v687_v31, 7 }
 0x7ff   :  { %v692_v51 = vsel %vm691_vm5, %v690_v42, %v625_v41 }
 0x800   :  { %v700_v48 = vsel %vm691_vm5, %v699_v34, %v698_v33  ;;  %v5969_v50 = vsel %vm1254_vm6, %v1816_v35, %v686_v26  ;;  %693 = vrot.lane.b32.xlu0 %v692_v51, %s5677_s27 }
 0x801   :  { %701 = vrot.lane.b32.xlu1 %v700_v48, %s5676_s26 }
 0x872   :  { %v5974_v46 = vpop.permute.xlu0 %693 }
 0x873   :  { %v702_v39 = vpop.permute.xlu1 %701 }
 0x874   :  { %v704_v49 = vsel %vm64_vm0, %v5974_v46, %v702_v39  ;;  %v776_v39 = vrot.slane %v5948_v61, 7 }
 0x875   :  { %v705_v52 = vpack.c.bf16 %v704_v49, %v704_v49 }
 0x877   :  { %v707_v55 = vrot.slane %v705_v52, 1 }
 0x879   :  { %4786 = vmatmul.mubr.msk.bf16.vlgmr.msra.gmra.mrb[8].mxu0 %vm160_vm2, %v707_v55  ;;  %v775_v55 = vrot.slane %v5960_v32, 7 }
 0x87a   :  { %1089 = vmatpush1.bf16.msra.mxu0 %v5725_v1  ;;  %1120 = vmatprep.mubr.bf16.mxu0 %v5674_v2 }
 0x87b   :  { %1090 = vmatprep.subr.bf16.mxu0 %v5741_v5 }
 0x87e   :  { %1091 = vmatpush1.bf16.msra.mxu0 %v5746_v6 }
 0x87f   :  { %1092 = vmatprep.subr.bf16.mxu0 %v5759_v9 }
 0x882   :  { %1093 = vmatpush1.bf16.msra.mxu0 %v5764_v10 }
 0x883   :  { %1094 = vmatprep.subr.bf16.mxu0 %v5777_v14 }
 0x886   :  { %1095 = vmatpush1.bf16.msra.mxu0 %v5782_v15 }
 0x887   :  { %1465 = vmatprep.subr.bf16.mxu0 %v5720_v0 }
 0x94c   :  { %v745_v53 = vpop.f32.mrb[8].mxu0 }
 0x94d   :  { %v754_v56 = vrot.slane %v745_v53, 6  ;;  %v747_v57 = vpop.f32.mrb[9].mxu0  ;;  %v753_v1 = vrot.slane %v745_v53, 5 }
 0x94e   :  { %v749_v58 = vpop.f32.mrb[10].mxu0  ;;  %v814_v5 = vrot.slane %v747_v57, 4  ;;  %v815_v9 = vrot.slane %v747_v57, 5 }
 0x94f   :  { %v758_v60 = vadd.f32 %v754_v56, %v5822_v29  ;;  %v750_v62 = vpop.f32.mrb[11].mxu0  ;;  %v757_v6 = vadd.f32 %v753_v1, %v5830_v40  ;;  %v836_v56 = vrot.slane %v5954_v12, 1 }
 0x950   :  { %v818_v10 = vadd.f32 %v814_v5, %v5825_v37  ;;  %v819_v14 = vadd.f32 %v815_v9, %v5827_v38  ;;  %v837_v62 = vrot.slane %v5956_v28, 1 }
 0x951   :  { %5322 = vtanh.f32 %v758_v60  ;;  %v4788_v4 = vmul.f32 -1.442695, %v758_v60  ;;  %v4787_v8 = vmul.f32 -1.442695, %v757_v6 }
 0x952   :  { %5324 = vtanh.f32 %v757_v6  ;;  %v4789_v21 = vmul.f32 -1.442695, %v818_v10  ;;  %v4790_v27 = vmul.f32 -1.442695, %v819_v14 }
 0x953   :  { %5326 = vtanh.f32 %v818_v10 }
 0x954   :  { %5328 = vtanh.f32 %v819_v14 }
 0x955   :  { %5330 = vpow2.f32 %v4788_v4 }
 0x956   :  { %5332 = vpow2.f32 %v4787_v8 }
 0x957   :  { %5334 = vpow2.f32 %v4789_v21 }
 0x958   :  { %5336 = vpow2.f32 %v4790_v27 }
 0x95b   :  { %v5323_v0 = vpop.eup %5322 }
 0x95c   :  { %785 = vrot.lane.b32.xlu0 %v5323_v0, %s5676_s26  ;;  %v5325_v15 = vpop.eup %5324 }
 0x95d   :  { %v5327_v63 = vpop.eup %5326 }
 0x95e   :  { %844 = vrot.lane.b32.xlu1 %v5327_v63, %s5676_s26  ;;  %v5329_v3 = vpop.eup %5328 }
 0x95f   :  { %v5331_v59 = vpop.eup %5330 }
 0x960   :  { %783 = vrot.lane.b32.xlu0 %v5325_v15, %s5676_s26  ;;  %v766_v7 = vadd.f32 1.0, %v5331_v59  ;;  %v5333_v11 = vpop.eup %5332 }
 0x961   :  { %v5335_v16 = vpop.eup %5334  ;;  %v765_v13 = vadd.f32 1.0, %v5333_v11 }
 0x962   :  { %846 = vrot.lane.b32.xlu1 %v5329_v3, %s5676_s26  ;;  %5338 = vrcp.f32 %v766_v7  ;;  %v826_v20 = vadd.f32 1.0, %v5335_v16  ;;  %v5337_v22 = vpop.eup %5336 }
 0x963   :  { %5340 = vrcp.f32 %v765_v13  ;;  %v827_v24 = vadd.f32 1.0, %v5337_v22 }
 0x964   :  { %5342 = vrcp.f32 %v826_v20 }
 0x965   :  { %5344 = vrcp.f32 %v827_v24 }
 0x96c   :  { %v5339_v25 = vpop.eup %5338 }
 0x96d   :  { %v5341_v31 = vpop.eup %5340  ;;  %v780_v49 = vmul.f32 %v5339_v25, %v776_v39  ;;  %v6066_v39 = vld [vmem:[%s7158_s4 + $0x54] ss:$8 sps:$4 sm:$0xff]  }
 0x96e   :  { %v5343_v34 = vpop.eup %5342  ;;  %v779_v57 = vmul.f32 %v5341_v31, %v775_v55 }
 0x96f   :  { %v5345_v41 = vpop.eup %5344  ;;  %v840_v1 = vmul.f32 %v5343_v34, %v836_v56 }
 0x970   :  { %v841_v61 = vmul.f32 %v5345_v41, %v837_v62 }
 0x9ce   :  { %v786_v26 = vpop.permute.xlu0 %785 }
 0x9cf   :  { %v790_v30 = vmul.f32 %v5339_v25, %v786_v26 }
 0x9d0   :  { %v845_v35 = vpop.permute.xlu1 %844 }
 0x9d1   :  { %795 = vrot.lane.b32.xlu0 %v790_v30, %s5677_s27  ;;  %v850_v42 = vmul.f32 %v5343_v34, %v845_v35 }
 0x9d2   :  { %v784_v33 = vpop.permute.xlu0 %783 }
 0x9d3   :  { %v789_v36 = vmul.f32 %v5341_v31, %v784_v33  ;;  %854 = vrot.lane.b32.xlu1 %v850_v42, %s5677_s27  ;;  %v6042_v42 = vld [vmem:[%s7158_s4 + $0x34] ss:$8 sps:$4 sm:$0xff]  }
 0x9d4   :  { %v847_v48 = vpop.permute.xlu1 %846 }
 0x9d5   :  { %793 = vrot.lane.b32.xlu0 %v789_v36, %s5677_s27  ;;  %v851_v51 = vmul.f32 %v5345_v41, %v847_v48  ;;  %v6035_v36 = vld [vmem:[%s7158_s4 + $0x20] ss:$8 sps:$4 sm:$0xff]   ;;  %v6054_v48 = vld [vmem:[%s7158_s4 + $0x44] ss:$8 sps:$4 sm:$0xff]  }
 0x9d7   :  { %856 = vrot.lane.b32.xlu1 %v851_v51, %s5677_s27  ;;  %v6060_v51 = vld [vmem:[%s7158_s4 + $0x40] ss:$8 sps:$4 sm:$0xff]  }
 0xa43   :  { %v796_v52 = vpop.permute.xlu0 %795 }
 0xa44   :  { %v6002_v53 = vadd.f32 %v796_v52, %v780_v49  ;;  %v6072_v49 = vld [vmem:[%s7158_s4 + $0x50] ss:$8 sps:$4 sm:$0xff]  }
 0xa45   :  { %v855_v60 = vpop.permute.xlu1 %854 }
 0xa46   :  { %5346 = vtanh.f32 %v6002_v53  ;;  %v6009_v6 = vadd.f32 %v855_v60, %v840_v1 }
 0xa47   :  { %v794_v58 = vpop.permute.xlu0 %793 }
 0xa48   :  { %v6006_v5 = vadd.f32 %v794_v58, %v779_v57 }
 0xa49   :  { %v857_v32 = vpop.permute.xlu1 %856 }
 0xa4a   :  { %5348 = vtanh.f32 %v6006_v5  ;;  %v6013_v9 = vadd.f32 %v857_v32, %v841_v61 }
 0xa4b   :  { %5350 = vtanh.f32 %v6009_v6 }
 0xa4c   :  { %5352 = vtanh.f32 %v6013_v9 }
 0xa50   :  { %v5347_v12 = vpop.eup %5346 }
 0xa51   :  { %807 = vrot.lane.b32.xlu0 %v5347_v12, %s5676_s26 }
 0xa54   :  { %v5349_v10 = vpop.eup %5348 }
 0xa55   :  { %v5351_v14 = vpop.eup %5350  ;;  %805 = vrot.lane.b32.xlu0 %v5349_v10, %s5676_s26 }
 0xa56   :  { %866 = vrot.lane.b32.xlu1 %v5351_v14, %s5676_s26  ;;  %v5353_v28 = vpop.eup %5352 }
 0xa5a   :  { %868 = vrot.lane.b32.xlu1 %v5353_v28, %s5676_s26 }
 0xac3   :  { %v808_v0 = vpop.permute.xlu0 %807 }
 0xac4   :  { %v812_v15 = vmul.f32 %v5339_v25, %v808_v0 }
 0xac6   :  { %v876_v3 = vrot.slane %v812_v15, 7 }
 0xac7   :  { %v806_v63 = vpop.permute.xlu0 %805 }
 0xac8   :  { %v867_v4 = vpop.permute.xlu1 %866  ;;  %v811_v8 = vmul.f32 %v5341_v31, %v806_v63 }
 0xac9   :  { %v872_v21 = vmul.f32 %v5343_v34, %v867_v4 }
 0xaca   :  { %v878_v27 = vsel %vm877_vm7, %v876_v3, %v811_v8 }
 0xacb   :  { %879 = vrot.lane.b32.xlu0 %v878_v27, %s5677_s27  ;;  %v884_v7 = vrot.slane %v872_v21, 1 }
 0xacc   :  { %v869_v59 = vpop.permute.xlu1 %868 }
 0xacd   :  { %v873_v11 = vmul.f32 %v5345_v41, %v869_v59  ;;  %v6048_v41 = vld [vmem:[%s7158_s4 + $0x30] ss:$8 sps:$4 sm:$0xff]  }
 0xacf   :  { %v1810_v16 = vrot.slane %v873_v11, 7  ;;  %v885_v13 = vsel %vm877_vm7, %v873_v11, %v884_v7 }
 0xad0   :  { %886 = vrot.lane.b32.xlu1 %v885_v13, %s5676_s26 }
 0xad1   :  { %v6025_v20 = vsel %vm1068_vm8, %v1810_v16, %v872_v21 }
 0xb3d   :  { %v6027_v22 = vpop.permute.xlu0 %879 }
 0xb42   :  { %v887_v24 = vpop.permute.xlu1 %886 }
 0xb43   :  { %v889_v25 = vsel %vm64_vm0, %v6027_v22, %v887_v24 }
 0xb44   :  { %v890_v26 = vpack.c.bf16 %v889_v25, %v889_v25 }
 0xb46   :  { %v892_v30 = vshrl.u32 %v890_v26, 16  ;;  %v895_v31 = vshll.u32 %v890_v26, 16 }
 0xb48   :  { %v894_v33 = vrot.slane %v892_v30, 1  ;;  %v897_v34 = vrot.slane %v895_v31, 2 }
 0xb4a   :  { %v898_v35 = vor.u32 %v897_v34, %v894_v33 }
 0xb4c   :  { %4791 = vmatmul.mubr.msk.bf16.vlgmr.msra.gmra.mrb[8].mxu1 %vm160_vm2, %v898_v35 }
 0xb4d   :  { %1281 = vmatpush1.bf16.msra.mxu1 %v6035_v36  ;;  %1312 = vmatprep.mubr.bf16.mxu1 %v5674_v2 }
 0xb4e   :  { %1282 = vmatprep.subr.bf16.mxu1 %v6042_v42 }
 0xb51   :  { %1283 = vmatpush1.bf16.msra.mxu1 %v6048_v41 }
 0xb52   :  { %1284 = vmatprep.subr.bf16.mxu1 %v6054_v48 }
 0xb55   :  { %1285 = vmatpush1.bf16.msra.mxu1 %v6060_v51 }
 0xb56   :  { %1286 = vmatprep.subr.bf16.mxu1 %v6066_v39 }
 0xb59   :  { %1287 = vmatpush1.bf16.msra.mxu1 %v6072_v49 }
 0xc1f   :  { %v936_v52 = vpop.f32.mrb[8].mxu1 }
 0xc20   :  { %v945_v55 = vrot.slane %v936_v52, 5  ;;  %v938_v56 = vpop.f32.mrb[9].mxu1  ;;  %v944_v61 = vrot.slane %v936_v52, 4 }
 0xc21   :  { %v940_v57 = vpop.f32.mrb[10].mxu1  ;;  %v1005_v58 = vrot.slane %v938_v56, 5  ;;  %v1006_v62 = vrot.slane %v938_v56, 6 }
 0xc22   :  { %v949_v1 = vadd.f32 %v945_v55, %v5822_v29  ;;  %v941_v60 = vpop.f32.mrb[11].mxu1  ;;  %v948_v10 = vadd.f32 %v944_v61, %v5830_v40 }
 0xc23   :  { %v1009_v32 = vadd.f32 %v1005_v58, %v5825_v37  ;;  %v1010_v12 = vadd.f32 %v1006_v62, %v5827_v38  ;;  %v967_v58 = vrot.slane %v6002_v53, 7 }
 0xc24   :  { %5354 = vtanh.f32 %v949_v1  ;;  %v4793_v63 = vmul.f32 -1.442695, %v949_v1  ;;  %v4792_v8 = vmul.f32 -1.442695, %v948_v10 }
 0xc25   :  { %5356 = vtanh.f32 %v1009_v32  ;;  %v4794_v3 = vmul.f32 -1.442695, %v1009_v32  ;;  %v4795_v4 = vmul.f32 -1.442695, %v1010_v12  ;;  %v1027_v32 = vrot.slane %v6009_v6, 1 }
 0xc26   :  { %5358 = vtanh.f32 %v1010_v12  ;;  %v1028_v12 = vrot.slane %v6013_v9, 1 }
 0xc27   :  { %5360 = vtanh.f32 %v948_v10 }
 0xc28   :  { %5362 = vpow2.f32 %v4793_v63 }
 0xc29   :  { %5364 = vpow2.f32 %v4794_v3 }
 0xc2a   :  { %5366 = vpow2.f32 %v4795_v4 }
 0xc2b   :  { %5368 = vpow2.f32 %v4792_v8 }
 0xc2e   :  { %v5355_v14 = vpop.eup %5354 }
 0xc2f   :  { %976 = vrot.lane.b32.xlu0 %v5355_v14, %s5676_s26  ;;  %v5357_v28 = vpop.eup %5356 }
 0xc30   :  { %v5359_v0 = vpop.eup %5358  ;;  %1035 = vrot.lane.b32.xlu1 %v5357_v28, %s5676_s26 }
 0xc31   :  { %v5361_v15 = vpop.eup %5360 }
 0xc32   :  { %v5363_v21 = vpop.eup %5362 }
 0xc33   :  { %1037 = vrot.lane.b32.xlu0 %v5359_v0, %s5676_s26  ;;  %v957_v27 = vadd.f32 1.0, %v5363_v21  ;;  %v5365_v59 = vpop.eup %5364  ;;  %v966_v0 = vrot.slane %v6006_v5, 7 }
 0xc34   :  { %974 = vrot.lane.b32.xlu1 %v5361_v15, %s5676_s26  ;;  %v5367_v7 = vpop.eup %5366  ;;  %v1017_v11 = vadd.f32 1.0, %v5365_v59 }
 0xc35   :  { %5370 = vrcp.f32 %v957_v27  ;;  %v5369_v16 = vpop.eup %5368  ;;  %v1018_v13 = vadd.f32 1.0, %v5367_v7 }
 0xc36   :  { %v956_v24 = vadd.f32 1.0, %v5369_v16  ;;  %5372 = vrcp.f32 %v1017_v11 }
 0xc37   :  { %5374 = vrcp.f32 %v1018_v13 }
 0xc38   :  { %5376 = vrcp.f32 %v956_v24 }
 0xc3f   :  { %v5371_v25 = vpop.eup %5370 }
 0xc40   :  { %v5373_v31 = vpop.eup %5372  ;;  %v971_v60 = vmul.f32 %v5371_v25, %v967_v58 }
 0xc41   :  { %v5375_v34 = vpop.eup %5374  ;;  %v1031_v10 = vmul.f32 %v5373_v31, %v1027_v32 }
 0xc42   :  { %v5377_v56 = vpop.eup %5376  ;;  %v1032_v28 = vmul.f32 %v5375_v34, %v1028_v12 }
 0xc43   :  { %v970_v53 = vmul.f32 %v5377_v56, %v966_v0 }
 0xca1   :  { %v977_v26 = vpop.permute.xlu0 %976 }
 0xca2   :  { %v981_v30 = vmul.f32 %v5371_v25, %v977_v26  ;;  %v1036_v33 = vpop.permute.xlu1 %1035 }
 0xca3   :  { %v1041_v35 = vmul.f32 %v5373_v31, %v1036_v33 }
 0xca4   :  { %986 = vrot.lane.b32.xlu0 %v981_v30, %s5677_s27 }
 0xca5   :  { %v1038_v52 = vpop.permute.xlu0 %1037  ;;  %1045 = vrot.lane.b32.xlu1 %v1041_v35, %s5677_s27 }
 0xca6   :  { %v1042_v55 = vmul.f32 %v5375_v34, %v1038_v52  ;;  %v975_v57 = vpop.permute.xlu1 %974 }
 0xca7   :  { %v980_v1 = vmul.f32 %v5377_v56, %v975_v57 }
 0xca8   :  { %1047 = vrot.lane.b32.xlu0 %v1042_v55, %s5677_s27 }
 0xca9   :  { %984 = vrot.lane.b32.xlu1 %v980_v1, %s5677_s27 }
 0xd16   :  { %v987_v62 = vpop.permute.xlu0 %986 }
 0xd17   :  { %v6088_v61 = vadd.f32 %v987_v62, %v971_v60  ;;  %v1046_v14 = vpop.permute.xlu1 %1045 }
 0xd18   :  { %v6094_v15 = vadd.f32 %v1046_v14, %v1031_v10 }
 0xd19   :  { %5378 = vtanh.f32 %v6088_v61 }
 0xd1a   :  { %v1048_v63 = vpop.permute.xlu0 %1047  ;;  %5380 = vtanh.f32 %v6094_v15 }
 0xd1b   :  { %v6096_v3 = vadd.f32 %v1048_v63, %v1032_v28  ;;  %v985_v6 = vpop.permute.xlu1 %984 }
 0xd1c   :  { %v6100_v4 = vadd.f32 %v985_v6, %v970_v53 }
 0xd1d   :  { %5382 = vtanh.f32 %v6096_v3 }
 0xd1e   :  { %5384 = vtanh.f32 %v6100_v4 }
 0xd23   :  { %v5379_v9 = vpop.eup %5378 }
 0xd24   :  { %998 = vrot.lane.b32.xlu0 %v5379_v9, %s5676_s26  ;;  %v5381_v8 = vpop.eup %5380 }
 0xd25   :  { %1057 = vrot.lane.b32.xlu1 %v5381_v8, %s5676_s26 }
 0xd27   :  { %v5383_v5 = vpop.eup %5382 }
 0xd28   :  { %1059 = vrot.lane.b32.xlu0 %v5383_v5, %s5676_s26  ;;  %v5385_v21 = vpop.eup %5384 }
 0xd29   :  { %996 = vrot.lane.b32.xlu1 %v5385_v21, %s5676_s26 }
 0xd96   :  { %v999_v27 = vpop.permute.xlu0 %998 }
 0xd97   :  { %v1058_v59 = vpop.permute.xlu1 %1057  ;;  %v1003_v7 = vmul.f32 %v5371_v25, %v999_v27 }
 0xd98   :  { %v1063_v11 = vmul.f32 %v5373_v31, %v1058_v59 }
 0xd99   :  { %v1067_v35 = vrot.slane %v1003_v7, 7 }
 0xd9a   :  { %v1060_v16 = vpop.permute.xlu0 %1059  ;;  %v1075_v24 = vrot.slane %v1063_v11, 7 }
 0xd9b   :  { %v1064_v13 = vmul.f32 %v5375_v34, %v1060_v16  ;;  %v997_v33 = vpop.permute.xlu1 %996 }
 0xd9c   :  { %v1002_v52 = vmul.f32 %v5377_v56, %v997_v33 }
 0xd9d   :  { %v1076_v26 = vrot.slane %v1064_v13, 6  ;;  %v1804_v30 = vrot.slane %v1064_v13, 7 }
 0xd9e   :  { %v1069_v1 = vsel %vm1068_vm8, %v1067_v35, %v1002_v52 }
 0xd9f   :  { %v1077_v55 = vsel %vm1068_vm8, %v1076_v26, %v1075_v24  ;;  %v6109_v57 = vsel %vm877_vm7, %v1804_v30, %v1063_v11  ;;  %1070 = vrot.lane.b32.xlu0 %v1069_v1, %s5677_s27 }
 0xda0   :  { %1078 = vrot.lane.b32.xlu1 %v1077_v55, %s5676_s26 }
 0xe11   :  { %v6114_v31 = vpop.permute.xlu0 %1070 }
 0xe12   :  { %v1079_v25 = vpop.permute.xlu1 %1078 }
 0xe13   :  { %v1081_v34 = vsel %vm64_vm0, %v6114_v31, %v1079_v25 }
 0xe14   :  { %v1082_v58 = vpack.c.bf16 %v1081_v34, %v1081_v34 }
 0xe16   :  { %v1084_v60 = vrot.slane %v1082_v58, 2 }
 0xe18   :  { %4796 = vmatmul.mubr.msk.bf16.vlgmr.msra.gmra.mrb[12].mxu0 %vm160_vm2, %v1084_v60 }
 0xe19   :  { %1466 = vmatpush1.bf16.msra.mxu0 %v6035_v36  ;;  %1497 = vmatprep.mubr.bf16.mxu0 %v5674_v2 }
 0xe1a   :  { %1467 = vmatprep.subr.bf16.mxu0 %v6042_v42 }
 0xe1d   :  { %1468 = vmatpush1.bf16.msra.mxu0 %v6048_v41 }
 0xe1e   :  { %1469 = vmatprep.subr.bf16.mxu0 %v6054_v48 }
 0xe21   :  { %1470 = vmatpush1.bf16.msra.mxu0 %v6060_v51 }
 0xe22   :  { %1471 = vmatprep.subr.bf16.mxu0 %v6066_v39 }
 0xe25   :  { %1472 = vmatpush1.bf16.msra.mxu0 %v6072_v49 }
 0xeeb   :  { %v1122_v56 = vpop.f32.mrb[12].mxu0 }
 0xeec   :  { %v1131_v62 = vrot.slane %v1122_v56, 4  ;;  %v1124_v32 = vpop.f32.mrb[13].mxu0  ;;  %v1130_v42 = vrot.slane %v1122_v56, 3  ;;  %v1153_v56 = vrot.slane %v6088_v61, 7 }
 0xeed   :  { %v1126_v12 = vpop.f32.mrb[14].mxu0  ;;  %v1191_v10 = vrot.slane %v1124_v32, 6  ;;  %v1192_v28 = vrot.slane %v1124_v32, 7 }
 0xeee   :  { %v1135_v36 = vadd.f32 %v1131_v62, %v5822_v29  ;;  %v1127_v14 = vpop.f32.mrb[15].mxu0  ;;  %v1134_v51 = vadd.f32 %v1130_v42, %v5830_v40 }
 0xeef   :  { %v1195_v41 = vadd.f32 %v1191_v10, %v5825_v37  ;;  %v1196_v48 = vadd.f32 %v1192_v28, %v5827_v38  ;;  %v1214_v10 = vrot.slane %v6096_v3, 1 }
 0xef0   :  { %5386 = vtanh.f32 %v1135_v36  ;;  %v4798_v53 = vmul.f32 -1.442695, %v1135_v36  ;;  %v4797_v8 = vmul.f32 -1.442695, %v1134_v51  ;;  %v1213_v36 = vrot.slane %v6094_v15, 1 }
 0xef1   :  { %5388 = vtanh.f32 %v1195_v41  ;;  %v4799_v6 = vmul.f32 -1.442695, %v1195_v41  ;;  %v4800_v9 = vmul.f32 -1.442695, %v1196_v48  ;;  %v1152_v41 = vrot.slane %v6100_v4, 7 }
 0xef2   :  { %5390 = vtanh.f32 %v1196_v48 }
 0xef3   :  { %5392 = vtanh.f32 %v1134_v51 }
 0xef4   :  { %5394 = vpow2.f32 %v4798_v53 }
 0xef5   :  { %5396 = vpow2.f32 %v4799_v6 }
 0xef6   :  { %5398 = vpow2.f32 %v4800_v9 }
 0xef7   :  { %5400 = vpow2.f32 %v4797_v8 }
 0xefa   :  { %v5387_v39 = vpop.eup %5386 }
 0xefb   :  { %1162 = vrot.lane.b32.xlu0 %v5387_v39, %s5676_s26  ;;  %v5389_v49 = vpop.eup %5388 }
 0xefc   :  { %v5391_v0 = vpop.eup %5390  ;;  %1221 = vrot.lane.b32.xlu1 %v5389_v49, %s5676_s26 }
 0xefd   :  { %v5393_v63 = vpop.eup %5392 }
 0xefe   :  { %v5395_v5 = vpop.eup %5394 }
 0xeff   :  { %1223 = vrot.lane.b32.xlu0 %v5391_v0, %s5676_s26  ;;  %v1143_v21 = vadd.f32 1.0, %v5395_v5  ;;  %v5397_v27 = vpop.eup %5396 }
 0xf00   :  { %1160 = vrot.lane.b32.xlu1 %v5393_v63, %s5676_s26  ;;  %v5399_v59 = vpop.eup %5398  ;;  %v1203_v7 = vadd.f32 1.0, %v5397_v27 }
 0xf01   :  { %5402 = vrcp.f32 %v1143_v21  ;;  %v5401_v11 = vpop.eup %5400  ;;  %v1204_v16 = vadd.f32 1.0, %v5399_v59 }
 0xf02   :  { %v1142_v13 = vadd.f32 1.0, %v5401_v11  ;;  %5404 = vrcp.f32 %v1203_v7 }
 0xf03   :  { %5406 = vrcp.f32 %v1204_v16 }
 0xf04   :  { %5408 = vrcp.f32 %v1142_v13 }
 0xf0b   :  { %v5403_v24 = vpop.eup %5402 }
 0xf0c   :  { %v5405_v33 = vpop.eup %5404  ;;  %v1157_v62 = vmul.f32 %v5403_v24, %v1153_v56 }
 0xf0d   :  { %v5407_v52 = vpop.eup %5406  ;;  %v1217_v14 = vmul.f32 %v5405_v33, %v1213_v36 }
 0xf0e   :  { %v5409_v34 = vpop.eup %5408  ;;  %v1218_v42 = vmul.f32 %v5407_v52, %v1214_v10 }
 0xf0f   :  { %v1156_v61 = vmul.f32 %v5409_v34, %v1152_v41 }
 0xf6d   :  { %v1163_v26 = vpop.permute.xlu0 %1162 }
 0xf6e   :  { %v1167_v30 = vmul.f32 %v5403_v24, %v1163_v26  ;;  %v1222_v35 = vpop.permute.xlu1 %1221 }
 0xf6f   :  { %v1227_v55 = vmul.f32 %v5405_v33, %v1222_v35 }
 0xf70   :  { %1172 = vrot.lane.b32.xlu0 %v1167_v30, %s5677_s27 }
 0xf71   :  { %v1224_v1 = vpop.permute.xlu0 %1223  ;;  %1231 = vrot.lane.b32.xlu1 %v1227_v55, %s5677_s27 }
 0xf72   :  { %v1228_v25 = vmul.f32 %v5407_v52, %v1224_v1  ;;  %v1161_v58 = vpop.permute.xlu1 %1160 }
 0xf73   :  { %v1166_v60 = vmul.f32 %v5409_v34, %v1161_v58 }
 0xf74   :  { %1233 = vrot.lane.b32.xlu0 %v1228_v25, %s5677_s27 }
 0xf75   :  { %1170 = vrot.lane.b32.xlu1 %v1166_v60, %s5677_s27 }
 0xfe2   :  { %v1173_v32 = vpop.permute.xlu0 %1172 }
 0xfe3   :  { %v6140_v12 = vadd.f32 %v1173_v32, %v1157_v62  ;;  %v1232_v28 = vpop.permute.xlu1 %1231 }
 0xfe4   :  { %v6146_v48 = vadd.f32 %v1232_v28, %v1217_v14 }
 0xfe5   :  { %5410 = vtanh.f32 %v6140_v12 }
 0xfe6   :  { %v1234_v51 = vpop.permute.xlu0 %1233  ;;  %5412 = vtanh.f32 %v6146_v48 }
 0xfe7   :  { %v6148_v39 = vadd.f32 %v1234_v51, %v1218_v42  ;;  %v1171_v15 = vpop.permute.xlu1 %1170 }
 0xfe8   :  { %v6152_v49 = vadd.f32 %v1171_v15, %v1156_v61 }
 0xfe9   :  { %5414 = vtanh.f32 %v6148_v39 }
 0xfea   :  { %5416 = vtanh.f32 %v6152_v49 }
 0xfef   :  { %v5411_v3 = vpop.eup %5410 }
 0xff0   :  { %1184 = vrot.lane.b32.xlu0 %v5411_v3, %s5676_s26  ;;  %v5413_v0 = vpop.eup %5412 }
 0xff1   :  { %1243 = vrot.lane.b32.xlu1 %v5413_v0, %s5676_s26 }
 0xff3   :  { %v5415_v4 = vpop.eup %5414 }
 0xff4   :  { %1245 = vrot.lane.b32.xlu0 %v5415_v4, %s5676_s26  ;;  %v5417_v63 = vpop.eup %5416 }
 0xff5   :  { %1182 = vrot.lane.b32.xlu1 %v5417_v63, %s5676_s26 }
0x1062   :  { %v1185_v53 = vpop.permute.xlu0 %1184 }
0x1063   :  { %v1244_v6 = vpop.permute.xlu1 %1243  ;;  %v1189_v9 = vmul.f32 %v5403_v24, %v1185_v53 }
0x1064   :  { %v1249_v8 = vmul.f32 %v5405_v33, %v1244_v6 }
0x1065   :  { %v1253_v16 = vrot.slane %v1189_v9, 7 }
0x1066   :  { %v1246_v5 = vpop.permute.xlu0 %1245  ;;  %v1261_v27 = vrot.slane %v1249_v8, 5 }
0x1067   :  { %v1250_v21 = vmul.f32 %v5407_v52, %v1246_v5  ;;  %v1183_v11 = vpop.permute.xlu1 %1182 }
0x1068   :  { %v1188_v13 = vmul.f32 %v5409_v34, %v1183_v11 }
0x1069   :  { %v1262_v59 = vrot.slane %v1250_v21, 4  ;;  %v1798_v7 = vrot.slane %v1250_v21, 7 }
0x106a   :  { %v1255_v35 = vsel %vm1254_vm6, %v1253_v16, %v1188_v13 }
0x106b   :  { %v1263_v26 = vsel %vm1254_vm6, %v1262_v59, %v1261_v27  ;;  %v6161_v30 = vsel %vm691_vm5, %v1798_v7, %v1249_v8  ;;  %1256 = vrot.lane.b32.xlu0 %v1255_v35, %s5677_s27 }
0x106c   :  { %1264 = vrot.lane.b32.xlu1 %v1263_v26, %s5676_s26 }
0x10dd   :  { %v6166_v33 = vpop.permute.xlu0 %1256 }
0x10de   :  { %v1265_v24 = vpop.permute.xlu1 %1264 }
0x10df   :  { %v1267_v52 = vsel %vm64_vm0, %v6166_v33, %v1265_v24 }
0x10e0   :  { %v1268_v55 = vpack.c.bf16 %v1267_v52, %v1267_v52 }
0x10e2   :  { %v1270_v1 = vshrl.u32 %v1268_v55, 16  ;;  %v1273_v25 = vshll.u32 %v1268_v55, 16 }
0x10e4   :  { %v1272_v34 = vrot.slane %v1270_v1, 2  ;;  %v1275_v58 = vrot.slane %v1273_v25, 3 }
0x10e6   :  { %v1276_v60 = vor.u32 %v1275_v58, %v1272_v34 }
0x10e8   :  { %4801 = vmatmul.mubr.msk.bf16.vlgmr.msra.gmra.mrb[12].mxu1 %vm160_vm2, %v1276_v60 }
0x11bb   :  { %v1314_v56 = vpop.f32.mrb[12].mxu1 }
0x11bc   :  { %v1323_v62 = vrot.slane %v1314_v56, 3  ;;  %v1316_v32 = vpop.f32.mrb[13].mxu1  ;;  %v1322_v41 = vrot.slane %v1314_v56, 2 }
0x11bd   :  { %v1318_v36 = vpop.f32.mrb[14].mxu1  ;;  %v1383_v14 = vrot.slane %v1316_v32, 7  ;;  %v1387_v42 = vadd.f32 %v1316_v32, %v5827_v38 }
0x11be   :  { %v1327_v10 = vadd.f32 %v1323_v62, %v5822_v29  ;;  %v1319_v28 = vpop.f32.mrb[15].mxu1  ;;  %v1326_v61 = vadd.f32 %v1322_v41, %v5830_v40  ;;  %v1345_v62 = vrot.slane %v6140_v12, 7 }
0x11bf   :  { %v1386_v51 = vadd.f32 %v1383_v14, %v5825_v37  ;;  %v4805_v53 = vmul.f32 -1.442695, %v1387_v42  ;;  %v1404_v28 = vrot.slane %v6146_v48, 1 }
0x11c0   :  { %5418 = vtanh.f32 %v1327_v10  ;;  %v4803_v63 = vmul.f32 -1.442695, %v1327_v10  ;;  %v4802_v9 = vmul.f32 -1.442695, %v1326_v61  ;;  %v1405_v10 = vrot.slane %v6148_v39, 1 }
0x11c1   :  { %5420 = vtanh.f32 %v1387_v42  ;;  %v4804_v6 = vmul.f32 -1.442695, %v1386_v51 }
0x11c2   :  { %5422 = vtanh.f32 %v1386_v51 }
0x11c3   :  { %5424 = vtanh.f32 %v1326_v61 }
0x11c4   :  { %5426 = vpow2.f32 %v4803_v63 }
0x11c5   :  { %5428 = vpow2.f32 %v4805_v53 }
0x11c6   :  { %5430 = vpow2.f32 %v4804_v6 }
0x11c7   :  { %5432 = vpow2.f32 %v4802_v9 }
0x11ca   :  { %v5419_v15 = vpop.eup %5418 }
0x11cb   :  { %1354 = vrot.lane.b32.xlu0 %v5419_v15, %s5676_s26  ;;  %v5421_v3 = vpop.eup %5420 }
0x11cc   :  { %v5423_v0 = vpop.eup %5422 }
0x11cd   :  { %1412 = vrot.lane.b32.xlu1 %v5423_v0, %s5676_s26  ;;  %v5425_v4 = vpop.eup %5424 }
0x11ce   :  { %v5427_v8 = vpop.eup %5426 }
0x11cf   :  { %1414 = vrot.lane.b32.xlu0 %v5421_v3, %s5676_s26  ;;  %v1335_v5 = vadd.f32 1.0, %v5427_v8  ;;  %v5429_v21 = vpop.eup %5428  ;;  %v1344_v3 = vrot.slane %v6152_v49, 7 }
0x11d0   :  { %v5431_v27 = vpop.eup %5430  ;;  %v1395_v59 = vadd.f32 1.0, %v5429_v21 }
0x11d1   :  { %1352 = vrot.lane.b32.xlu1 %v5425_v4, %s5676_s26  ;;  %5434 = vrcp.f32 %v1335_v5  ;;  %v1394_v7 = vadd.f32 1.0, %v5431_v27  ;;  %v5433_v11 = vpop.eup %5432 }
0x11d2   :  { %5436 = vrcp.f32 %v1395_v59  ;;  %v1334_v16 = vadd.f32 1.0, %v5433_v11 }
0x11d3   :  { %5438 = vrcp.f32 %v1394_v7 }
0x11d4   :  { %5440 = vrcp.f32 %v1334_v16 }
0x11db   :  { %v5435_v13 = vpop.eup %5434 }
0x11dc   :  { %v5437_v24 = vpop.eup %5436  ;;  %v1349_v32 = vmul.f32 %v5435_v13, %v1345_v62 }
0x11dd   :  { %v5439_v55 = vpop.eup %5438  ;;  %v1409_v42 = vmul.f32 %v5437_v24, %v1405_v10 }
0x11de   :  { %v5441_v58 = vpop.eup %5440  ;;  %v1408_v41 = vmul.f32 %v5439_v55, %v1404_v28 }
0x11df   :  { %v1348_v12 = vmul.f32 %v5441_v58, %v1344_v3 }
0x123d   :  { %v1355_v26 = vpop.permute.xlu0 %1354 }
0x123e   :  { %v1359_v35 = vmul.f32 %v5435_v13, %v1355_v26 }
0x123f   :  { %v1413_v1 = vpop.permute.xlu1 %1412 }
0x1240   :  { %1364 = vrot.lane.b32.xlu0 %v1359_v35, %s5677_s27  ;;  %v1418_v34 = vmul.f32 %v5439_v55, %v1413_v1 }
0x1241   :  { %v1415_v52 = vpop.permute.xlu0 %1414 }
0x1242   :  { %v1419_v25 = vmul.f32 %v5437_v24, %v1415_v52  ;;  %1422 = vrot.lane.b32.xlu1 %v1418_v34, %s5677_s27 }
0x1243   :  { %v1353_v60 = vpop.permute.xlu1 %1352 }
0x1244   :  { %1424 = vrot.lane.b32.xlu0 %v1419_v25, %s5677_s27  ;;  %v1358_v56 = vmul.f32 %v5441_v58, %v1353_v60 }
0x1246   :  { %1362 = vrot.lane.b32.xlu1 %v1358_v56, %s5677_s27 }
0x12b2   :  { %v1365_v36 = vpop.permute.xlu0 %1364 }
0x12b3   :  { %v6185_v14 = vadd.f32 %v1365_v36, %v1349_v32 }
0x12b4   :  { %v1423_v61 = vpop.permute.xlu1 %1422 }
0x12b5   :  { %5442 = vtanh.f32 %v6185_v14  ;;  %v6192_v0 = vadd.f32 %v1423_v61, %v1408_v41 }
0x12b6   :  { %v1425_v51 = vpop.permute.xlu0 %1424 }
0x12b7   :  { %v6189_v15 = vadd.f32 %v1425_v51, %v1409_v42 }
0x12b8   :  { %v1363_v39 = vpop.permute.xlu1 %1362 }
0x12b9   :  { %5444 = vtanh.f32 %v6189_v15  ;;  %v6196_v4 = vadd.f32 %v1363_v39, %v1348_v12 }
0x12ba   :  { %5446 = vtanh.f32 %v6192_v0 }
0x12bb   :  { %5448 = vtanh.f32 %v6196_v4 }
0x12bf   :  { %v5443_v48 = vpop.eup %5442 }
0x12c0   :  { %1376 = vrot.lane.b32.xlu0 %v5443_v48, %s5676_s26 }
0x12c3   :  { %v5445_v63 = vpop.eup %5444 }
0x12c4   :  { %v5447_v53 = vpop.eup %5446  ;;  %1436 = vrot.lane.b32.xlu0 %v5445_v63, %s5676_s26 }
0x12c5   :  { %1434 = vrot.lane.b32.xlu1 %v5447_v53, %s5676_s26  ;;  %v5449_v49 = vpop.eup %5448 }
0x12c9   :  { %1374 = vrot.lane.b32.xlu1 %v5449_v49, %s5676_s26 }
0x1332   :  { %v1377_v6 = vpop.permute.xlu0 %1376 }
0x1333   :  { %v1381_v21 = vmul.f32 %v5435_v13, %v1377_v6 }
0x1335   :  { %v1444_v35 = vrot.slane %v1381_v21, 7 }
0x1336   :  { %v1437_v9 = vpop.permute.xlu0 %1436 }
0x1337   :  { %v1435_v8 = vpop.permute.xlu1 %1434  ;;  %v1441_v5 = vmul.f32 %v5437_v24, %v1437_v9 }
0x1338   :  { %v1440_v27 = vmul.f32 %v5439_v55, %v1435_v8 }
0x1339   :  { %v1453_v59 = vrot.slane %v1441_v5, 2  ;;  %v1792_v7 = vrot.slane %v1441_v5, 7 }
0x133a   :  { %v1452_v11 = vrot.slane %v1440_v27, 3 }
0x133b   :  { %v1375_v16 = vpop.permute.xlu1 %1374  ;;  %v6204_v26 = vsel %vm500_vm3, %v1792_v7, %v1440_v27 }
0x133c   :  { %v1380_v52 = vmul.f32 %v5441_v58, %v1375_v16  ;;  %v1454_v1 = vsel %vm1445_vm4, %v1453_v59, %v1452_v11 }
0x133d   :  { %1455 = vrot.lane.b32.xlu1 %v1454_v1, %s5676_s26 }
0x133e   :  { %v1446_v25 = vsel %vm1445_vm4, %v1444_v35, %v1380_v52 }
0x133f   :  { %1447 = vrot.lane.b32.xlu0 %v1446_v25, %s5677_s27 }
0x13af   :  { %v1456_v24 = vpop.permute.xlu1 %1455 }
0x13b1   :  { %v6210_v13 = vpop.permute.xlu0 %1447 }
0x13b2   :  { %v1458_v55 = vsel %vm64_vm0, %v6210_v13, %v1456_v24 }
0x13b3   :  { %v1459_v34 = vpack.c.bf16 %v1458_v55, %v1458_v55 }
0x13b5   :  { %v1461_v60 = vrot.slane %v1459_v34, 3  ;;  %v1589_v34 = vrot.slane %v6192_v0, 1 }
0x13b7   :  { %4806 = vmatmul.mubr.msk.bf16.vlgmr.msra.gmra.mrb[16].mxu0 %vm160_vm2, %v1461_v60  ;;  %v1530_v60 = vrot.slane %v6185_v14, 7 }
0x13b8   :  { %2239 = vmatprep.mubr.bf16.mxu0 %v5674_v2 }
0x148a   :  { %v1499_v58 = vpop.f32.mrb[16].mxu0 }
0x148b   :  { %v1508_v56 = vrot.slane %v1499_v58, 2  ;;  %v1501_v62 = vpop.f32.mrb[17].mxu0  ;;  %v1507_v32 = vrot.slane %v1499_v58, 1 }
0x148c   :  { %v1571_v36 = vadd.f32 %v1501_v62, %v5825_v37  ;;  %v1503_v10 = vpop.f32.mrb[18].mxu0  ;;  %v1568_v42 = vrot.slane %v1501_v62, 1 }
0x148d   :  { %v1512_v28 = vadd.f32 %v1508_v56, %v5822_v29  ;;  %v1504_v41 = vpop.f32.mrb[19].mxu0  ;;  %v1511_v51 = vadd.f32 %v1507_v32, %v5830_v40  ;;  %v1529_v10 = vrot.slane %v6196_v4, 7 }
0x148e   :  { %5450 = vtanh.f32 %v1571_v36  ;;  %v1572_v61 = vadd.f32 %v1568_v42, %v5827_v38  ;;  %v4809_v29 = vmul.f32 -1.442695, %v1571_v36  ;;  %v1590_v42 = vrot.slane %v6189_v15, 1 }
0x148f   :  { %5452 = vtanh.f32 %v1512_v28  ;;  %v4808_v39 = vmul.f32 -1.442695, %v1512_v28  ;;  %v4807_v40 = vmul.f32 -1.442695, %v1511_v51 }
0x1490   :  { %5454 = vtanh.f32 %v1511_v51  ;;  %v4810_v38 = vmul.f32 -1.442695, %v1572_v61 }
0x1491   :  { %5456 = vtanh.f32 %v1572_v61 }
0x1492   :  { %5458 = vpow2.f32 %v4809_v29 }
0x1493   :  { %5460 = vpow2.f32 %v4808_v39  ;;  %v5192_v39 = vld [vmem:[%s7158_s4 + $0x120] ss:$8 sps:$4 sm:$0xff]  }
0x1494   :  { %5462 = vpow2.f32 %v4807_v40  ;;  %v5678_v40 = vmov 0.0  }
0x1495   :  { %5464 = vpow2.f32 %v4810_v38  ;;  %4954 = vmatprep.subr.bf16.mxu1 %v5678_v40  ;;  %v5193_v38 = vld [vmem:[%s7158_s4 + $0x130] ss:$8 sps:$4 sm:$0xff]   ;;  %4970 = vmatprep.mubr.msk.bf16.mxu1 %vm5679_vm9, %v5678_v40 }
0x1496   :  { %4955 = vmatpush3.bf16.msra.mxu1 %v5192_v39 }
0x1497   :  { %4956 = vmatprep.subr.bf16.mxu1 %v5678_v40 }
0x1498   :  { %v5451_v2 = vpop.eup %5450 }
0x1499   :  { %1597 = vrot.lane.b32.xlu1 %v5451_v2, %s5676_s26  ;;  %v5453_v3 = vpop.eup %5452 }
0x149a   :  { %1539 = vrot.lane.b32.xlu0 %v5453_v3, %s5676_s26  ;;  %v5455_v37 = vpop.eup %5454  ;;  %4957 = vmatpush3.bf16.msra.mxu1 %v5193_v38 }
0x149b   :  { %v5457_v12 = vpop.eup %5456  ;;  %4958 = vmatprep.subr.bf16.mxu1 %v5678_v40 }
0x149c   :  { %v5459_v48 = vpop.eup %5458 }
0x149d   :  { %1599 = vrot.lane.b32.xlu1 %v5457_v12, %s5676_s26  ;;  %v5461_v63 = vpop.eup %5460  ;;  %v1579_v53 = vadd.f32 1.0, %v5459_v48  ;;  %v5194_v48 = vld [vmem:[%s7158_s4 + $0x140] ss:$8 sps:$4 sm:$0xff]  }
0x149e   :  { %1537 = vrot.lane.b32.xlu0 %v5455_v37, %s5676_s26  ;;  %v1520_v49 = vadd.f32 1.0, %v5461_v63  ;;  %v5463_v6 = vpop.eup %5462  ;;  %4959 = vmatpush3.bf16.msra.mxu1 %v5194_v48  ;;  %v5195_v63 = vld [vmem:[%s7158_s4 + $0x150] ss:$8 sps:$4 sm:$0xff]  }
0x149f   :  { %v5465_v9 = vpop.eup %5464  ;;  %5466 = vrcp.f32 %v1579_v53  ;;  %v1519_v8 = vadd.f32 1.0, %v5463_v6  ;;  %4960 = vmatprep.subr.bf16.mxu1 %v5678_v40  ;;  %v5196_v6 = vld [vmem:[%s7158_s4 + $0x160] ss:$8 sps:$4 sm:$0xff]  }
0x14a0   :  { %5468 = vrcp.f32 %v1520_v49  ;;  %v1580_v5 = vadd.f32 1.0, %v5465_v9 }
0x14a1   :  { %5470 = vrcp.f32 %v1519_v8 }
0x14a2   :  { %5472 = vrcp.f32 %v1580_v5  ;;  %4961 = vmatpush3.bf16.msra.mxu1 %v5195_v63 }
0x14a3   :  { %4962 = vmatprep.subr.bf16.mxu1 %v5678_v40 }
0x14a6   :  { %4963 = vmatpush3.bf16.msra.mxu1 %v5196_v6 }
0x14a7   :  { %4964 = vmatprep.subr.bf16.mxu1 %v5678_v40 }
0x14a9   :  { %v6224_v21 = vpop.eup %5466 }
0x14aa   :  { %v5469_v7 = vpop.eup %5468  ;;  %v1593_v58 = vmul.f32 %v6224_v21, %v1589_v34  ;;  %v5200_v34 = vld [vmem:[%s7158_s4 + $0xe0] ss:$8 sps:$4 sm:$0xff]  }
0x14ab   :  { %v6229_v35 = vpop.eup %5470  ;;  %v1534_v32 = vmul.f32 %v5469_v7, %v1530_v60  ;;  %v5208_v60 = vld [vmem:[%s7158_s4 + $0x104] ss:$8 sps:$4 sm:$0xff]  }
0x14ac   :  { %v6231_v1 = vpop.eup %5472  ;;  %v1533_v41 = vmul.f32 %v6229_v35, %v1529_v10 }
0x14ad   :  { %v1594_v51 = vmul.f32 %v6231_v1, %v1590_v42 }
0x150b   :  { %v1598_v27 = vpop.permute.xlu1 %1597 }
0x150c   :  { %v1603_v59 = vmul.f32 %v6224_v21, %v1598_v27  ;;  %v1540_v11 = vpop.permute.xlu0 %1539 }
0x150d   :  { %v1544_v16 = vmul.f32 %v5469_v7, %v1540_v11 }
0x150e   :  { %1607 = vrot.lane.b32.xlu1 %v1603_v59, %s5677_s27  ;;  %v5197_v59 = vld [vmem:[%s7158_s4 + $0x170] ss:$8 sps:$4 sm:$0xff]  }
0x150f   :  { %1549 = vrot.lane.b32.xlu0 %v1544_v16, %s5677_s27  ;;  %v1600_v25 = vpop.permute.xlu1 %1599  ;;  %4965 = vmatpush3.bf16.msra.mxu1 %v5197_v59 }
0x1510   :  { %v1538_v52 = vpop.permute.xlu0 %1537  ;;  %v1604_v55 = vmul.f32 %v6231_v1, %v1600_v25  ;;  %4966 = vmatprep.subr.bf16.mxu1 %v5678_v40 }
0x1511   :  { %v1543_v24 = vmul.f32 %v6229_v35, %v1538_v52 }
0x1512   :  { %1609 = vrot.lane.b32.xlu1 %v1604_v55, %s5677_s27 }
0x1513   :  { %1547 = vrot.lane.b32.xlu0 %v1543_v24, %s5677_s27 }
0x1580   :  { %v1608_v56 = vpop.permute.xlu1 %1607 }
0x1581   :  { %v1613_v62 = vadd.f32 %v1608_v56, %v1593_v58  ;;  %v1550_v36 = vpop.permute.xlu0 %1549  ;;  %v5211_v58 = vld [vmem:[%s7158_s4 + $0x114] ss:$8 sps:$4 sm:$0xff]  }
0x1582   :  { %v1554_v28 = vadd.f32 %v1550_v36, %v1534_v32 }
0x1583   :  { %5474 = vtanh.f32 %v1613_v62  ;;  %v1656_v2 = vrot.slane %v1613_v62, 1 }
0x1584   :  { %5476 = vtanh.f32 %v1554_v28  ;;  %v1610_v61 = vpop.permute.xlu1 %1609 }
0x1585   :  { %v1548_v0 = vpop.permute.xlu0 %1547  ;;  %v1614_v3 = vadd.f32 %v1610_v61, %v1594_v51 }
0x1586   :  { %v1553_v14 = vadd.f32 %v1548_v0, %v1533_v41 }
0x1587   :  { %v5162_v37 = vpack.i.bf16 %v1614_v3, %v1656_v2 }
0x1588   :  { %5478 = vtanh.f32 %v1553_v14 }
0x1589   :  { %5480 = vtanh.f32 %v1614_v3 }
0x158d   :  { %v5475_v12 = vpop.eup %5474 }
0x158e   :  { %1619 = vrot.lane.b32.xlu1 %v5475_v12, %s5676_s26  ;;  %v5477_v4 = vpop.eup %5476 }
0x158f   :  { %1561 = vrot.lane.b32.xlu0 %v5477_v4, %s5676_s26 }
0x1592   :  { %v5479_v15 = vpop.eup %5478 }
0x1593   :  { %v5481_v29 = vpop.eup %5480  ;;  %1559 = vrot.lane.b32.xlu0 %v5479_v15, %s5676_s26 }
0x1594   :  { %1621 = vrot.lane.b32.xlu1 %v5481_v29, %s5676_s26 }
0x1600   :  { %v1620_v53 = vpop.permute.xlu1 %1619 }
0x1601   :  { %v1562_v49 = vpop.permute.xlu0 %1561  ;;  %v1625_v8 = vmul.f32 %v6224_v21, %v1620_v53  ;;  %v5198_v21 = vld [vmem:[%s7158_s4 + $0x180] ss:$8 sps:$4 sm:$0xff]  }
0x1602   :  { %v1566_v9 = vmul.f32 %v5469_v7, %v1562_v49  ;;  %v1647_v7 = vrot.slane %v1554_v28, 7  ;;  %4967 = vmatpush3.bf16.msra.mxu1 %v5198_v21 }
0x1603   :  { %v1638_v24 = vrot.slane %v1625_v8, 1  ;;  %4968 = vmatprep.subr.bf16.mxu1 %v5678_v40 }
0x1604   :  { %v1629_v5 = vrot.slane %v1566_v9, 7 }
0x1605   :  { %v1560_v27 = vpop.permute.xlu0 %1559 }
0x1606   :  { %v5157_v11 = vpack.i.bf16 %v1553_v14, %v1629_v5  ;;  %v1622_v16 = vpop.permute.xlu1 %1621  ;;  %v1565_v52 = vmul.f32 %v6229_v35, %v1560_v27  ;;  %v5199_v35 = vld [vmem:[%s7158_s4 + $0x190] ss:$8 sps:$4 sm:$0xff]  }
0x1607   :  { %v1626_v25 = vmul.f32 %v6231_v1, %v1622_v16  ;;  %4969 = vmatpush3.bf16.msra.mxu1 %v5199_v35 }
0x1608   :  { %1630 = vrot.lane.b32.xlu0 %v1565_v52, %s5677_s27  ;;  %5158 = vrot.lane.b32.xlu1 %v5157_v11, %s5677_s27 }
0x1609   :  { %v5152_v55 = vpack.i.bf16 %v1626_v25, %v1638_v24  ;;  %4990 = vmatprep.subr.bf16.mxu1 %v5678_v40  ;;  %v1786_v1 = vrot.slane %v1626_v25, 7 }
0x160c   :  { %1650 = vrot.lane.b32.xlu1 %v1647_v7, %s5677_s27  ;;  %5153 = vrot.lane.b32.xlu0 %v5152_v55, %s5676_s26 }
0x1610   :  { %1800 = vrot.lane.b32.xlu1 %v6161_v30, %s5676_s26  ;;  %5163 = vrot.lane.b32.xlu0 %v5162_v37, %s5676_s26  ;;  %v5202_v30 = vld [vmem:[%s7158_s4 + $0xe4] ss:$8 sps:$4 sm:$0xff]  }
0x1611   :  { %2207 = vmatprep.subr.bf16.mxu0 %v5202_v30 }
0x1612   :  { %2208 = vmatpush1.bf16.msra.mxu0 %v5200_v34 }
0x1614   :  { %1806 = vrot.lane.b32.xlu1 %v6109_v57, %s5676_s26  ;;  %1794 = vrot.lane.b32.xlu0 %v6204_v26, %s5676_s26  ;;  %v1787_v57 = vsel %vm317_vm1, %v1786_v1, %v1625_v8  ;;  %v1828_v26 = vrot.slane %v5860_v45, 7  ;;  %v5209_v45 = vld [vmem:[%s7158_s4 + $0x110] ss:$8 sps:$4 sm:$0xff]  }
0x1618   :  { %1824 = vrot.lane.b32.xlu1 %v5916_v44, %s5676_s26  ;;  %1812 = vrot.lane.b32.xlu0 %v6025_v20, %s5676_s26  ;;  %v5205_v44 = vld [vmem:[%s7158_s4 + $0xf4] ss:$8 sps:$4 sm:$0xff]   ;;  %v5203_v20 = vld [vmem:[%s7158_s4 + $0xf0] ss:$8 sps:$4 sm:$0xff]  }
0x1619   :  { %2209 = vmatprep.subr.bf16.mxu0 %v5205_v44 }
0x161a   :  { %2210 = vmatpush1.bf16.msra.mxu0 %v5203_v20 }
0x161b   :  { %2211 = vmatprep.subr.bf16.mxu0 %v5208_v60 }
0x161c   :  { %1818 = vrot.lane.b32.xlu1 %v5969_v50, %s5676_s26  ;;  %1788 = vrot.lane.b32.xlu0 %v1787_v57, %s5676_s26  ;;  %v5206_v50 = vld [vmem:[%s7158_s4 + $0x100] ss:$8 sps:$4 sm:$0xff]  }
0x161e   :  { %2212 = vmatpush1.bf16.msra.mxu0 %v5206_v50 }
0x161f   :  { %2213 = vmatprep.subr.bf16.mxu0 %v5211_v58 }
0x1620   :  { %1831 = vrot.lane.b32.xlu1 %v1828_v26, %s5676_s26  ;;  %1829 = vrot.lane.b32.xlu0 %v5858_v43, %s5676_s26  ;;  %v5680_v43 = vmov 1966171168  }
0x1621   :  { %v1839_v56 = vunpack.c.l.s4 %v5680_v43 }
0x1622   :  { %2214 = vmatpush1.bf16.msra.mxu0 %v5209_v45 }
0x1623   :  { %4974 = vmatprep.subr.bf16.mxu0 %v5678_v40  ;;  %v1840_v36 = vunpack.c.0.s8 %v1839_v56 }
0x1625   :  { %v6340_v0 = vsub.s32 %v1840_v36, %v5809_v18 }
0x167a   :  { %v6334_v62 = vpop.permute.xlu0 %1630  ;;  %v6336_v32 = vpop.permute.xlu1 %5158 }
0x167b   :  { %v5160_v42 = vunpack.i.l.bf16 %v6336_v32  ;;  %v5161_v2 = vunpack.i.h.bf16 %v6336_v32 }
0x167e   :  { %v5154_v10 = vpop.permute.xlu0 %5153  ;;  %v1651_v28 = vpop.permute.xlu1 %1650 }
0x167f   :  { %v5156_v41 = vunpack.i.h.bf16 %v5154_v10  ;;  %v5155_v51 = vunpack.i.l.bf16 %v5154_v10 }
0x1681   :  { %v1663_v61 = vsel %vm64_vm0, %v6334_v62, %v5155_v51  ;;  %v1664_v14 = vsel %vm64_vm0, %v5160_v42, %v5156_v41 }
0x1682   :  { %v5164_v3 = vpop.permute.xlu0 %5163  ;;  %v1801_v37 = vpop.permute.xlu1 %1800  ;;  %v1666_v29 = vsel %vm160_vm2, %v1664_v14, %v1651_v28  ;;  %v1665_v39 = vsel %vm160_vm2, %v1663_v61, %v5161_v2 }
0x1683   :  { %v5166_v12 = vunpack.i.h.bf16 %v5164_v3  ;;  %v5165_v4 = vunpack.i.l.bf16 %v5164_v3  ;;  %v1803_v15 = vsel %vm64_vm0, %v5974_v46, %v1801_v37 }
0x1684   :  { %v1893_v38 = vrot.slane %v1803_v15, %v6340_v0 }
0x1685   :  { %v1668_v48 = vsel %vm1667_vm10, %v1665_v39, %v5165_v4  ;;  %v1669_v63 = vsel %vm1667_vm10, %v1666_v29, %v5166_v12  ;;  %vm7163_vm10 = vcmask 1045504  }
0x1686   :  { %v1670_v53 = vpack.c.bf16 %v1669_v63, %v1668_v48  ;;  %v1894_v49 = vcombine.high %v1893_v38, %v1893_v38  ;;  %v1795_v6 = vpop.permute.xlu0 %1794  ;;  %v1807_v9 = vpop.permute.xlu1 %1806  ;;  %v1901_v59 = vrot.slane %v1893_v38, %v6340_v0 }
0x1687   :  { %v1797_v8 = vsel %vm64_vm0, %v5921_v47, %v1795_v6  ;;  %v1809_v5 = vsel %vm64_vm0, %v6027_v22, %v1807_v9 }
0x1688   :  { %v1869_v46 = vrot.slane %v1797_v8, %v6340_v0  ;;  %v1912_v27 = vcombine.high %v1809_v5, %v1809_v5  ;;  %v1919_v11 = vrot.slane %v1809_v5, %v6340_v0  ;;  %v1908_v16 = vrot.slane %v1894_v49, %v6340_v0 }
0x1689   :  { %v1689_v7 = vshrl.u32 %v1670_v53, 16  ;;  %v1692_v35 = vshll.u32 %v1670_v53, 16  ;;  %v1909_v34 = vcombine.high %v1901_v59, %v1901_v59 }
0x168a   :  { %v1870_v52 = vcombine.high %v1869_v46, %v1869_v46  ;;  %v1877_v25 = vrot.slane %v1869_v46, %v6340_v0  ;;  %v1813_v24 = vpop.permute.xlu0 %1812  ;;  %v1825_v21 = vpop.permute.xlu1 %1824  ;;  %v1927_v55 = vcombine.high %v1919_v11, %v1919_v11  ;;  %v1926_v1 = vrot.slane %v1912_v27, %v6340_v0 }
0x168b   :  { %v1815_v47 = vsel %vm64_vm0, %v6114_v31, %v1813_v24  ;;  %v1827_v22 = vsel %vm64_vm0, %v6210_v13, %v1825_v21  ;;  %v1910_v20 = vcombine.high %v1908_v16, %v1908_v16  ;;  %v1691_v43 = vrot.slane %v1689_v7, 3 }
0x168c   :  { %v1944_v30 = vcombine.high %v1815_v47, %v1815_v47  ;;  %v1941_v57 = vrot.slane %v1927_v55, %v6340_v0  ;;  %v1993_v44 = vcombine.high %v1827_v22, %v1827_v22  ;;  %v1884_v26 = vrot.slane %v1870_v52, %v6340_v0 }
0x168d   :  { %v1885_v50 = vcombine.high %v1877_v25, %v1877_v25  ;;  %v1694_v56 = vrot.slane %v1692_v35, 4  ;;  %v1934_v36 = vrot.slane %v1926_v1, %v6340_v0  ;;  %v2064_v51 = vrot.slane %v1909_v34, %v5812_v19 }
0x168e   :  { %v1951_v60 = vrot.slane %v1944_v30, %v6340_v0  ;;  %v1789_v31 = vpop.permute.xlu0 %1788  ;;  %v1819_v58 = vpop.permute.xlu1 %1818  ;;  %v2000_v13 = vrot.slane %v1993_v44, %v6340_v0  ;;  %v1942_v61 = vcombine.high %v1941_v57, %v1941_v57  ;;  %v2068_v3 = vrot.slane %v1910_v20, %v5812_v19 }
0x168f   :  { %v1791_v45 = vsel %vm64_vm0, %v5868_v54, %v1789_v31  ;;  %v1821_v41 = vsel %vm64_vm0, %v6166_v33, %v1819_v58  ;;  %v2054_v54 = vrot.slane %v1884_v26, %v5812_v19  ;;  %v2058_v15 = vrot.slane %v1885_v50, %v5812_v19 }
0x1690   :  { %v1952_v10 = vcombine.high %v1951_v60, %v1951_v60  ;;  %v1844_v28 = vrot.slane %v1791_v45, %v6340_v0  ;;  %v2001_v14 = vcombine.high %v2000_v13, %v2000_v13  ;;  %v1968_v2 = vcombine.high %v1821_v41, %v1821_v41  ;;  %v5212_v41 = vld [vmem:[%s7158_s4 + $0x60] ss:$8 sps:$4 sm:$0xff]  }
0x1691   :  { %v1695_v33 = vor.u32 %v1694_v56, %v1691_v43  ;;  %v2078_v38 = vrot.slane %v1934_v36, %v5812_v19  ;;  %v2074_v49 = vrot.slane %v1942_v61, %v5812_v19  ;;  %v1959_v6 = vrot.slane %v1951_v60, %v6340_v0  ;;  %v5213_v61 = vld [vmem:[%s7158_s4 + $0x70] ss:$8 sps:$4 sm:$0xff]  }
0x1692   :  { %v1845_v37 = vcombine.high %v1844_v28, %v1844_v28  ;;  %v1852_v12 = vrot.slane %v1844_v28, %v6340_v0  ;;  %v1830_v4 = vpop.permute.xlu0 %1829  ;;  %v1966_v29 = vrot.slane %v1952_v10, %v6340_v0  ;;  %v1975_v39 = vrot.slane %v1968_v2, %v6340_v0  ;;  %v1832_v5 = vpop.permute.xlu1 %1831  ;;  %v2251_v2 = vld [vmem:[%s7155_s1 + $0x8] sm:$0xff] }
0x1693   :  { %v1835_v53 = vsel %vm64_vm0, %v6334_v62, %v1830_v4  ;;  %v2015_v9 = vrot.slane %v2001_v14, %v6340_v0  ;;  %4971 = vmatmul.mubr.bf16.vlgmr.msra.gmra.mrb[16].mxu1 %v1695_v33  ;;  %v2008_v46 = vrot.slane %v2000_v13, %v6340_v0  ;;  %v1836_v55 = vsel %vm64_vm0, %v5160_v42, %v1832_v5  ;;  %v2250_v14 = vld [vmem:[%s7155_s1] sm:$0xff] }
0x1694   :  { %v1859_v48 = vrot.slane %v1845_v37, %v6340_v0  ;;  %v2122_v63 = vsel %vm2121_vm11, %v1852_v12, %v2054_v54  ;;  %v1976_v8 = vcombine.high %v1975_v39, %v1975_v39  ;;  %v1983_v59 = vrot.slane %v1975_v39, %v6340_v0  ;;  %4998 = vmatprep.mubr.msk.bf16.mxu1 %vm5679_vm9, %v5678_v40  ;;  %v6445_v54 = vld [vmem:[%s7158_s4 + $0xc0] ss:$8 sps:$4 sm:$0xff]   ;;  %v6452_v37 = vld [vmem:[%s7158_s4 + $0xd0] ss:$8 sps:$4 sm:$0xff]   ;;  %v1687_v12 = vld [vmem:[%s7159_s5 + $0x4] ss:$0 sm:$0xff] }
0x1695   :  { %v2020_v11 = vcombine.high %v1835_v53, %v1835_v53  ;;  %v2088_v62 = vrot.slane %v1966_v29, %v5812_v19  ;;  %v2125_v16 = vsel %vm2124_vm12, %v2122_v63, %v2064_v51  ;;  %v2017_v47 = vcombine.high %v2015_v9, %v2015_v9 }
0x1696   :  { %v2123_v27 = vsel %vm2121_vm11, %v1859_v48, %v2058_v15  ;;  %v1990_v25 = vrot.slane %v1976_v8, %v6340_v0  ;;  %v1991_v21 = vcombine.high %v1983_v59, %v1983_v59  ;;  %v2043_v35 = vrot.slane %v1836_v55, %v6340_v0 }
0x1697   :  { %v2126_v52 = vsel %vm2124_vm12, %v2123_v27, %v2068_v3  ;;  %v2027_v7 = vrot.slane %v2020_v11, %v6340_v0  ;;  %v2128_v1 = vsel %vm7161_vm13, %v2125_v16, %v2074_v49  ;;  %v2084_v44 = vrot.slane %v1959_v6, %v5812_v19  ;;  %v6488_v16 = vld [vmem:[%s7159_s5 + $0x2] ss:$0 sm:$0xff] }
0x1698   :  { %v2129_v24 = vsel %vm7161_vm13, %v2126_v52, %v2078_v38  ;;  %v2094_v30 = vrot.slane %v1990_v25, %v5812_v19  ;;  %v2098_v34 = vrot.slane %v1991_v21, %v5812_v19  ;;  %v2016_v20 = vcombine.high %v2008_v46, %v2008_v46  ;;  %v4819_v38 = vld [vmem:[%s7159_s5 + $0x3] ss:$8 sm:$0x3] }
0x1699   :  { %v2132_v22 = vsel %vm2130_vm14, %v2129_v24, %v2088_v62  ;;  %v2028_v57 = vcombine.high %v2027_v7, %v2027_v7  ;;  %v2050_v26 = vrot.slane %v2043_v35, %v6340_v0  ;;  %v2108_v50 = vrot.slane %v2017_v47, %v5812_v19 }
0x169a   :  { %v2135_v32 = vsel %vm2133_vm15, %v2132_v22, %v2098_v34  ;;  %v2131_v60 = vsel %vm2130_vm14, %v2128_v1, %v2084_v44  ;;  %v2104_v13 = vrot.slane %v2016_v20, %v5812_v19  ;;  %vm7162_vm13 = vcmask 1046528  }
0x169b   :  { %v2035_v42 = vrot.slane %v2028_v57, %v6340_v0  ;;  %v2134_v31 = vsel %vm2133_vm15, %v2131_v60, %v2094_v30  ;;  %v2138_v45 = vsel %vm7163_vm10, %v2135_v32, %v2108_v50  ;;  %v2118_v56 = vrot.slane %v2050_v26, %v5812_v19  ;;  %v6513_v60 = vld [vmem:[%s7156_s2] sm:$0x3] }
0x169c   :  { %v2137_v36 = vsel %vm7163_vm10, %v2134_v31, %v2104_v13  ;;  %v2252_v3 = vpack.c.bf16 %v2251_v2, %v2250_v14  ;;  %v2161_v53 = vrot.slane %v4819_v38, %v5818_v23  ;;  %v2157_v7 = vrot.slane %v4819_v38, %v5812_v19 }
0x169d   :  { %v2036_v58 = vcombine.high %v2035_v42, %v2035_v42  ;;  %v2141_v10 = vsel %vm7162_vm13, %v2138_v45, %v2118_v56  ;;  %v6504_v42 = vand.u32 127, %v34_v17  ;;  %vm2439_vm10 = vcmask 58368  }
0x169f   :  { %v2114_v43 = vrot.slane %v2036_v58, %v5812_v19  ;;  %v6508_v26 = vsub.s32 %v6504_v42, %v5809_v18 }
0x16a1   :  { %v2140_v28 = vsel %vm7162_vm13, %v2137_v36, %v2114_v43  ;;  %vm2315_vm13 = vcmp.gt.f32.partialorder %v6513_v60, 0.5 }
0x16a2   :  { %v2142_v51 = vpack.c.bf16 %v2141_v10, %v2140_v28 }
0x16a4   :  { %4828 = vmatmul.mubr.msk.bf16.vlgmr.msra.gmra.mrb[20].mxu0 %vm160_vm2, %v2142_v51  ;;  %v6526_v51 = vld [vmem:[%s7158_s4 + $0x80] ss:$8 sps:$4 sm:$0xff]  }
0x16a5   :  { %4975 = vmatpush3.bf16.msra.mxu0 %v5212_v41  ;;  %4978 = vmatprep.mubr.msk.bf16.mxu0 %vm5679_vm9, %v5678_v40 }
0x16a6   :  { %4976 = vmatprep.subr.bf16.mxu0 %v5678_v40  ;;  %4991 = vmatpush3.bf16.msra.mxu1 %v6526_v51 }
0x16a7   :  { %4992 = vmatprep.subr.bf16.mxu1 %v5678_v40 }
0x16a9   :  { %4977 = vmatpush3.bf16.msra.mxu0 %v5213_v61  ;;  %v6533_v61 = vld [vmem:[%s7158_s4 + $0x90] ss:$8 sps:$4 sm:$0xff]  }
0x16aa   :  { %4982 = vmatprep.subr.bf16.mxu0 %v5678_v40  ;;  %4993 = vmatpush3.bf16.msra.mxu1 %v6533_v61 }
0x16ab   :  { %4994 = vmatprep.subr.bf16.mxu1 %v5678_v40 }
0x16ac   :  { %4979 = vmatmul.mubr.msk.bf16.vlgmr.msra.gmra.mrb[24].mxu0 %vm64_vm0, %v2252_v3  ;;  %v6540_v3 = vld [vmem:[%s7158_s4 + $0xa0] ss:$8 sps:$4 sm:$0xff]  }
0x16ad   :  { %4983 = vmatpush3.bf16.msra.mxu0 %v6445_v54  ;;  %4986 = vmatprep.mubr.msk.bf16.mxu0 %vm5679_vm9, %v5678_v40 }
0x16ae   :  { %4984 = vmatprep.subr.bf16.mxu0 %v5678_v40  ;;  %4995 = vmatpush3.bf16.msra.mxu1 %v6540_v3 }
0x16af   :  { %4996 = vmatprep.subr.bf16.mxu1 %v5678_v40 }
0x16b1   :  { %4985 = vmatpush3.bf16.msra.mxu0 %v6452_v37 }
0x16b2   :  { %5002 = vmatprep.subr.bf16.mxu0 %v5678_v40 }
0x1766   :  { %v1779_v4 = vpop.f32.mrb[16].mxu1 }
0x1767   :  { %v1780_v15 = vadd.f32 %v1779_v4, %v1687_v12  ;;  %v4972_v29 = vpop.f32.mrb[17].mxu1 }
0x1768   :  { %v1782_v39 = vpop.f32.mrb[18].mxu1 }
0x1769   :  { %5482 = vtanh.f32 %v1780_v15  ;;  %v4973_v33 = vpop.f32.mrb[19].mxu1  ;;  %v6549_v15 = vld [vmem:[%s7158_s4 + $0xb0] ss:$8 sps:$4 sm:$0xff]  }
0x176a   :  { %4997 = vmatpush3.bf16.msra.mxu1 %v6549_v15 }
0x176b   :  { %5022 = vmatprep.subr.bf16.mxu1 %v5678_v40 }
0x1773   :  { %v6465_v48 = vpop.eup %5482 }
0x1774   :  { %v2329_v63 = vpack.c.bf16 %v6465_v48, %v6465_v48 }
0x1776   :  { %4987 = vmatmul.mubr.msk.bf16.vlgmr.msra.gmra.mrb[28].mxu0 %vm64_vm0, %v2329_v63 }
0x1777   :  { %v2241_v49 = vpop.f32.mrb[20].mxu0  ;;  %5003 = vmatpush3.bf16.msra.mxu0 %v6445_v54  ;;  %5006 = vmatprep.mubr.msk.bf16.mxu0 %vm5679_vm9, %v5678_v40 }
0x1778   :  { %v2243_v6 = vpop.f32.mrb[21].mxu0  ;;  %5004 = vmatprep.subr.bf16.mxu0 %v5678_v40  ;;  %v6494_v1 = vadd.f32 %v2241_v49, %v2157_v7 }
0x1779   :  { %v6474_v9 = vadd.f32 %v2243_v6, %v2161_v53  ;;  %v2245_v8 = vpop.f32.mrb[22].mxu0 }
0x177a   :  { %v2247_v5 = vpop.f32.mrb[23].mxu0  ;;  %v6498_v57 = vadd.f32 %v2245_v8, %v2157_v7 }
0x177b   :  { %v6477_v46 = vadd.f32 %v2247_v5, %v2161_v53  ;;  %5005 = vmatpush3.bf16.msra.mxu0 %v6452_v37 }
0x177c   :  { %5010 = vmatprep.subr.bf16.mxu0 %v5678_v40 }
0x177f   :  { %v6481_v27 = vpop.f32.mrb[24].mxu0 }
0x1780   :  { %v4980_v59 = vpop.f32.mrb[25].mxu0 }
0x1781   :  { %v6483_v11 = vpop.f32.mrb[26].mxu0 }
0x1782   :  { %v4981_v62 = vpop.f32.mrb[27].mxu0 }
0x1849   :  { %v2379_v52 = vpop.f32.mrb[28].mxu0 }
0x184a   :  { %v2380_v25 = vadd.f32 %v2379_v52, %v6488_v16  ;;  %v4988_v24 = vpop.f32.mrb[29].mxu0 }
0x184b   :  { %v2382_v21 = vpop.f32.mrb[30].mxu0 }
0x184c   :  { %v2392_v55 = vrot.slane %v2380_v25, %v6340_v0  ;;  %v4989_v47 = vpop.f32.mrb[31].mxu0 }
0x184e   :  { %v2393_v22 = vcombine.high %v2392_v55, %v2392_v55  ;;  %v2400_v35 = vrot.slane %v2392_v55, %v6340_v0 }
0x1850   :  { %v2407_v30 = vrot.slane %v2393_v22, %v6340_v0  ;;  %v2411_v34 = vrot.slane %v2400_v35, %v5812_v19 }
0x1852   :  { %v2418_v44 = vmul.f32 %v2411_v34, %v6494_v1  ;;  %v2415_v20 = vrot.slane %v2407_v30, %v5812_v19  ;;  %v2257_v34 = vld [vmem:[%s7159_s5 + $0x1] ss:$0 sm:$0xff] }
0x1854   :  { %2420 = vadd.xlane.f32.xlu0 %v2418_v44  ;;  %v2419_v32 = vmul.f32 %v2415_v20, %v6498_v57  ;;  %v6575_v44 = vadd.f32 %v6481_v27, %v2257_v34 }
0x1856   :  { %2422 = vadd.xlane.f32.xlu1 %v2419_v32  ;;  %v6578_v32 = vadd.f32 %v6483_v11, %v2257_v34 }
0x18e1   :  { %v2421_v50 = vpop.xlane.xlu0 %2420 }
0x18e2   :  { %v2431_v58 = vrot.slane %v2421_v50, %v6508_v26 }
0x18e3   :  { %v2423_v31 = vpop.xlane.xlu1 %2422 }
0x18e4   :  { %v2435_v13 = vrot.slane %v2423_v31, %v6508_v26 }
0x18e6   :  { %v2436_v17 = vsel %vm317_vm1, %v2435_v13, %v2431_v58 }
0x18e7   :  { %v2438_v18 = vsel %vm2315_vm13, %v2436_v17, -1e+30 }
0x18e8   :  { %v2440_v45 = vsel %vm2439_vm10, %v2438_v18, -inf }
0x18e9   :  { %2441 = vmax.xlane.f32.xlu0 %v2440_v45 }
0x1976   :  { %v2442_v43 = vpop.xlane.xlu0 %2441 }
0x1977   :  { %v2443_v56 = vsub.f32 %v2438_v18, %v2442_v43 }
0x1979   :  { %v2444_v36 = vmul.f32 1.442695, %v2443_v56 }
0x197b   :  { %5484 = vpow2.f32 %v2444_v36 }
0x1985   :  { %v5485_v10 = vpop.eup %5484 }
0x1986   :  { %v2446_v28 = vsel %vm2439_vm10, %v5485_v10, 0.0 }
0x1987   :  { %2447 = vadd.xlane.f32.xlu0 %v2446_v28 }
0x1a14   :  { %v2448_v41 = vpop.xlane.xlu0 %2447 }
0x1a15   :  { %5486 = vrcp.f32 %v2448_v41 }
0x1a1f   :  { %v5487_v14 = vpop.eup %5486 }
0x1a20   :  { %v2450_v2 = vmul.f32 %v5487_v14, %v5485_v10 }
0x1a22   :  { %v2461_v12 = vrot.slane %v2450_v2, %v5818_v23  ;;  %v2454_v4 = vrot.slane %v2450_v2, %v5812_v19 }
0x1a24   :  { %2463 = vbcast.lane.b32.xlu0 %v2461_v12, 256  ;;  %2456 = vbcast.lane.b32.xlu1 %v2454_v4, 256 }
0x1a28   :  { %2486 = vrot.lane.b32.xlu1 %v6465_v48, %s5677_s27 }
0x1a96   :  { %v2464_v29 = vpop.permute.xlu0 %2463  ;;  %v2457_v39 = vpop.permute.xlu1 %2456 }
0x1a97   :  { %v2466_v33 = vmul.f32 %v2464_v29, %v6477_v46  ;;  %v2465_v38 = vmul.f32 %v2457_v39, %v6474_v9 }
0x1a99   :  { %v2474_v63 = vsel %vm64_vm0, %v2466_v33, 0.0  ;;  %v2467_v53 = vsel %vm64_vm0, %v2465_v38, 0.0  ;;  %v2578_v38 = vrot.slane %v6465_v48, 1 }
0x1a9a   :  { %v2475_v49 = vrot.slane %v2474_v63, 4  ;;  %v2468_v6 = vrot.slane %v2467_v53, 4  ;;  %v2487_v22 = vpop.permute.xlu1 %2486 }
0x1a9c   :  { %v2476_v8 = vadd.f32 %v2475_v49, %v2474_v63  ;;  %v2469_v5 = vadd.f32 %v2468_v6, %v2467_v53 }
0x1a9e   :  { %v2477_v59 = vrot.slane %v2476_v8, 2  ;;  %v2470_v62 = vrot.slane %v2469_v5, 2 }
0x1aa0   :  { %v2478_v52 = vadd.f32 %v2477_v59, %v2476_v8  ;;  %v2471_v25 = vadd.f32 %v2470_v62, %v2469_v5 }
0x1aa2   :  { %v2479_v24 = vrot.slane %v2478_v52, 1  ;;  %v2472_v21 = vrot.slane %v2471_v25, 1 }
0x1aa4   :  { %v2473_v7 = vadd.f32 %v2472_v21, %v2471_v25  ;;  %v2480_v55 = vadd.f32 %v2479_v24, %v2478_v52 }
0x1aa6   :  { %v6560_v47 = vsel %vm317_vm1, %v2480_v55, %v2473_v7 }
0x1aa7   :  { %v2489_v35 = vsel %vm64_vm0, %v6560_v47, %v2487_v22 }
0x1aa8   :  { %v2490_v30 = vpack.c.bf16 %v2489_v35, %v2489_v35 }
0x1aaa   :  { %4999 = vmatmul.mubr.msk.bf16.vlgmr.msra.gmra.mrb[20].mxu1 %vm160_vm2, %v2490_v30 }
0x1aab   :  { %5023 = vmatpush3.bf16.msra.mxu1 %v6445_v54  ;;  %5026 = vmatprep.mubr.msk.bf16.mxu1 %vm5679_vm9, %v5678_v40 }
0x1aac   :  { %5024 = vmatprep.subr.bf16.mxu1 %v5678_v40 }
0x1aaf   :  { %5025 = vmatpush3.bf16.msra.mxu1 %v6452_v37 }
0x1ab0   :  { %5030 = vmatprep.subr.bf16.mxu1 %v5678_v40 }
0x1b7d   :  { %v2552_v20 = vpop.f32.mrb[20].mxu1 }
0x1b7e   :  { %v2559_v50 = vrot.slane %v2552_v20, 1  ;;  %v2562_v31 = vadd.f32 %v2552_v20, %v6575_v44  ;;  %v5000_v58 = vpop.f32.mrb[21].mxu1 }
0x1b7f   :  { %v2555_v13 = vpop.f32.mrb[22].mxu1 }
0x1b80   :  { %v2563_v17 = vadd.f32 %v2559_v50, %v6578_v32  ;;  %5488 = vtanh.f32 %v2562_v31  ;;  %v5001_v18 = vpop.f32.mrb[23].mxu1  ;;  %v4840_v27 = vmul.f32 -1.442695, %v2562_v31 }
0x1b82   :  { %5490 = vtanh.f32 %v2563_v17  ;;  %v4841_v56 = vmul.f32 -1.442695, %v2563_v17 }
0x1b83   :  { %5492 = vpow2.f32 %v4840_v27 }
0x1b84   :  { %5494 = vpow2.f32 %v4841_v56 }
0x1b8a   :  { %v5489_v45 = vpop.eup %5488 }
0x1b8b   :  { %2585 = vrot.lane.b32.xlu0 %v5489_v45, %s5676_s26 }
0x1b8c   :  { %v5491_v43 = vpop.eup %5490 }
0x1b8d   :  { %2587 = vrot.lane.b32.xlu1 %v5491_v43, %s5676_s26  ;;  %v5493_v11 = vpop.eup %5492 }
0x1b8e   :  { %v5495_v36 = vpop.eup %5494  ;;  %v2570_v10 = vadd.f32 1.0, %v5493_v11 }
0x1b8f   :  { %v2571_v28 = vadd.f32 1.0, %v5495_v36 }
0x1b90   :  { %5496 = vrcp.f32 %v2570_v10 }
0x1b91   :  { %5498 = vrcp.f32 %v2571_v28 }
0x1b9a   :  { %v5497_v41 = vpop.eup %5496 }
0x1b9b   :  { %v5499_v12 = vpop.eup %5498  ;;  %v2581_v39 = vmul.f32 %v5497_v41, %v6465_v48 }
0x1b9c   :  { %v2582_v53 = vmul.f32 %v5499_v12, %v2578_v38 }
0x1bfd   :  { %v2586_v14 = vpop.permute.xlu0 %2585 }
0x1bfe   :  { %v2591_v2 = vmul.f32 %v5497_v41, %v2586_v14 }
0x1bff   :  { %v2588_v4 = vpop.permute.xlu1 %2587 }
0x1c00   :  { %2595 = vrot.lane.b32.xlu0 %v2591_v2, %s5677_s27  ;;  %v2592_v29 = vmul.f32 %v5499_v12, %v2588_v4 }
0x1c02   :  { %2597 = vrot.lane.b32.xlu1 %v2592_v29, %s5677_s27 }
0x1c72   :  { %v2596_v33 = vpop.permute.xlu0 %2595 }
0x1c73   :  { %v6588_v63 = vadd.f32 %v2596_v33, %v2581_v39 }
0x1c74   :  { %v2598_v49 = vpop.permute.xlu1 %2597 }
0x1c75   :  { %5500 = vtanh.f32 %v6588_v63  ;;  %v6591_v6 = vadd.f32 %v2598_v49, %v2582_v53 }
0x1c77   :  { %5502 = vtanh.f32 %v6591_v6 }
0x1c7f   :  { %v5501_v8 = vpop.eup %5500 }
0x1c80   :  { %2607 = vrot.lane.b32.xlu0 %v5501_v8, %s5676_s26 }
0x1c81   :  { %v5503_v5 = vpop.eup %5502 }
0x1c82   :  { %2609 = vrot.lane.b32.xlu1 %v5503_v5, %s5676_s26 }
0x1cf2   :  { %v2608_v59 = vpop.permute.xlu0 %2607 }
0x1cf3   :  { %v2613_v62 = vmul.f32 %v5497_v41, %v2608_v59 }
0x1cf4   :  { %v2610_v52 = vpop.permute.xlu1 %2609 }
0x1cf5   :  { %v2614_v48 = vmul.f32 %v5499_v12, %v2610_v52  ;;  %v2626_v25 = vpack.c.bf16 %v2613_v62, %v2613_v62 }
0x1cf7   :  { %v2617_v24 = vrot.slane %v2614_v48, 7  ;;  %v2627_v21 = vpack.c.bf16 %v2614_v48, %v2614_v48  ;;  %v2630_v22 = vunpack.c.l.b16 %v2626_v25 }
0x1cf9   :  { %v2631_v7 = vunpack.c.l.b16 %v2627_v21  ;;  %v6597_v55 = vsel %vm317_vm1, %v2617_v24, %v2613_v62 }
0x1cfb   :  { %v2632_v35 = vrot.slane %v2631_v7, 7 }
0x1cfd   :  { %v2633_v30 = vsel %vm317_vm1, %v2632_v35, %v2630_v22 }
0x1cfe   :  { %v2634_v34 = vpack.c.b16 %v2633_v30, %v2633_v30 }
0x1d00   :  { %2635 = vrot.lane.b32.xlu1 %v2634_v34, %s5677_s27 }
0x1d72   :  { %v2636_v20 = vpop.permute.xlu1 %2635 }
0x1d73   :  { %5007 = vmatmul.mubr.msk.bf16.vlgmr.msra.gmra.mrb[32].mxu0 %vm64_vm0, %v2636_v20 }
0x1d74   :  { %5011 = vmatpush3.bf16.msra.mxu0 %v6526_v51  ;;  %5018 = vmatprep.mubr.msk.bf16.mxu0 %vm5679_vm9, %v5678_v40 }
0x1d75   :  { %5012 = vmatprep.subr.bf16.mxu0 %v5678_v40 }
0x1d78   :  { %5013 = vmatpush3.bf16.msra.mxu0 %v6533_v61 }
0x1d79   :  { %5014 = vmatprep.subr.bf16.mxu0 %v5678_v40 }
0x1d7c   :  { %5015 = vmatpush3.bf16.msra.mxu0 %v6540_v3 }
0x1d7d   :  { %5016 = vmatprep.subr.bf16.mxu0 %v5678_v40 }
0x1d80   :  { %5017 = vmatpush3.bf16.msra.mxu0 %v6549_v15 }
0x1d81   :  { %5042 = vmatprep.subr.bf16.mxu0 %v5678_v40 }
0x1e46   :  { %v2674_v50 = vpop.f32.mrb[32].mxu0 }
0x1e47   :  { %v2675_v31 = vadd.f32 %v2674_v50, %v6488_v16  ;;  %v5008_v58 = vpop.f32.mrb[33].mxu0 }
0x1e48   :  { %v2677_v13 = vpop.f32.mrb[34].mxu0 }
0x1e49   :  { %v2687_v17 = vrot.slane %v2675_v31, %v6340_v0  ;;  %v5009_v18 = vpop.f32.mrb[35].mxu0 }
0x1e4b   :  { %v2688_v45 = vcombine.high %v2687_v17, %v2687_v17  ;;  %v2695_v43 = vrot.slane %v2687_v17, %v6340_v0 }
0x1e4d   :  { %v2702_v27 = vrot.slane %v2688_v45, %v6340_v0  ;;  %v2706_v56 = vrot.slane %v2695_v43, %v5812_v19 }
0x1e4f   :  { %v2713_v11 = vmul.f32 %v2706_v56, %v6494_v1  ;;  %v2710_v36 = vrot.slane %v2702_v27, %v5812_v19 }
0x1e51   :  { %2715 = vadd.xlane.f32.xlu0 %v2713_v11  ;;  %v2714_v10 = vmul.f32 %v2710_v36, %v6498_v57 }
0x1e53   :  { %2717 = vadd.xlane.f32.xlu1 %v2714_v10 }
0x1ede   :  { %v2716_v28 = vpop.xlane.xlu0 %2715 }
0x1edf   :  { %v2724_v14 = vrot.slane %v2716_v28, %v6508_v26 }
0x1ee0   :  { %v2718_v41 = vpop.xlane.xlu1 %2717 }
0x1ee1   :  { %v2728_v2 = vrot.slane %v2718_v41, %v6508_v26 }
0x1ee3   :  { %v2729_v12 = vsel %vm317_vm1, %v2728_v2, %v2724_v14 }
0x1ee4   :  { %v2731_v4 = vsel %vm2315_vm13, %v2729_v12, -1e+30 }
0x1ee5   :  { %v2732_v29 = vsel %vm2439_vm10, %v2731_v4, -inf }
0x1ee6   :  { %2733 = vmax.xlane.f32.xlu0 %v2732_v29 }
0x1f73   :  { %v2734_v39 = vpop.xlane.xlu0 %2733 }
0x1f74   :  { %v2735_v33 = vsub.f32 %v2731_v4, %v2734_v39 }
0x1f76   :  { %v2736_v38 = vmul.f32 1.442695, %v2735_v33 }
0x1f78   :  { %5504 = vpow2.f32 %v2736_v38 }
0x1f82   :  { %v5505_v53 = vpop.eup %5504 }
0x1f83   :  { %v2738_v49 = vsel %vm2439_vm10, %v5505_v53, 0.0 }
0x1f84   :  { %2739 = vadd.xlane.f32.xlu0 %v2738_v49 }
0x2011   :  { %v2740_v8 = vpop.xlane.xlu0 %2739 }
0x2012   :  { %5506 = vrcp.f32 %v2740_v8 }
0x201c   :  { %v5507_v5 = vpop.eup %5506 }
0x201d   :  { %v2742_v59 = vmul.f32 %v5507_v5, %v5505_v53 }
0x201f   :  { %v2753_v62 = vrot.slane %v2742_v59, %v5818_v23  ;;  %v2746_v52 = vrot.slane %v2742_v59, %v5812_v19 }
0x2021   :  { %2755 = vbcast.lane.b32.xlu0 %v2753_v62, 256  ;;  %2748 = vbcast.lane.b32.xlu1 %v2746_v52, 256 }
0x2025   :  { %2777 = vrot.lane.b32.xlu1 %v6597_v55, %s5676_s26 }
0x2093   :  { %v2756_v48 = vpop.permute.xlu0 %2755  ;;  %v2749_v25 = vpop.permute.xlu1 %2748 }
0x2094   :  { %v2758_v24 = vmul.f32 %v2756_v48, %v6477_v46  ;;  %v2757_v21 = vmul.f32 %v2749_v25, %v6474_v9 }
0x2096   :  { %v2766_v7 = vsel %vm64_vm0, %v2758_v24, 0.0  ;;  %v2759_v22 = vsel %vm64_vm0, %v2757_v21, 0.0 }
0x2097   :  { %v2767_v35 = vrot.slane %v2766_v7, 4  ;;  %v2760_v30 = vrot.slane %v2759_v22, 4  ;;  %v2778_v56 = vpop.permute.xlu1 %2777 }
0x2099   :  { %v2768_v34 = vadd.f32 %v2767_v35, %v2766_v7  ;;  %v2761_v20 = vadd.f32 %v2760_v30, %v2759_v22  ;;  %v2848_v7 = vrot.slane %v6591_v6, 7  ;;  %v2847_v35 = vrot.slane %v6588_v63, 7 }
0x209b   :  { %v2769_v50 = vrot.slane %v2768_v34, 2  ;;  %v2762_v31 = vrot.slane %v2761_v20, 2 }
0x209d   :  { %v2770_v58 = vadd.f32 %v2769_v50, %v2768_v34  ;;  %v2763_v13 = vadd.f32 %v2762_v31, %v2761_v20 }
0x209f   :  { %v2771_v17 = vrot.slane %v2770_v58, 1  ;;  %v2764_v18 = vrot.slane %v2763_v13, 1 }
0x20a1   :  { %v2772_v45 = vadd.f32 %v2771_v17, %v2770_v58  ;;  %v2765_v43 = vadd.f32 %v2764_v18, %v2763_v13 }
0x20a3   :  { %v2775_v27 = vsel %vm317_vm1, %v2772_v45, %v2765_v43  ;;  %v6637_v11 = vsel %vm500_vm3, %v2772_v45, %v2765_v43 }
0x20a4   :  { %v2780_v36 = vsel %vm64_vm0, %v2775_v27, %v2778_v56 }
0x20a5   :  { %v2781_v10 = vpack.c.bf16 %v2780_v36, %v2780_v36 }
0x20a7   :  { %5019 = vmatmul.mubr.msk.bf16.vlgmr.msra.gmra.mrb[36].mxu0 %vm160_vm2, %v2781_v10 }
0x20a8   :  { %5043 = vmatpush3.bf16.msra.mxu0 %v6445_v54  ;;  %5046 = vmatprep.mubr.msk.bf16.mxu0 %vm5679_vm9, %v5678_v40 }
0x20a9   :  { %5044 = vmatprep.subr.bf16.mxu0 %v5678_v40 }
0x20ac   :  { %5045 = vmatpush3.bf16.msra.mxu0 %v6452_v37 }
0x20ad   :  { %5050 = vmatprep.subr.bf16.mxu0 %v5678_v40 }
0x217a   :  { %v2819_v28 = vpop.f32.mrb[36].mxu0 }
0x217b   :  { %v2826_v41 = vrot.slane %v2819_v28, 7  ;;  %v2830_v14 = vadd.f32 %v2819_v28, %v6578_v32  ;;  %v5020_v2 = vpop.f32.mrb[37].mxu0 }
0x217c   :  { %v2822_v12 = vpop.f32.mrb[38].mxu0 }
0x217d   :  { %v2829_v4 = vadd.f32 %v2826_v41, %v6575_v44  ;;  %5508 = vtanh.f32 %v2830_v14  ;;  %v5021_v29 = vpop.f32.mrb[39].mxu0  ;;  %v4845_v38 = vmul.f32 -1.442695, %v2830_v14 }
0x217f   :  { %5510 = vtanh.f32 %v2829_v4  ;;  %v4844_v53 = vmul.f32 -1.442695, %v2829_v4 }
0x2180   :  { %5512 = vpow2.f32 %v4845_v38 }
0x2181   :  { %5514 = vpow2.f32 %v4844_v53 }
0x2187   :  { %v5509_v39 = vpop.eup %5508 }
0x2188   :  { %2857 = vrot.lane.b32.xlu0 %v5509_v39, %s5676_s26 }
0x2189   :  { %v5511_v33 = vpop.eup %5510 }
0x218a   :  { %2855 = vrot.lane.b32.xlu1 %v5511_v33, %s5676_s26  ;;  %v5513_v49 = vpop.eup %5512 }
0x218b   :  { %v5515_v8 = vpop.eup %5514  ;;  %v2838_v5 = vadd.f32 1.0, %v5513_v49 }
0x218c   :  { %v2837_v59 = vadd.f32 1.0, %v5515_v8 }
0x218d   :  { %5516 = vrcp.f32 %v2838_v5 }
0x218e   :  { %5518 = vrcp.f32 %v2837_v59 }
0x2197   :  { %v5517_v62 = vpop.eup %5516 }
0x2198   :  { %v5519_v25 = vpop.eup %5518  ;;  %v2852_v22 = vmul.f32 %v5517_v62, %v2848_v7 }
0x2199   :  { %v2851_v20 = vmul.f32 %v5519_v25, %v2847_v35 }
0x21fa   :  { %v2858_v52 = vpop.permute.xlu0 %2857 }
0x21fb   :  { %v2862_v48 = vmul.f32 %v5517_v62, %v2858_v52 }
0x21fc   :  { %v2856_v24 = vpop.permute.xlu1 %2855 }
0x21fd   :  { %2867 = vrot.lane.b32.xlu0 %v2862_v48, %s5677_s27  ;;  %v2861_v21 = vmul.f32 %v5519_v25, %v2856_v24 }
0x21ff   :  { %2865 = vrot.lane.b32.xlu1 %v2861_v21, %s5677_s27 }
0x226f   :  { %v2868_v30 = vpop.permute.xlu0 %2867 }
0x2270   :  { %v6655_v34 = vadd.f32 %v2868_v30, %v2852_v22 }
0x2271   :  { %v2866_v50 = vpop.permute.xlu1 %2865 }
0x2272   :  { %5520 = vtanh.f32 %v6655_v34  ;;  %v6658_v31 = vadd.f32 %v2866_v50, %v2851_v20 }
0x2274   :  { %5522 = vtanh.f32 %v6658_v31 }
0x227c   :  { %v5521_v58 = vpop.eup %5520 }
0x227d   :  { %2879 = vrot.lane.b32.xlu0 %v5521_v58, %s5676_s26 }
0x227e   :  { %v5523_v13 = vpop.eup %5522 }
0x227f   :  { %2877 = vrot.lane.b32.xlu1 %v5523_v13, %s5676_s26 }
0x22ef   :  { %v2880_v6 = vpop.permute.xlu0 %2879 }
0x22f0   :  { %v2884_v17 = vmul.f32 %v5517_v62, %v2880_v6 }
0x22f1   :  { %v2878_v18 = vpop.permute.xlu1 %2877 }
0x22f2   :  { %v2887_v63 = vrot.slane %v2884_v17, 7  ;;  %v2883_v45 = vmul.f32 %v5519_v25, %v2878_v18  ;;  %v2898_v43 = vpack.c.bf16 %v2884_v17, %v2884_v17 }
0x22f4   :  { %v2897_v27 = vpack.c.bf16 %v2883_v45, %v2883_v45  ;;  %v3048_v56 = vrot.slane %v2883_v45, 1  ;;  %v6664_v36 = vsel %vm500_vm3, %v2887_v63, %v2883_v45  ;;  %v2902_v41 = vunpack.c.l.b16 %v2898_v43 }
0x22f6   :  { %v2901_v10 = vunpack.c.l.b16 %v2897_v27  ;;  %v3049_v28 = vsel %vm317_vm1, %v2884_v17, %v3048_v56 }
0x22f8   :  { %v2903_v14 = vrot.slane %v2901_v10, 1 }
0x22fa   :  { %v2904_v2 = vsel %vm317_vm1, %v2902_v41, %v2903_v14 }
0x22fb   :  { %v2905_v12 = vpack.c.b16 %v2904_v2, %v2904_v2 }
0x22fd   :  { %2906 = vrot.lane.b32.xlu1 %v2905_v12, %s5677_s27 }
0x236f   :  { %v2907_v4 = vpop.permute.xlu1 %2906 }
0x2370   :  { %5027 = vmatmul.mubr.msk.bf16.vlgmr.msra.gmra.mrb[24].mxu1 %vm64_vm0, %v2907_v4 }
0x2371   :  { %5031 = vmatpush3.bf16.msra.mxu1 %v6526_v51  ;;  %5038 = vmatprep.mubr.msk.bf16.mxu1 %vm5679_vm9, %v5678_v40 }
0x2372   :  { %5032 = vmatprep.subr.bf16.mxu1 %v5678_v40 }
0x2375   :  { %5033 = vmatpush3.bf16.msra.mxu1 %v6533_v61 }
0x2376   :  { %5034 = vmatprep.subr.bf16.mxu1 %v5678_v40 }
0x2379   :  { %5035 = vmatpush3.bf16.msra.mxu1 %v6540_v3 }
0x237a   :  { %5036 = vmatprep.subr.bf16.mxu1 %v5678_v40 }
0x237d   :  { %5037 = vmatpush3.bf16.msra.mxu1 %v6549_v15 }
0x237e   :  { %5062 = vmatprep.subr.bf16.mxu1 %v5678_v40 }
0x2443   :  { %v2945_v29 = vpop.f32.mrb[24].mxu1 }
0x2444   :  { %v2946_v39 = vadd.f32 %v2945_v29, %v6488_v16  ;;  %v5028_v33 = vpop.f32.mrb[25].mxu1 }
0x2445   :  { %v2948_v38 = vpop.f32.mrb[26].mxu1 }
0x2446   :  { %v2958_v53 = vrot.slane %v2946_v39, %v6340_v0  ;;  %v5029_v49 = vpop.f32.mrb[27].mxu1 }
0x2448   :  { %v2959_v8 = vcombine.high %v2958_v53, %v2958_v53  ;;  %v2966_v5 = vrot.slane %v2958_v53, %v6340_v0 }
0x244a   :  { %v2973_v59 = vrot.slane %v2959_v8, %v6340_v0  ;;  %v2977_v62 = vrot.slane %v2966_v5, %v5812_v19 }
0x244c   :  { %v2984_v52 = vmul.f32 %v2977_v62, %v6494_v1  ;;  %v2981_v48 = vrot.slane %v2973_v59, %v5812_v19 }
0x244e   :  { %2986 = vadd.xlane.f32.xlu0 %v2984_v52  ;;  %v2985_v25 = vmul.f32 %v2981_v48, %v6498_v57 }
0x2450   :  { %2988 = vadd.xlane.f32.xlu1 %v2985_v25 }
0x24db   :  { %v2987_v24 = vpop.xlane.xlu0 %2986 }
0x24dc   :  { %v2995_v7 = vrot.slane %v2987_v24, %v6508_v26 }
0x24dd   :  { %v2989_v21 = vpop.xlane.xlu1 %2988 }
0x24de   :  { %v2999_v22 = vrot.slane %v2989_v21, %v6508_v26 }
0x24e0   :  { %v3000_v35 = vsel %vm317_vm1, %v2999_v22, %v2995_v7 }
0x24e1   :  { %v3002_v30 = vsel %vm2315_vm13, %v3000_v35, -1e+30 }
0x24e2   :  { %v3003_v20 = vsel %vm2439_vm10, %v3002_v30, -inf }
0x24e3   :  { %3004 = vmax.xlane.f32.xlu0 %v3003_v20 }
0x2570   :  { %v3005_v50 = vpop.xlane.xlu0 %3004 }
0x2571   :  { %v3006_v58 = vsub.f32 %v3002_v30, %v3005_v50 }
0x2573   :  { %v3007_v13 = vmul.f32 1.442695, %v3006_v58 }
0x2575   :  { %5524 = vpow2.f32 %v3007_v13 }
0x257f   :  { %v5525_v6 = vpop.eup %5524 }
0x2580   :  { %v3009_v17 = vsel %vm2439_vm10, %v5525_v6, 0.0 }
0x2581   :  { %3010 = vadd.xlane.f32.xlu0 %v3009_v17 }
0x260e   :  { %v3011_v63 = vpop.xlane.xlu0 %3010 }
0x260f   :  { %5526 = vrcp.f32 %v3011_v63 }
0x2619   :  { %v5527_v18 = vpop.eup %5526 }
0x261a   :  { %v3013_v45 = vmul.f32 %v5527_v18, %v5525_v6 }
0x261c   :  { %v3024_v43 = vrot.slane %v3013_v45, %v5818_v23  ;;  %v3017_v27 = vrot.slane %v3013_v45, %v5812_v19 }
0x261e   :  { %3026 = vbcast.lane.b32.xlu0 %v3024_v43, 256  ;;  %3019 = vbcast.lane.b32.xlu1 %v3017_v27, 256 }
0x2622   :  { %3050 = vrot.lane.b32.xlu1 %v3049_v28, %s5676_s26 }
0x2690   :  { %v3027_v56 = vpop.permute.xlu0 %3026  ;;  %v3020_v10 = vpop.permute.xlu1 %3019 }
0x2691   :  { %v3029_v41 = vmul.f32 %v3027_v56, %v6477_v46  ;;  %v3028_v14 = vmul.f32 %v3020_v10, %v6474_v9 }
0x2693   :  { %v3037_v2 = vsel %vm64_vm0, %v3029_v41, 0.0  ;;  %v3030_v12 = vsel %vm64_vm0, %v3028_v14, 0.0 }
0x2694   :  { %v3038_v4 = vrot.slane %v3037_v2, 4  ;;  %v3031_v29 = vrot.slane %v3030_v12, 4  ;;  %v3051_v48 = vpop.permute.xlu1 %3050 }
0x2696   :  { %v3039_v39 = vadd.f32 %v3038_v4, %v3037_v2  ;;  %v3032_v33 = vadd.f32 %v3031_v29, %v3030_v12  ;;  %v3121_v12 = vrot.slane %v6658_v31, 7  ;;  %v3122_v4 = vrot.slane %v6655_v34, 7 }
0x2698   :  { %v3040_v38 = vrot.slane %v3039_v39, 2  ;;  %v3033_v53 = vrot.slane %v3032_v33, 2 }
0x269a   :  { %v3041_v49 = vadd.f32 %v3040_v38, %v3039_v39  ;;  %v3034_v8 = vadd.f32 %v3033_v53, %v3032_v33 }
0x269c   :  { %v3042_v5 = vrot.slane %v3041_v49, 1  ;;  %v3035_v28 = vrot.slane %v3034_v8, 1 }
0x269e   :  { %v3043_v59 = vadd.f32 %v3042_v5, %v3041_v49  ;;  %v3036_v62 = vadd.f32 %v3035_v28, %v3034_v8 }
0x26a0   :  { %v3046_v52 = vsel %vm317_vm1, %v3043_v59, %v3036_v62  ;;  %v6704_v25 = vsel %vm691_vm5, %v3043_v59, %v3036_v62 }
0x26a1   :  { %v3053_v24 = vsel %vm64_vm0, %v3046_v52, %v3051_v48 }
0x26a2   :  { %v3054_v21 = vpack.c.bf16 %v3053_v24, %v3053_v24 }
0x26a4   :  { %5039 = vmatmul.mubr.msk.bf16.vlgmr.msra.gmra.mrb[28].mxu1 %vm160_vm2, %v3054_v21 }
0x26a5   :  { %5063 = vmatpush3.bf16.msra.mxu1 %v6445_v54  ;;  %5066 = vmatprep.mubr.msk.bf16.mxu1 %vm5679_vm9, %v5678_v40 }
0x26a6   :  { %5064 = vmatprep.subr.bf16.mxu1 %v5678_v40 }
0x26a9   :  { %5065 = vmatpush3.bf16.msra.mxu1 %v6452_v37 }
0x26aa   :  { %5070 = vmatprep.subr.bf16.mxu1 %v5678_v40 }
0x2777   :  { %v3092_v7 = vpop.f32.mrb[28].mxu1 }
0x2778   :  { %v3099_v22 = vrot.slane %v3092_v7, 6  ;;  %v3100_v35 = vrot.slane %v3092_v7, 7  ;;  %v5040_v30 = vpop.f32.mrb[29].mxu1 }
0x2779   :  { %v3095_v20 = vpop.f32.mrb[30].mxu1 }
0x277a   :  { %v3103_v50 = vadd.f32 %v3099_v22, %v6575_v44  ;;  %v3104_v58 = vadd.f32 %v3100_v35, %v6578_v32  ;;  %v5041_v13 = vpop.f32.mrb[31].mxu1 }
0x277c   :  { %5528 = vtanh.f32 %v3103_v50  ;;  %v4848_v37 = vmul.f32 -1.442695, %v3103_v50  ;;  %v4849_v17 = vmul.f32 -1.442695, %v3104_v58 }
0x277d   :  { %5530 = vtanh.f32 %v3104_v58 }
0x277e   :  { %5532 = vpow2.f32 %v4848_v37 }
0x277f   :  { %5534 = vpow2.f32 %v4849_v17 }
0x2786   :  { %v5529_v54 = vpop.eup %5528 }
0x2787   :  { %v5531_v6 = vpop.eup %5530  ;;  %3129 = vrot.lane.b32.xlu1 %v5529_v54, %s5676_s26 }
0x2788   :  { %3131 = vrot.lane.b32.xlu0 %v5531_v6, %s5676_s26  ;;  %v5533_v63 = vpop.eup %5532 }
0x2789   :  { %v5535_v18 = vpop.eup %5534  ;;  %v3111_v45 = vadd.f32 1.0, %v5533_v63 }
0x278a   :  { %v3112_v43 = vadd.f32 1.0, %v5535_v18 }
0x278b   :  { %5536 = vrcp.f32 %v3111_v45 }
0x278c   :  { %5538 = vrcp.f32 %v3112_v43 }
0x2795   :  { %v5537_v27 = vpop.eup %5536 }
0x2796   :  { %v5539_v10 = vpop.eup %5538  ;;  %v3125_v29 = vmul.f32 %v5537_v27, %v3121_v12 }
0x2797   :  { %v3126_v39 = vmul.f32 %v5539_v10, %v3122_v4 }
0x27f9   :  { %v3130_v56 = vpop.permute.xlu1 %3129 }
0x27fa   :  { %v3132_v41 = vpop.permute.xlu0 %3131  ;;  %v3135_v14 = vmul.f32 %v5537_v27, %v3130_v56 }
0x27fb   :  { %v3136_v2 = vmul.f32 %v5539_v10, %v3132_v41 }
0x27fc   :  { %3139 = vrot.lane.b32.xlu1 %v3135_v14, %s5677_s27 }
0x27fd   :  { %3141 = vrot.lane.b32.xlu0 %v3136_v2, %s5677_s27 }
0x286e   :  { %v3140_v33 = vpop.permute.xlu1 %3139 }
0x286f   :  { %v3142_v38 = vpop.permute.xlu0 %3141  ;;  %v6722_v53 = vadd.f32 %v3140_v33, %v3125_v29 }
0x2870   :  { %v6724_v49 = vadd.f32 %v3142_v38, %v3126_v39 }
0x2871   :  { %5540 = vtanh.f32 %v6722_v53 }
0x2872   :  { %5542 = vtanh.f32 %v6724_v49 }
0x287b   :  { %v5541_v8 = vpop.eup %5540 }
0x287c   :  { %v5543_v5 = vpop.eup %5542  ;;  %3151 = vrot.lane.b32.xlu1 %v5541_v8, %s5676_s26 }
0x287d   :  { %3153 = vrot.lane.b32.xlu0 %v5543_v5, %s5676_s26 }
0x28ee   :  { %v3152_v31 = vpop.permute.xlu1 %3151 }
0x28ef   :  { %v3154_v34 = vpop.permute.xlu0 %3153  ;;  %v3157_v28 = vmul.f32 %v5537_v27, %v3152_v31 }
0x28f0   :  { %v3158_v59 = vmul.f32 %v5539_v10, %v3154_v34 }
0x28f1   :  { %v3171_v62 = vpack.c.bf16 %v3157_v28, %v3157_v28  ;;  %v3323_v52 = vrot.slane %v3157_v28, 2 }
0x28f2   :  { %v3161_v48 = vrot.slane %v3158_v59, 7  ;;  %v3172_v24 = vpack.c.bf16 %v3158_v59, %v3158_v59  ;;  %v3324_v21 = vrot.slane %v3158_v59, 1 }
0x28f3   :  { %v3175_v7 = vunpack.c.l.b16 %v3171_v62 }
0x28f4   :  { %v3176_v22 = vunpack.c.l.b16 %v3172_v24  ;;  %v3325_v35 = vsel %vm317_vm1, %v3324_v21, %v3323_v52  ;;  %v6732_v30 = vsel %vm691_vm5, %v3161_v48, %v3157_v28 }
0x28f5   :  { %v3177_v20 = vrot.slane %v3175_v7, 2 }
0x28f6   :  { %v3178_v50 = vrot.slane %v3176_v22, 1 }
0x28f8   :  { %v3179_v58 = vsel %vm317_vm1, %v3178_v50, %v3177_v20 }
0x28f9   :  { %v3180_v13 = vpack.c.b16 %v3179_v58, %v3179_v58 }
0x28fb   :  { %3181 = vrot.lane.b32.xlu1 %v3180_v13, %s5677_s27 }
0x296d   :  { %v3182_v54 = vpop.permute.xlu1 %3181 }
0x296e   :  { %5047 = vmatmul.mubr.msk.bf16.vlgmr.msra.gmra.mrb[40].mxu0 %vm64_vm0, %v3182_v54 }
0x296f   :  { %5051 = vmatpush3.bf16.msra.mxu0 %v6526_v51  ;;  %5058 = vmatprep.mubr.msk.bf16.mxu0 %vm5679_vm9, %v5678_v40 }
0x2970   :  { %5052 = vmatprep.subr.bf16.mxu0 %v5678_v40 }
0x2973   :  { %5053 = vmatpush3.bf16.msra.mxu0 %v6533_v61 }
0x2974   :  { %5054 = vmatprep.subr.bf16.mxu0 %v5678_v40 }
0x2977   :  { %5055 = vmatpush3.bf16.msra.mxu0 %v6540_v3 }
0x2978   :  { %5056 = vmatprep.subr.bf16.mxu0 %v5678_v40 }
0x297b   :  { %5057 = vmatpush3.bf16.msra.mxu0 %v6549_v15 }
0x297c   :  { %5082 = vmatprep.subr.bf16.mxu0 %v5678_v40 }
0x2a41   :  { %v3220_v6 = vpop.f32.mrb[40].mxu0 }
0x2a42   :  { %v3221_v51 = vadd.f32 %v3220_v6, %v6488_v16  ;;  %v5048_v37 = vpop.f32.mrb[41].mxu0 }
0x2a43   :  { %v3223_v17 = vpop.f32.mrb[42].mxu0 }
0x2a44   :  { %v3233_v63 = vrot.slane %v3221_v51, %v6340_v0  ;;  %v5049_v18 = vpop.f32.mrb[43].mxu0 }
0x2a46   :  { %v3234_v45 = vcombine.high %v3233_v63, %v3233_v63  ;;  %v3241_v61 = vrot.slane %v3233_v63, %v6340_v0 }
0x2a48   :  { %v3248_v43 = vrot.slane %v3234_v45, %v6340_v0  ;;  %v3252_v3 = vrot.slane %v3241_v61, %v5812_v19 }
0x2a4a   :  { %v3259_v27 = vmul.f32 %v3252_v3, %v6494_v1  ;;  %v3256_v15 = vrot.slane %v3248_v43, %v5812_v19 }
0x2a4c   :  { %3261 = vadd.xlane.f32.xlu0 %v3259_v27  ;;  %v3260_v56 = vmul.f32 %v3256_v15, %v6498_v57  ;;  %v6778_v27 = vld [vmem:[%s7158_s4 + $0xc0] ss:$8 sps:$4 sm:$0xff]   ;;  %v6787_v15 = vld [vmem:[%s7158_s4 + $0xd0] ss:$8 sps:$4 sm:$0xff]  }
0x2a4e   :  { %3263 = vadd.xlane.f32.xlu1 %v3260_v56 }
0x2ad9   :  { %v3262_v16 = vpop.xlane.xlu0 %3261 }
0x2ada   :  { %v3270_v41 = vrot.slane %v3262_v16, %v6508_v26 }
0x2adb   :  { %v3264_v10 = vpop.xlane.xlu1 %3263 }
0x2adc   :  { %v3274_v14 = vrot.slane %v3264_v10, %v6508_v26 }
0x2ade   :  { %v3275_v2 = vsel %vm317_vm1, %v3274_v14, %v3270_v41 }
0x2adf   :  { %v3277_v12 = vsel %vm2315_vm13, %v3275_v2, -1e+30 }
0x2ae0   :  { %v3278_v4 = vsel %vm2439_vm10, %v3277_v12, -inf }
0x2ae1   :  { %3279 = vmax.xlane.f32.xlu0 %v3278_v4 }
0x2b6e   :  { %v3280_v29 = vpop.xlane.xlu0 %3279 }
0x2b6f   :  { %v3281_v39 = vsub.f32 %v3277_v12, %v3280_v29 }
0x2b71   :  { %v3282_v33 = vmul.f32 1.442695, %v3281_v39 }
0x2b73   :  { %5544 = vpow2.f32 %v3282_v33 }
0x2b7d   :  { %v5545_v38 = vpop.eup %5544 }
0x2b7e   :  { %v3284_v8 = vsel %vm2439_vm10, %v5545_v38, 0.0 }
0x2b7f   :  { %3285 = vadd.xlane.f32.xlu0 %v3284_v8 }
0x2c0c   :  { %v3286_v5 = vpop.xlane.xlu0 %3285 }
0x2c0d   :  { %5546 = vrcp.f32 %v3286_v5 }
0x2c17   :  { %v5547_v31 = vpop.eup %5546 }
0x2c18   :  { %v3288_v34 = vmul.f32 %v5547_v31, %v5545_v38 }
0x2c1a   :  { %v3299_v28 = vrot.slane %v3288_v34, %v5818_v23  ;;  %v3292_v59 = vrot.slane %v3288_v34, %v5812_v19 }
0x2c1c   :  { %3301 = vbcast.lane.b32.xlu0 %v3299_v28, 256  ;;  %3294 = vbcast.lane.b32.xlu1 %v3292_v59, 256 }
0x2c20   :  { %3326 = vrot.lane.b32.xlu1 %v3325_v35, %s5676_s26 }
0x2c8e   :  { %v3302_v62 = vpop.permute.xlu0 %3301  ;;  %v3295_v52 = vpop.permute.xlu1 %3294 }
0x2c8f   :  { %v3304_v48 = vmul.f32 %v3302_v62, %v6477_v46  ;;  %v3303_v24 = vmul.f32 %v3295_v52, %v6474_v9 }
0x2c91   :  { %v3312_v21 = vsel %vm64_vm0, %v3304_v48, 0.0  ;;  %v3305_v7 = vsel %vm64_vm0, %v3303_v24, 0.0 }
0x2c92   :  { %v3313_v22 = vrot.slane %v3312_v21, 4  ;;  %v3306_v20 = vrot.slane %v3305_v7, 4  ;;  %v3327_v45 = vpop.permute.xlu1 %3326 }
0x2c94   :  { %v3314_v50 = vadd.f32 %v3313_v22, %v3312_v21  ;;  %v3307_v58 = vadd.f32 %v3306_v20, %v3305_v7  ;;  %v3397_v21 = vrot.slane %v6722_v53, 7  ;;  %v3398_v7 = vrot.slane %v6724_v49, 7 }
0x2c96   :  { %v3315_v13 = vrot.slane %v3314_v50, 2  ;;  %v3308_v54 = vrot.slane %v3307_v58, 2 }
0x2c98   :  { %v3316_v6 = vadd.f32 %v3315_v13, %v3314_v50  ;;  %v3309_v51 = vadd.f32 %v3308_v54, %v3307_v58 }
0x2c9a   :  { %v3317_v37 = vrot.slane %v3316_v6, 1  ;;  %v3310_v35 = vrot.slane %v3309_v51, 1 }
0x2c9c   :  { %v3318_v17 = vadd.f32 %v3317_v37, %v3316_v6  ;;  %v3311_v63 = vadd.f32 %v3310_v35, %v3309_v51 }
0x2c9e   :  { %v3321_v18 = vsel %vm317_vm1, %v3318_v17, %v3311_v63  ;;  %v6771_v61 = vsel %vm877_vm7, %v3318_v17, %v3311_v63 }
0x2c9f   :  { %v3329_v43 = vsel %vm64_vm0, %v3321_v18, %v3327_v45 }
0x2ca0   :  { %v3330_v3 = vpack.c.bf16 %v3329_v43, %v3329_v43 }
0x2ca2   :  { %5059 = vmatmul.mubr.msk.bf16.vlgmr.msra.gmra.mrb[44].mxu0 %vm160_vm2, %v3330_v3 }
0x2ca3   :  { %5083 = vmatpush3.bf16.msra.mxu0 %v6778_v27  ;;  %5086 = vmatprep.mubr.msk.bf16.mxu0 %vm5679_vm9, %v5678_v40 }
0x2ca4   :  { %5084 = vmatprep.subr.bf16.mxu0 %v5678_v40 }
0x2ca7   :  { %5085 = vmatpush3.bf16.msra.mxu0 %v6787_v15 }
0x2ca8   :  { %5090 = vmatprep.subr.bf16.mxu0 %v5678_v40 }
0x2d75   :  { %v3368_v56 = vpop.f32.mrb[44].mxu0 }
0x2d76   :  { %v3375_v16 = vrot.slane %v3368_v56, 5  ;;  %v3376_v10 = vrot.slane %v3368_v56, 6  ;;  %v5060_v41 = vpop.f32.mrb[45].mxu0 }
0x2d77   :  { %v3371_v14 = vpop.f32.mrb[46].mxu0 }
0x2d78   :  { %v3379_v2 = vadd.f32 %v3375_v16, %v6575_v44  ;;  %v3380_v12 = vadd.f32 %v3376_v10, %v6578_v32  ;;  %v5061_v4 = vpop.f32.mrb[47].mxu0 }
0x2d7a   :  { %5548 = vtanh.f32 %v3379_v2  ;;  %v4852_v33 = vmul.f32 -1.442695, %v3379_v2  ;;  %v4853_v38 = vmul.f32 -1.442695, %v3380_v12 }
0x2d7b   :  { %5550 = vtanh.f32 %v3380_v12 }
0x2d7c   :  { %5552 = vpow2.f32 %v4852_v33  ;;  %v6833_v33 = vld [vmem:[%s7158_s4 + $0xa0] ss:$8 sps:$4 sm:$0xff]  }
0x2d7d   :  { %5554 = vpow2.f32 %v4853_v38  ;;  %v6840_v38 = vld [vmem:[%s7158_s4 + $0xb0] ss:$8 sps:$4 sm:$0xff]  }
0x2d84   :  { %v5549_v29 = vpop.eup %5548 }
0x2d85   :  { %v5551_v39 = vpop.eup %5550  ;;  %3405 = vrot.lane.b32.xlu1 %v5549_v29, %s5676_s26  ;;  %v6817_v29 = vld [vmem:[%s7158_s4 + $0x80] ss:$8 sps:$4 sm:$0xff]  }
0x2d86   :  { %3407 = vrot.lane.b32.xlu0 %v5551_v39, %s5676_s26  ;;  %v5553_v8 = vpop.eup %5552  ;;  %v6826_v39 = vld [vmem:[%s7158_s4 + $0x90] ss:$8 sps:$4 sm:$0xff]  }
0x2d87   :  { %v5555_v5 = vpop.eup %5554  ;;  %v3387_v31 = vadd.f32 1.0, %v5553_v8 }
0x2d88   :  { %v3388_v34 = vadd.f32 1.0, %v5555_v5  ;;  %v6847_v5 = vld [vmem:[%s7159_s5 + $0x2] ss:$0 sm:$0xff] }
0x2d89   :  { %5556 = vrcp.f32 %v3387_v31 }
0x2d8a   :  { %5558 = vrcp.f32 %v3388_v34 }
0x2d93   :  { %v5557_v28 = vpop.eup %5556 }
0x2d94   :  { %v5559_v62 = vpop.eup %5558  ;;  %v3401_v22 = vmul.f32 %v5557_v28, %v3397_v21 }
0x2d95   :  { %v3402_v20 = vmul.f32 %v5559_v62, %v3398_v7 }
0x2df7   :  { %v3406_v59 = vpop.permute.xlu1 %3405 }
0x2df8   :  { %v3408_v52 = vpop.permute.xlu0 %3407  ;;  %v3411_v48 = vmul.f32 %v5557_v28, %v3406_v59 }
0x2df9   :  { %v3412_v24 = vmul.f32 %v5559_v62, %v3408_v52 }
0x2dfa   :  { %3415 = vrot.lane.b32.xlu1 %v3411_v48, %s5677_s27 }
0x2dfb   :  { %3417 = vrot.lane.b32.xlu0 %v3412_v24, %s5677_s27 }
0x2e6c   :  { %v3416_v50 = vpop.permute.xlu1 %3415 }
0x2e6d   :  { %v3418_v58 = vpop.permute.xlu0 %3417  ;;  %v6799_v13 = vadd.f32 %v3416_v50, %v3401_v22 }
0x2e6e   :  { %v6801_v54 = vadd.f32 %v3418_v58, %v3402_v20 }
0x2e6f   :  { %5560 = vtanh.f32 %v6799_v13 }
0x2e70   :  { %5562 = vtanh.f32 %v6801_v54 }
0x2e79   :  { %v5561_v6 = vpop.eup %5560 }
0x2e7a   :  { %v5563_v51 = vpop.eup %5562  ;;  %3427 = vrot.lane.b32.xlu1 %v5561_v6, %s5676_s26 }
0x2e7b   :  { %3429 = vrot.lane.b32.xlu0 %v5563_v51, %s5676_s26 }
0x2eec   :  { %v3428_v53 = vpop.permute.xlu1 %3427 }
0x2eed   :  { %v3430_v49 = vpop.permute.xlu0 %3429  ;;  %v3433_v37 = vmul.f32 %v5557_v28, %v3428_v53 }
0x2eee   :  { %v3434_v35 = vmul.f32 %v5559_v62, %v3430_v49 }
0x2eef   :  { %v3447_v17 = vpack.c.bf16 %v3433_v37, %v3433_v37  ;;  %v3599_v63 = vrot.slane %v3433_v37, 3 }
0x2ef0   :  { %v3437_v18 = vrot.slane %v3434_v35, 7  ;;  %v3448_v45 = vpack.c.bf16 %v3434_v35, %v3434_v35  ;;  %v3600_v43 = vrot.slane %v3434_v35, 2 }
0x2ef1   :  { %v3451_v3 = vunpack.c.l.b16 %v3447_v17 }
0x2ef2   :  { %v3452_v56 = vunpack.c.l.b16 %v3448_v45  ;;  %v3601_v16 = vsel %vm317_vm1, %v3600_v43, %v3599_v63  ;;  %v6809_v10 = vsel %vm877_vm7, %v3437_v18, %v3433_v37 }
0x2ef3   :  { %v3453_v41 = vrot.slane %v3451_v3, 3 }
0x2ef4   :  { %v3454_v14 = vrot.slane %v3452_v56, 2 }
0x2ef6   :  { %v3455_v2 = vsel %vm317_vm1, %v3454_v14, %v3453_v41 }
0x2ef7   :  { %v3456_v12 = vpack.c.b16 %v3455_v2, %v3455_v2 }
0x2ef9   :  { %3457 = vrot.lane.b32.xlu1 %v3456_v12, %s5677_s27 }
0x2f6b   :  { %v3458_v4 = vpop.permute.xlu1 %3457 }
0x2f6c   :  { %5067 = vmatmul.mubr.msk.bf16.vlgmr.msra.gmra.mrb[32].mxu1 %vm64_vm0, %v3458_v4 }
0x2f6d   :  { %5071 = vmatpush3.bf16.msra.mxu1 %v6817_v29  ;;  %5078 = vmatprep.mubr.msk.bf16.mxu1 %vm5679_vm9, %v5678_v40 }
0x2f6e   :  { %5072 = vmatprep.subr.bf16.mxu1 %v5678_v40 }
0x2f71   :  { %5073 = vmatpush3.bf16.msra.mxu1 %v6826_v39 }
0x2f72   :  { %5074 = vmatprep.subr.bf16.mxu1 %v5678_v40 }
0x2f75   :  { %5075 = vmatpush3.bf16.msra.mxu1 %v6833_v33 }
0x2f76   :  { %5076 = vmatprep.subr.bf16.mxu1 %v5678_v40 }
0x2f79   :  { %5077 = vmatpush3.bf16.msra.mxu1 %v6840_v38 }
0x2f7a   :  { %5102 = vmatprep.subr.bf16.mxu1 %v5678_v40 }
0x303f   :  { %v3496_v8 = vpop.f32.mrb[32].mxu1 }
0x3040   :  { %v3497_v31 = vadd.f32 %v6847_v5, %v3496_v8  ;;  %v5068_v34 = vpop.f32.mrb[33].mxu1 }
0x3041   :  { %v3499_v28 = vpop.f32.mrb[34].mxu1 }
0x3042   :  { %v3509_v59 = vrot.slane %v3497_v31, %v6340_v0  ;;  %v5069_v62 = vpop.f32.mrb[35].mxu1 }
0x3044   :  { %v3510_v52 = vcombine.high %v3509_v59, %v3509_v59  ;;  %v3517_v48 = vrot.slane %v3509_v59, %v6340_v0 }
0x3046   :  { %v3524_v24 = vrot.slane %v3510_v52, %v6340_v0  ;;  %v3528_v21 = vrot.slane %v3517_v48, %v5812_v19 }
0x3048   :  { %v3535_v7 = vmul.f32 %v3528_v21, %v6494_v1  ;;  %v3532_v22 = vrot.slane %v3524_v24, %v5812_v19 }
0x304a   :  { %3537 = vadd.xlane.f32.xlu0 %v3535_v7  ;;  %v3536_v20 = vmul.f32 %v3532_v22, %v6498_v57 }
0x304c   :  { %3539 = vadd.xlane.f32.xlu1 %v3536_v20 }
0x30d7   :  { %v3538_v50 = vpop.xlane.xlu0 %3537 }
0x30d8   :  { %v3546_v6 = vrot.slane %v3538_v50, %v6508_v26 }
0x30d9   :  { %v3540_v58 = vpop.xlane.xlu1 %3539 }
0x30da   :  { %v3550_v51 = vrot.slane %v3540_v58, %v6508_v26 }
0x30dc   :  { %v3551_v53 = vsel %vm317_vm1, %v3550_v51, %v3546_v6 }
0x30dd   :  { %v3553_v49 = vsel %vm2315_vm13, %v3551_v53, -1e+30 }
0x30de   :  { %v3554_v37 = vsel %vm2439_vm10, %v3553_v49, -inf }
0x30df   :  { %3555 = vmax.xlane.f32.xlu0 %v3554_v37 }
0x316c   :  { %v3556_v35 = vpop.xlane.xlu0 %3555 }
0x316d   :  { %v3557_v17 = vsub.f32 %v3553_v49, %v3556_v35 }
0x316f   :  { %v3558_v63 = vmul.f32 1.442695, %v3557_v17 }
0x3171   :  { %5564 = vpow2.f32 %v3558_v63 }
0x317b   :  { %v5565_v18 = vpop.eup %5564 }
0x317c   :  { %v3560_v45 = vsel %vm2439_vm10, %v5565_v18, 0.0 }
0x317d   :  { %3561 = vadd.xlane.f32.xlu0 %v3560_v45 }
0x320a   :  { %v3562_v43 = vpop.xlane.xlu0 %3561 }
0x320b   :  { %5566 = vrcp.f32 %v3562_v43 }
0x3215   :  { %v5567_v3 = vpop.eup %5566 }
0x3216   :  { %v3564_v56 = vmul.f32 %v5567_v3, %v5565_v18 }
0x3218   :  { %v3575_v41 = vrot.slane %v3564_v56, %v5818_v23  ;;  %v3568_v14 = vrot.slane %v3564_v56, %v5812_v19 }
0x321a   :  { %3577 = vbcast.lane.b32.xlu0 %v3575_v41, 256  ;;  %3570 = vbcast.lane.b32.xlu1 %v3568_v14, 256 }
0x321e   :  { %3602 = vrot.lane.b32.xlu1 %v3601_v16, %s5676_s26 }
0x328c   :  { %v3578_v2 = vpop.permute.xlu0 %3577  ;;  %v3571_v12 = vpop.permute.xlu1 %3570 }
0x328d   :  { %v3580_v4 = vmul.f32 %v3578_v2, %v6477_v46  ;;  %v3579_v8 = vmul.f32 %v3571_v12, %v6474_v9 }
0x328f   :  { %v3588_v31 = vsel %vm64_vm0, %v3580_v4, 0.0  ;;  %v3581_v34 = vsel %vm64_vm0, %v3579_v8, 0.0 }
0x3290   :  { %v3589_v28 = vrot.slane %v3588_v31, 4  ;;  %v3582_v59 = vrot.slane %v3581_v34, 4  ;;  %v3603_v6 = vpop.permute.xlu1 %3602 }
0x3292   :  { %v3590_v62 = vadd.f32 %v3589_v28, %v3588_v31  ;;  %v3583_v52 = vadd.f32 %v3582_v59, %v3581_v34 }
0x3294   :  { %v3591_v48 = vrot.slane %v3590_v62, 2  ;;  %v3584_v24 = vrot.slane %v3583_v52, 2 }
0x3296   :  { %v3592_v21 = vadd.f32 %v3591_v48, %v3590_v62  ;;  %v3585_v7 = vadd.f32 %v3584_v24, %v3583_v52  ;;  %v3673_v52 = vrot.slane %v6799_v13, 7  ;;  %v3674_v48 = vrot.slane %v6801_v54, 7 }
0x3298   :  { %v3593_v22 = vrot.slane %v3592_v21, 1  ;;  %v3586_v16 = vrot.slane %v3585_v7, 1 }
0x329a   :  { %v3594_v20 = vadd.f32 %v3593_v22, %v3592_v21  ;;  %v3587_v50 = vadd.f32 %v3586_v16, %v3585_v7 }
0x329c   :  { %v3597_v58 = vsel %vm317_vm1, %v3594_v20, %v3587_v50  ;;  %v6873_v51 = vsel %vm1068_vm8, %v3594_v20, %v3587_v50 }
0x329d   :  { %v3605_v53 = vsel %vm64_vm0, %v3597_v58, %v3603_v6 }
0x329e   :  { %v3606_v49 = vpack.c.bf16 %v3605_v53, %v3605_v53 }
0x32a0   :  { %5079 = vmatmul.mubr.msk.bf16.vlgmr.msra.gmra.mrb[36].mxu1 %vm160_vm2, %v3606_v49 }
0x32a1   :  { %5103 = vmatpush3.bf16.msra.mxu1 %v6778_v27  ;;  %5106 = vmatprep.mubr.msk.bf16.mxu1 %vm5679_vm9, %v5678_v40 }
0x32a2   :  { %5104 = vmatprep.subr.bf16.mxu1 %v5678_v40 }
0x32a5   :  { %5105 = vmatpush3.bf16.msra.mxu1 %v6787_v15 }
0x32a6   :  { %5110 = vmatprep.subr.bf16.mxu1 %v5678_v40 }
0x3373   :  { %v3644_v37 = vpop.f32.mrb[36].mxu1 }
0x3374   :  { %v3651_v35 = vrot.slane %v3644_v37, 4  ;;  %v3652_v17 = vrot.slane %v3644_v37, 5  ;;  %v5080_v63 = vpop.f32.mrb[37].mxu1 }
0x3375   :  { %v3647_v18 = vpop.f32.mrb[38].mxu1 }
0x3376   :  { %v3655_v45 = vadd.f32 %v3651_v35, %v6575_v44  ;;  %v3656_v43 = vadd.f32 %v3652_v17, %v6578_v32  ;;  %v5081_v3 = vpop.f32.mrb[39].mxu1 }
0x3378   :  { %5568 = vtanh.f32 %v3655_v45  ;;  %v4856_v15 = vmul.f32 -1.442695, %v3655_v45  ;;  %v4857_v41 = vmul.f32 -1.442695, %v3656_v43 }
0x3379   :  { %5570 = vtanh.f32 %v3656_v43 }
0x337a   :  { %5572 = vpow2.f32 %v4856_v15 }
0x337b   :  { %5574 = vpow2.f32 %v4857_v41 }
0x3382   :  { %v5569_v27 = vpop.eup %5568 }
0x3383   :  { %v5571_v56 = vpop.eup %5570  ;;  %3681 = vrot.lane.b32.xlu1 %v5569_v27, %s5676_s26 }
0x3384   :  { %3683 = vrot.lane.b32.xlu0 %v5571_v56, %s5676_s26  ;;  %v5573_v14 = vpop.eup %5572 }
0x3385   :  { %v5575_v2 = vpop.eup %5574  ;;  %v3663_v12 = vadd.f32 1.0, %v5573_v14 }
0x3386   :  { %v3664_v4 = vadd.f32 1.0, %v5575_v2 }
0x3387   :  { %5576 = vrcp.f32 %v3663_v12 }
0x3388   :  { %5578 = vrcp.f32 %v3664_v4 }
0x3391   :  { %v5577_v8 = vpop.eup %5576 }
0x3392   :  { %v5579_v34 = vpop.eup %5578  ;;  %v3677_v24 = vmul.f32 %v5577_v8, %v3673_v52 }
0x3393   :  { %v3678_v21 = vmul.f32 %v5579_v34, %v3674_v48 }
0x33f5   :  { %v3682_v31 = vpop.permute.xlu1 %3681 }
0x33f6   :  { %v3684_v28 = vpop.permute.xlu0 %3683  ;;  %v3687_v59 = vmul.f32 %v5577_v8, %v3682_v31 }
0x33f7   :  { %v3688_v62 = vmul.f32 %v5579_v34, %v3684_v28 }
0x33f8   :  { %3691 = vrot.lane.b32.xlu1 %v3687_v59, %s5677_s27 }
0x33f9   :  { %3693 = vrot.lane.b32.xlu0 %v3688_v62, %s5677_s27 }
0x346a   :  { %v3692_v7 = vpop.permute.xlu1 %3691 }
0x346b   :  { %v3694_v22 = vpop.permute.xlu0 %3693  ;;  %v6891_v16 = vadd.f32 %v3692_v7, %v3677_v24 }
0x346c   :  { %v6893_v20 = vadd.f32 %v3694_v22, %v3678_v21 }
0x346d   :  { %5580 = vtanh.f32 %v6891_v16 }
0x346e   :  { %5582 = vtanh.f32 %v6893_v20 }
0x3477   :  { %v5581_v50 = vpop.eup %5580 }
0x3478   :  { %v5583_v58 = vpop.eup %5582  ;;  %3703 = vrot.lane.b32.xlu1 %v5581_v50, %s5676_s26 }
0x3479   :  { %3705 = vrot.lane.b32.xlu0 %v5583_v58, %s5676_s26 }
0x34ea   :  { %v3704_v13 = vpop.permute.xlu1 %3703 }
0x34eb   :  { %v3706_v54 = vpop.permute.xlu0 %3705  ;;  %v3709_v6 = vmul.f32 %v5577_v8, %v3704_v13 }
0x34ec   :  { %v3710_v53 = vmul.f32 %v5579_v34, %v3706_v54 }
0x34ed   :  { %v3723_v49 = vpack.c.bf16 %v3709_v6, %v3709_v6  ;;  %v3875_v37 = vrot.slane %v3709_v6, 4 }
0x34ee   :  { %v3713_v35 = vrot.slane %v3710_v53, 7  ;;  %v3724_v17 = vpack.c.bf16 %v3710_v53, %v3710_v53  ;;  %v3876_v63 = vrot.slane %v3710_v53, 3 }
0x34ef   :  { %v3727_v18 = vunpack.c.l.b16 %v3723_v49 }
0x34f0   :  { %v3728_v45 = vunpack.c.l.b16 %v3724_v17  ;;  %v3877_v43 = vsel %vm317_vm1, %v3876_v63, %v3875_v37  ;;  %v6901_v3 = vsel %vm1068_vm8, %v3713_v35, %v3709_v6 }
0x34f1   :  { %v3729_v27 = vrot.slane %v3727_v18, 4 }
0x34f2   :  { %v3730_v56 = vrot.slane %v3728_v45, 3 }
0x34f4   :  { %v3731_v15 = vsel %vm317_vm1, %v3730_v56, %v3729_v27 }
0x34f5   :  { %v3732_v41 = vpack.c.b16 %v3731_v15, %v3731_v15 }
0x34f7   :  { %3733 = vrot.lane.b32.xlu1 %v3732_v41, %s5677_s27 }
0x3569   :  { %v3734_v14 = vpop.permute.xlu1 %3733 }
0x356a   :  { %5087 = vmatmul.mubr.msk.bf16.vlgmr.msra.gmra.mrb[48].mxu0 %vm64_vm0, %v3734_v14 }
0x356b   :  { %5091 = vmatpush3.bf16.msra.mxu0 %v6817_v29  ;;  %5098 = vmatprep.mubr.msk.bf16.mxu0 %vm5679_vm9, %v5678_v40 }
0x356c   :  { %5092 = vmatprep.subr.bf16.mxu0 %v5678_v40 }
0x356f   :  { %5093 = vmatpush3.bf16.msra.mxu0 %v6826_v39 }
0x3570   :  { %5094 = vmatprep.subr.bf16.mxu0 %v5678_v40 }
0x3573   :  { %5095 = vmatpush3.bf16.msra.mxu0 %v6833_v33 }
0x3574   :  { %5096 = vmatprep.subr.bf16.mxu0 %v5678_v40 }
0x3577   :  { %5097 = vmatpush3.bf16.msra.mxu0 %v6840_v38 }
0x3578   :  { %5122 = vmatprep.subr.bf16.mxu0 %v5678_v40 }
0x363d   :  { %v3772_v2 = vpop.f32.mrb[48].mxu0 }
0x363e   :  { %v3773_v12 = vadd.f32 %v6847_v5, %v3772_v2  ;;  %v5088_v4 = vpop.f32.mrb[49].mxu0 }
0x363f   :  { %v3775_v8 = vpop.f32.mrb[50].mxu0 }
0x3640   :  { %v3785_v31 = vrot.slane %v3773_v12, %v6340_v0  ;;  %v5089_v34 = vpop.f32.mrb[51].mxu0 }
0x3642   :  { %v3786_v28 = vcombine.high %v3785_v31, %v3785_v31  ;;  %v3793_v59 = vrot.slane %v3785_v31, %v6340_v0 }
0x3644   :  { %v3800_v62 = vrot.slane %v3786_v28, %v6340_v0  ;;  %v3804_v52 = vrot.slane %v3793_v59, %v5812_v19 }
0x3646   :  { %v3811_v48 = vmul.f32 %v3804_v52, %v6494_v1  ;;  %v3808_v24 = vrot.slane %v3800_v62, %v5812_v19 }
0x3648   :  { %3813 = vadd.xlane.f32.xlu0 %v3811_v48  ;;  %v3812_v21 = vmul.f32 %v3808_v24, %v6498_v57 }
0x364a   :  { %3815 = vadd.xlane.f32.xlu1 %v3812_v21 }
0x36d5   :  { %v3814_v7 = vpop.xlane.xlu0 %3813 }
0x36d6   :  { %v3822_v50 = vrot.slane %v3814_v7, %v6508_v26 }
0x36d7   :  { %v3816_v22 = vpop.xlane.xlu1 %3815 }
0x36d8   :  { %v3826_v58 = vrot.slane %v3816_v22, %v6508_v26 }
0x36da   :  { %v3827_v13 = vsel %vm317_vm1, %v3826_v58, %v3822_v50 }
0x36db   :  { %v3829_v54 = vsel %vm2315_vm13, %v3827_v13, -1e+30 }
0x36dc   :  { %v3830_v6 = vsel %vm2439_vm10, %v3829_v54, -inf }
0x36dd   :  { %3831 = vmax.xlane.f32.xlu0 %v3830_v6 }
0x376a   :  { %v3832_v53 = vpop.xlane.xlu0 %3831 }
0x376b   :  { %v3833_v49 = vsub.f32 %v3829_v54, %v3832_v53 }
0x376d   :  { %v3834_v37 = vmul.f32 1.442695, %v3833_v49 }
0x376f   :  { %5584 = vpow2.f32 %v3834_v37 }
0x3779   :  { %v5585_v35 = vpop.eup %5584 }
0x377a   :  { %v3836_v17 = vsel %vm2439_vm10, %v5585_v35, 0.0 }
0x377b   :  { %3837 = vadd.xlane.f32.xlu0 %v3836_v17 }
0x3808   :  { %v3838_v63 = vpop.xlane.xlu0 %3837 }
0x3809   :  { %5586 = vrcp.f32 %v3838_v63 }
0x3813   :  { %v5587_v18 = vpop.eup %5586 }
0x3814   :  { %v3840_v45 = vmul.f32 %v5587_v18, %v5585_v35 }
0x3816   :  { %v3851_v27 = vrot.slane %v3840_v45, %v5818_v23  ;;  %v3844_v56 = vrot.slane %v3840_v45, %v5812_v19 }
0x3818   :  { %3853 = vbcast.lane.b32.xlu0 %v3851_v27, 256  ;;  %3846 = vbcast.lane.b32.xlu1 %v3844_v56, 256 }
0x381c   :  { %3878 = vrot.lane.b32.xlu1 %v3877_v43, %s5676_s26 }
0x388a   :  { %v3854_v15 = vpop.permute.xlu0 %3853  ;;  %v3847_v41 = vpop.permute.xlu1 %3846 }
0x388b   :  { %v3856_v14 = vmul.f32 %v3854_v15, %v6477_v46  ;;  %v3855_v2 = vmul.f32 %v3847_v41, %v6474_v9 }
0x388d   :  { %v3864_v12 = vsel %vm64_vm0, %v3856_v14, 0.0  ;;  %v3857_v4 = vsel %vm64_vm0, %v3855_v2, 0.0 }
0x388e   :  { %v3865_v8 = vrot.slane %v3864_v12, 4  ;;  %v3858_v31 = vrot.slane %v3857_v4, 4  ;;  %v3879_v50 = vpop.permute.xlu1 %3878 }
0x3890   :  { %v3866_v34 = vadd.f32 %v3865_v8, %v3864_v12  ;;  %v3859_v28 = vadd.f32 %v3858_v31, %v3857_v4 }
0x3892   :  { %v3867_v59 = vrot.slane %v3866_v34, 2  ;;  %v3860_v62 = vrot.slane %v3859_v28, 2 }
0x3894   :  { %v3868_v52 = vadd.f32 %v3867_v59, %v3866_v34  ;;  %v3861_v48 = vadd.f32 %v3860_v62, %v3859_v28  ;;  %v3949_v62 = vrot.slane %v6891_v16, 7 }
0x3896   :  { %v3869_v24 = vrot.slane %v3868_v52, 1  ;;  %v3862_v43 = vrot.slane %v3861_v48, 1 }
0x3898   :  { %v3870_v21 = vadd.f32 %v3869_v24, %v3868_v52  ;;  %v3863_v7 = vadd.f32 %v3862_v43, %v3861_v48  ;;  %v3950_v52 = vrot.slane %v6893_v20, 7 }
0x389a   :  { %v3873_v22 = vsel %vm317_vm1, %v3870_v21, %v3863_v7  ;;  %v6940_v58 = vsel %vm1254_vm6, %v3870_v21, %v3863_v7 }
0x389b   :  { %v3881_v13 = vsel %vm64_vm0, %v3873_v22, %v3879_v50 }
0x389c   :  { %v3882_v54 = vpack.c.bf16 %v3881_v13, %v3881_v13 }
0x389e   :  { %5099 = vmatmul.mubr.msk.bf16.vlgmr.msra.gmra.mrb[52].mxu0 %vm160_vm2, %v3882_v54 }
0x389f   :  { %5130 = vmatprep.mubr.msk.bf16.mxu0 %vm5679_vm9, %v5678_v40 }
0x3971   :  { %v3920_v6 = vpop.f32.mrb[52].mxu0 }
0x3972   :  { %v3927_v53 = vrot.slane %v3920_v6, 3  ;;  %v3928_v49 = vrot.slane %v3920_v6, 4  ;;  %v5100_v37 = vpop.f32.mrb[53].mxu0 }
0x3973   :  { %v3923_v35 = vpop.f32.mrb[54].mxu0 }
0x3974   :  { %v3931_v17 = vadd.f32 %v3927_v53, %v6575_v44  ;;  %v3932_v63 = vadd.f32 %v3928_v49, %v6578_v32  ;;  %v5101_v18 = vpop.f32.mrb[55].mxu0 }
0x3976   :  { %5588 = vtanh.f32 %v3931_v17  ;;  %v4860_v56 = vmul.f32 -1.442695, %v3931_v17  ;;  %v4861_v15 = vmul.f32 -1.442695, %v3932_v63 }
0x3977   :  { %5590 = vtanh.f32 %v3932_v63 }
0x3978   :  { %5592 = vpow2.f32 %v4860_v56 }
0x3979   :  { %5594 = vpow2.f32 %v4861_v15 }
0x3980   :  { %v5589_v45 = vpop.eup %5588 }
0x3981   :  { %v5591_v27 = vpop.eup %5590  ;;  %3957 = vrot.lane.b32.xlu1 %v5589_v45, %s5676_s26 }
0x3982   :  { %3959 = vrot.lane.b32.xlu0 %v5591_v27, %s5676_s26  ;;  %v5593_v41 = vpop.eup %5592 }
0x3983   :  { %v5595_v14 = vpop.eup %5594  ;;  %v3939_v2 = vadd.f32 1.0, %v5593_v41 }
0x3984   :  { %v3940_v12 = vadd.f32 1.0, %v5595_v14 }
0x3985   :  { %5596 = vrcp.f32 %v3939_v2 }
0x3986   :  { %5598 = vrcp.f32 %v3940_v12 }
0x398f   :  { %v5597_v4 = vpop.eup %5596 }
0x3990   :  { %v5599_v31 = vpop.eup %5598  ;;  %v3953_v48 = vmul.f32 %v5597_v4, %v3949_v62 }
0x3991   :  { %v3954_v24 = vmul.f32 %v5599_v31, %v3950_v52 }
0x39f3   :  { %v3958_v8 = vpop.permute.xlu1 %3957 }
0x39f4   :  { %v3960_v34 = vpop.permute.xlu0 %3959  ;;  %v3963_v28 = vmul.f32 %v5597_v4, %v3958_v8 }
0x39f5   :  { %v3964_v59 = vmul.f32 %v5599_v31, %v3960_v34 }
0x39f6   :  { %3967 = vrot.lane.b32.xlu1 %v3963_v28, %s5677_s27 }
0x39f7   :  { %3969 = vrot.lane.b32.xlu0 %v3964_v59, %s5677_s27 }
0x3a68   :  { %v3968_v43 = vpop.permute.xlu1 %3967 }
0x3a69   :  { %v3970_v21 = vpop.permute.xlu0 %3969  ;;  %v6954_v7 = vadd.f32 %v3968_v43, %v3953_v48 }
0x3a6a   :  { %v6956_v22 = vadd.f32 %v3970_v21, %v3954_v24 }
0x3a6b   :  { %5600 = vtanh.f32 %v6954_v7 }
0x3a6c   :  { %5602 = vtanh.f32 %v6956_v22 }
0x3a75   :  { %v5601_v50 = vpop.eup %5600 }
0x3a76   :  { %v5603_v13 = vpop.eup %5602  ;;  %3979 = vrot.lane.b32.xlu1 %v5601_v50, %s5676_s26 }
0x3a77   :  { %3981 = vrot.lane.b32.xlu0 %v5603_v13, %s5676_s26 }
0x3ae8   :  { %v3980_v16 = vpop.permute.xlu1 %3979 }
0x3ae9   :  { %v3982_v20 = vpop.permute.xlu0 %3981  ;;  %v3985_v54 = vmul.f32 %v5597_v4, %v3980_v16 }
0x3aea   :  { %v3986_v6 = vmul.f32 %v5599_v31, %v3982_v20 }
0x3aeb   :  { %v3999_v53 = vpack.c.bf16 %v3985_v54, %v3985_v54  ;;  %v4151_v49 = vrot.slane %v3985_v54, 5 }
0x3aec   :  { %v3989_v37 = vrot.slane %v3986_v6, 7  ;;  %v4000_v35 = vpack.c.bf16 %v3986_v6, %v3986_v6  ;;  %v4152_v17 = vrot.slane %v3986_v6, 4 }
0x3aed   :  { %v4003_v63 = vunpack.c.l.b16 %v3999_v53 }
0x3aee   :  { %v4004_v18 = vunpack.c.l.b16 %v4000_v35  ;;  %v4153_v45 = vsel %vm317_vm1, %v4152_v17, %v4151_v49  ;;  %v6964_v27 = vsel %vm1254_vm6, %v3989_v37, %v3985_v54  ;;  %vm7168_vm6 = vcmask 1046528  }
0x3aef   :  { %v4005_v56 = vrot.slane %v4003_v63, 5  ;;  %vm7169_vm7 = vmmov %vm7168_vm6 }
0x3af0   :  { %v4006_v15 = vrot.slane %v4004_v18, 4 }
0x3af2   :  { %v4007_v41 = vsel %vm317_vm1, %v4006_v15, %v4005_v56 }
0x3af3   :  { %v4008_v14 = vpack.c.b16 %v4007_v41, %v4007_v41 }
0x3af5   :  { %4009 = vrot.lane.b32.xlu1 %v4008_v14, %s5677_s27 }
0x3b67   :  { %v4010_v2 = vpop.permute.xlu1 %4009 }
0x3b68   :  { %5107 = vmatmul.mubr.msk.bf16.vlgmr.msra.gmra.mrb[40].mxu1 %vm64_vm0, %v4010_v2 }
0x3b69   :  { %5111 = vmatpush3.bf16.msra.mxu1 %v6817_v29  ;;  %5118 = vmatprep.mubr.msk.bf16.mxu1 %vm5679_vm9, %v5678_v40 }
0x3b6a   :  { %5112 = vmatprep.subr.bf16.mxu1 %v5678_v40 }
0x3b6d   :  { %5113 = vmatpush3.bf16.msra.mxu1 %v6826_v39 }
0x3b6e   :  { %5114 = vmatprep.subr.bf16.mxu1 %v5678_v40 }
0x3b71   :  { %5115 = vmatpush3.bf16.msra.mxu1 %v6833_v33 }
0x3b72   :  { %5116 = vmatprep.subr.bf16.mxu1 %v5678_v40 }
0x3b75   :  { %5117 = vmatpush3.bf16.msra.mxu1 %v6840_v38 }
0x3b76   :  { %5134 = vmatprep.subr.bf16.mxu1 %v5678_v40 }
0x3c3b   :  { %v4048_v12 = vpop.f32.mrb[40].mxu1 }
0x3c3c   :  { %v4049_v29 = vadd.f32 %v6847_v5, %v4048_v12  ;;  %v5108_v4 = vpop.f32.mrb[41].mxu1 }
0x3c3d   :  { %v4051_v8 = vpop.f32.mrb[42].mxu1 }
0x3c3e   :  { %v4061_v31 = vrot.slane %v4049_v29, %v6340_v0  ;;  %v5109_v34 = vpop.f32.mrb[43].mxu1 }
0x3c40   :  { %v4062_v28 = vcombine.high %v4061_v31, %v4061_v31  ;;  %v4069_v39 = vrot.slane %v4061_v31, %v6340_v0 }
0x3c42   :  { %v4076_v59 = vrot.slane %v4062_v28, %v6340_v0  ;;  %v4080_v33 = vrot.slane %v4069_v39, %v5812_v19 }
0x3c44   :  { %v4087_v62 = vmul.f32 %v4080_v33, %v6494_v1  ;;  %v4084_v38 = vrot.slane %v4076_v59, %v5812_v19 }
0x3c46   :  { %4089 = vadd.xlane.f32.xlu0 %v4087_v62  ;;  %v4088_v52 = vmul.f32 %v4084_v38, %v6498_v57 }
0x3c48   :  { %4091 = vadd.xlane.f32.xlu1 %v4088_v52 }
0x3cd3   :  { %v4090_v5 = vpop.xlane.xlu0 %4089 }
0x3cd4   :  { %v4098_v24 = vrot.slane %v4090_v5, %v6508_v26 }
0x3cd5   :  { %v4092_v48 = vpop.xlane.xlu1 %4091 }
0x3cd6   :  { %v4102_v43 = vrot.slane %v4092_v48, %v6508_v26 }
0x3cd8   :  { %v4103_v21 = vsel %vm317_vm1, %v4102_v43, %v4098_v24 }
0x3cd9   :  { %v4105_v50 = vsel %vm2315_vm13, %v4103_v21, -1e+30 }
0x3cda   :  { %v4106_v13 = vsel %vm2439_vm10, %v4105_v50, -inf }
0x3cdb   :  { %4107 = vmax.xlane.f32.xlu0 %v4106_v13 }
0x3d68   :  { %v4108_v1 = vpop.xlane.xlu0 %4107 }
0x3d69   :  { %v4109_v16 = vsub.f32 %v4105_v50, %v4108_v1 }
0x3d6b   :  { %v4110_v20 = vmul.f32 1.442695, %v4109_v16 }
0x3d6d   :  { %5604 = vpow2.f32 %v4110_v20 }
0x3d77   :  { %v5605_v57 = vpop.eup %5604 }
0x3d78   :  { %v4112_v54 = vsel %vm2439_vm10, %v5605_v57, 0.0 }
0x3d79   :  { %4113 = vadd.xlane.f32.xlu0 %v4112_v54 }
0x3e06   :  { %v4114_v6 = vpop.xlane.xlu0 %4113 }
0x3e07   :  { %5606 = vrcp.f32 %v4114_v6 }
0x3e11   :  { %v5607_v53 = vpop.eup %5606 }
0x3e12   :  { %v4116_v26 = vmul.f32 %v5607_v53, %v5605_v57 }
0x3e14   :  { %v4127_v49 = vrot.slane %v4116_v26, %v5818_v23  ;;  %v4120_v60 = vrot.slane %v4116_v26, %v5812_v19 }
0x3e16   :  { %4129 = vbcast.lane.b32.xlu0 %v4127_v49, 256  ;;  %4122 = vbcast.lane.b32.xlu1 %v4120_v60, 256  ;;  %v4225_v60 = vrot.slane %v6954_v7, 7 }
0x3e1a   :  { %4154 = vrot.lane.b32.xlu1 %v4153_v45, %s5676_s26 }
0x3e88   :  { %v4130_v37 = vpop.permute.xlu0 %4129  ;;  %v4123_v35 = vpop.permute.xlu1 %4122 }
0x3e89   :  { %v4132_v17 = vmul.f32 %v4130_v37, %v6477_v46  ;;  %v4131_v63 = vmul.f32 %v4123_v35, %v6474_v9  ;;  %v4226_v37 = vrot.slane %v6956_v22, 7 }
0x3e8b   :  { %v4140_v18 = vsel %vm64_vm0, %v4132_v17, 0.0  ;;  %v4133_v56 = vsel %vm64_vm0, %v4131_v63, 0.0 }
0x3e8c   :  { %v4141_v15 = vrot.slane %v4140_v18, 4  ;;  %v4134_v41 = vrot.slane %v4133_v56, 4  ;;  %v4155_v28 = vpop.permute.xlu1 %4154 }
0x3e8e   :  { %v4142_v14 = vadd.f32 %v4141_v15, %v4140_v18  ;;  %v4135_v23 = vadd.f32 %v4134_v41, %v4133_v56 }
0x3e90   :  { %v4143_v2 = vrot.slane %v4142_v14, 2  ;;  %v4136_v12 = vrot.slane %v4135_v23, 2 }
0x3e92   :  { %v4144_v29 = vadd.f32 %v4143_v2, %v4142_v14  ;;  %v4137_v4 = vadd.f32 %v4136_v12, %v4135_v23 }
0x3e94   :  { %v4145_v8 = vrot.slane %v4144_v29, 1  ;;  %v4138_v45 = vrot.slane %v4137_v4, 1 }
0x3e96   :  { %v4146_v31 = vadd.f32 %v4145_v8, %v4144_v29  ;;  %v4139_v34 = vadd.f32 %v4138_v45, %v4137_v4 }
0x3e98   :  { %v4149_v46 = vsel %vm317_vm1, %v4146_v31, %v4139_v34  ;;  %v4270_v9 = vsel %vm1445_vm4, %v4146_v31, %v4139_v34  ;;  %vm7164_vm1 = vcmask 1042432  }
0x3e99   :  { %v4157_v39 = vsel %vm64_vm0, %v4149_v46, %v4155_v28  ;;  %vm7165_vm3 = vmmov %vm7164_vm1 }
0x3e9a   :  { %v4158_v59 = vpack.c.bf16 %v4157_v39, %v4157_v39 }
0x3e9c   :  { %5119 = vmatmul.mubr.msk.bf16.vlgmr.msra.gmra.mrb[44].mxu1 %vm160_vm2, %v4158_v59 }
0x3e9d   :  { %5138 = vmatprep.mubr.msk.bf16.mxu1 %vm5679_vm9, %v5678_v40 }
0x3f6f   :  { %v4196_v33 = vpop.f32.mrb[44].mxu1 }
0x3f70   :  { %v4203_v62 = vrot.slane %v4196_v33, 2  ;;  %v4204_v38 = vrot.slane %v4196_v33, 3  ;;  %v5120_v52 = vpop.f32.mrb[45].mxu1 }
0x3f71   :  { %v4199_v5 = vpop.f32.mrb[46].mxu1 }
0x3f72   :  { %v4207_v48 = vadd.f32 %v4203_v62, %v6575_v44  ;;  %v4208_v24 = vadd.f32 %v4204_v38, %v6578_v32  ;;  %v5121_v43 = vpop.f32.mrb[47].mxu1 }
0x3f74   :  { %5608 = vtanh.f32 %v4207_v48  ;;  %v4864_v13 = vmul.f32 -1.442695, %v4207_v48  ;;  %v4865_v1 = vmul.f32 -1.442695, %v4208_v24 }
0x3f75   :  { %5610 = vtanh.f32 %v4208_v24 }
0x3f76   :  { %5612 = vpow2.f32 %v4864_v13 }
0x3f77   :  { %5614 = vpow2.f32 %v4865_v1 }
0x3f7e   :  { %v5609_v21 = vpop.eup %5608 }
0x3f7f   :  { %v5611_v50 = vpop.eup %5610  ;;  %4233 = vrot.lane.b32.xlu0 %v5609_v21, %s5676_s26 }
0x3f80   :  { %4235 = vrot.lane.b32.xlu1 %v5611_v50, %s5676_s26  ;;  %v5613_v16 = vpop.eup %5612 }
0x3f81   :  { %v5615_v20 = vpop.eup %5614  ;;  %v4215_v57 = vadd.f32 1.0, %v5613_v16 }
0x3f82   :  { %v4216_v54 = vadd.f32 1.0, %v5615_v20 }
0x3f83   :  { %5616 = vrcp.f32 %v4215_v57 }
0x3f84   :  { %5618 = vrcp.f32 %v4216_v54 }
0x3f8d   :  { %v5617_v44 = vpop.eup %5616 }
0x3f8e   :  { %v5619_v6 = vpop.eup %5618  ;;  %v4229_v35 = vmul.f32 %v5617_v44, %v4225_v60 }
0x3f8f   :  { %v4230_v17 = vmul.f32 %v5619_v6, %v4226_v37 }
0x3ff1   :  { %v4234_v32 = vpop.permute.xlu0 %4233 }
0x3ff2   :  { %v4236_v53 = vpop.permute.xlu1 %4235  ;;  %v4239_v26 = vmul.f32 %v5617_v44, %v4234_v32 }
0x3ff3   :  { %v4240_v49 = vmul.f32 %v5619_v6, %v4236_v53 }
0x3ff4   :  { %4243 = vrot.lane.b32.xlu0 %v4239_v26, %s5677_s27 }
0x3ff5   :  { %4245 = vrot.lane.b32.xlu1 %v4240_v49, %s5677_s27 }
0x4066   :  { %v4244_v63 = vpop.permute.xlu0 %4243 }
0x4067   :  { %v4246_v18 = vpop.permute.xlu1 %4245  ;;  %v4249_v56 = vadd.f32 %v4244_v63, %v4229_v35 }
0x4068   :  { %v4250_v15 = vadd.f32 %v4246_v18, %v4230_v17 }
0x4069   :  { %5620 = vtanh.f32 %v4249_v56 }
0x406a   :  { %5622 = vtanh.f32 %v4250_v15 }
0x4073   :  { %v5621_v41 = vpop.eup %5620 }
0x4074   :  { %v5623_v14 = vpop.eup %5622  ;;  %4255 = vrot.lane.b32.xlu0 %v5621_v41, %s5676_s26 }
0x4075   :  { %4257 = vrot.lane.b32.xlu1 %v5623_v14, %s5676_s26 }
0x4078   :  { %3167 = vrot.lane.b32.xlu0 %v6704_v25, %s5677_s27 }
0x4079   :  { %3163 = vrot.lane.b32.xlu1 %v6732_v30, %s5677_s27 }
0x407c   :  { %2893 = vrot.lane.b32.xlu0 %v6637_v11, %s5677_s27  ;;  %v5220_v11 = vld [vmem:[%s7158_s4 + $0x1a0] ss:$8 sps:$4 sm:$0xff]  }
0x407d   :  { %2889 = vrot.lane.b32.xlu1 %v6664_v36, %s5677_s27  ;;  %5123 = vmatpush3.bf16.msra.mxu0 %v5220_v11 }
0x407e   :  { %5124 = vmatprep.subr.bf16.mxu0 %v5678_v40 }
0x4080   :  { %3443 = vrot.lane.b32.xlu0 %v6771_v61, %s5677_s27 }
0x4081   :  { %3439 = vrot.lane.b32.xlu1 %v6809_v10, %s5677_s27 }
0x4084   :  { %3719 = vrot.lane.b32.xlu0 %v6873_v51, %s5677_s27  ;;  %v5222_v51 = vld [vmem:[%s7158_s4 + $0x1c0] ss:$8 sps:$4 sm:$0xff]  }
0x4085   :  { %3715 = vrot.lane.b32.xlu1 %v6901_v3, %s5677_s27  ;;  %v5223_v3 = vld [vmem:[%s7158_s4 + $0x1d0] ss:$8 sps:$4 sm:$0xff]  }
0x4088   :  { %4271 = vrot.lane.b32.xlu0 %v4270_v9, %s5677_s27 }
0x4089   :  { %2619 = vrot.lane.b32.xlu1 %v6597_v55, %s5677_s27  ;;  %v5221_v55 = vld [vmem:[%s7158_s4 + $0x1b0] ss:$8 sps:$4 sm:$0xff]  }
0x408a   :  { %5125 = vmatpush3.bf16.msra.mxu0 %v5221_v55 }
0x408b   :  { %5126 = vmatprep.subr.bf16.mxu0 %v5678_v40 }
0x408c   :  { %2622 = vrot.lane.b32.xlu0 %v6560_v47, %s5677_s27 }
0x408e   :  { %5127 = vmatpush3.bf16.msra.mxu0 %v5222_v51 }
0x408f   :  { %5128 = vmatprep.subr.bf16.mxu0 %v5678_v40 }
0x4090   :  { %3995 = vrot.lane.b32.xlu0 %v6940_v58, %s5677_s27 }
0x4092   :  { %5129 = vmatpush3.bf16.msra.mxu0 %v5223_v3 }
0x40e6   :  { %v4256_v25 = vpop.permute.xlu0 %4255 }
0x40e7   :  { %v4258_v36 = vpop.permute.xlu1 %4257  ;;  %v4261_v10 = vmul.f32 %v5617_v44, %v4256_v25 }
0x40e8   :  { %v4262_v30 = vmul.f32 %v5619_v6, %v4258_v36 }
0x40ea   :  { %v4265_v61 = vrot.slane %v4262_v30, 7  ;;  %v3168_v58 = vpop.permute.xlu0 %3167 }
0x40eb   :  { %v3164_v22 = vpop.permute.xlu1 %3163 }
0x40ec   :  { %v4266_v47 = vsel %vm1445_vm4, %v4265_v61, %v4261_v10  ;;  %v3170_v45 = vsel %vm64_vm0, %v3164_v22, %v3168_v58  ;;  %vm7166_vm4 = vcmask 1045504  }
0x40ed   :  { %4267 = vrot.lane.b32.xlu1 %v4266_v47, %s5677_s27  ;;  %vm7167_vm5 = vmmov %vm7166_vm4 }
0x40ee   :  { %v2894_v7 = vpop.permute.xlu0 %2893 }
0x40ef   :  { %v2890_v2 = vpop.permute.xlu1 %2889 }
0x40f0   :  { %v2896_v34 = vsel %vm64_vm0, %v2890_v2, %v2894_v7 }
0x40f1   :  { %3991 = vrot.lane.b32.xlu1 %v6964_v27, %s5677_s27  ;;  %v4331_v27 = vrot.slane %v3170_v45, %v6340_v0  ;;  %v4307_v39 = vrot.slane %v2896_v34, %v6340_v0 }
0x40f2   :  { %v3444_v23 = vpop.permute.xlu0 %3443 }
0x40f3   :  { %v3440_v29 = vpop.permute.xlu1 %3439  ;;  %v4332_v38 = vcombine.high %v4331_v27, %v4331_v27  ;;  %v4308_v52 = vcombine.high %v4307_v39, %v4307_v39  ;;  %v4315_v5 = vrot.slane %v4307_v39, %v6340_v0  ;;  %v4339_v50 = vrot.slane %v4331_v27, %v6340_v0 }
0x40f4   :  { %v3446_v46 = vsel %vm64_vm0, %v3440_v29, %v3444_v23 }
0x40f5   :  { %v4357_v59 = vrot.slane %v3446_v46, %v6340_v0  ;;  %v4350_v48 = vcombine.high %v3446_v46, %v3446_v46  ;;  %v4346_v13 = vrot.slane %v4332_v38, %v6340_v0  ;;  %v4322_v1 = vrot.slane %v4308_v52, %v6340_v0 }
0x40f6   :  { %v3720_v12 = vpop.permute.xlu0 %3719  ;;  %v4323_v16 = vcombine.high %v4315_v5, %v4315_v5  ;;  %v4347_v49 = vcombine.high %v4339_v50, %v4339_v50  ;;  %v5225_v50 = vld [vmem:[%s7158_s4 + $0x1f0] ss:$8 sps:$4 sm:$0xff]  }
0x40f7   :  { %v3716_v8 = vpop.permute.xlu1 %3715  ;;  %v4365_v24 = vcombine.high %v4357_v59, %v4357_v59  ;;  %v4364_v57 = vrot.slane %v4350_v48, %v6340_v0  ;;  %v4348_v60 = vcombine.high %v4346_v13, %v4346_v13  ;;  %v4459_v37 = vrot.slane %v4322_v1, %v5812_v19  ;;  %v4539_v13 = vld [vmem:[%s7159_s5 + $0x5] ss:$0 sm:$0xff] }
0x40f8   :  { %v3722_v33 = vsel %vm64_vm0, %v3716_v8, %v3720_v12  ;;  %v4463_v35 = vrot.slane %v4323_v16, %v5812_v19  ;;  %v4469_v55 = vrot.slane %v4347_v49, %v5812_v19 }
0x40f9   :  { %v4382_v43 = vcombine.high %v3722_v33, %v3722_v33  ;;  %v4379_v54 = vrot.slane %v4365_v24, %v6340_v0  ;;  %v4372_v56 = vrot.slane %v4364_v57, %v6340_v0  ;;  %v4473_v61 = vrot.slane %v4348_v60, %v5812_v19 }
0x40fa   :  { %v4272_v4 = vpop.permute.xlu0 %4271 }
0x40fb   :  { %v2620_v28 = vpop.permute.xlu1 %2619  ;;  %v4389_v44 = vrot.slane %v4382_v43, %v6340_v0  ;;  %v4380_v15 = vcombine.high %v4379_v54, %v4379_v54  ;;  %v4483_v2 = vrot.slane %v4372_v56, %v5812_v19 }
0x40fd   :  { %v4390_v41 = vcombine.high %v4389_v44, %v4389_v44  ;;  %v4397_v3 = vrot.slane %v4389_v44, %v6340_v0  ;;  %v4479_v23 = vrot.slane %v4380_v15, %v5812_v19  ;;  %v4698_v15 = vld [vmem:[%s7157_s3 + $0x8] sm:$0xff] }
0x40fe   :  { %v2623_v31 = vpop.permute.xlu0 %2622  ;;  %vm4712_vm8 = vcmp.ne.s32.totalorder %v4698_v15, 0 }
0x40ff   :  { %v2625_v9 = vsel %vm64_vm0, %v2620_v28, %v2623_v31  ;;  %v4404_v58 = vrot.slane %v4390_v41, %v6340_v0  ;;  %v4489_v28 = vrot.slane %v4397_v3, %v5812_v19 }
0x4100   :  { %v4282_v62 = vrot.slane %v2625_v9, %v6340_v0 }
0x4101   :  { %v4493_v27 = vrot.slane %v4404_v58, %v5812_v19 }
0x4102   :  { %v4283_v21 = vcombine.high %v4282_v62, %v4282_v62  ;;  %v4290_v6 = vrot.slane %v4282_v62, %v6340_v0  ;;  %v3996_v17 = vpop.permute.xlu0 %3995 }
0x4104   :  { %v4297_v53 = vrot.slane %v4283_v21, %v6340_v0  ;;  %v4516_v11 = vsel %vm2121_vm11, %v4290_v6, %v4459_v37 }
0x4105   :  { %v4518_v7 = vsel %vm2124_vm12, %v4516_v11, %v4469_v55 }
0x4106   :  { %v4517_v36 = vsel %vm2121_vm11, %v4297_v53, %v4463_v35  ;;  %v4520_v45 = vsel %vm7164_vm1, %v4518_v7, %v4479_v23 }
0x4107   :  { %v4519_v22 = vsel %vm2124_vm12, %v4517_v36, %v4473_v61  ;;  %v4522_v59 = vsel %vm2130_vm14, %v4520_v45, %v4489_v28  ;;  %vm4743_vm12 = vcmask 0  }
0x4108   :  { %v4521_v31 = vsel %vm7165_vm3, %v4519_v22, %v4483_v2 }
0x4109   :  { %v4523_v38 = vsel %vm2130_vm14, %v4521_v31, %v4493_v27 }
0x415f   :  { %v4268_v20 = vpop.permute.xlu1 %4267 }
0x4160   :  { %v4274_v32 = vsel %vm64_vm0, %v4268_v20, %v4272_v4 }
0x4161   :  { %v4431_v26 = vcombine.high %v4274_v32, %v4274_v32 }
0x4163   :  { %v4438_v63 = vrot.slane %v4431_v26, %v6340_v0  ;;  %v3992_v18 = vpop.permute.xlu1 %3991  ;;  %v4615_v26 = vld [vmem:[%s7159_s5 + $0x6] ss:$0 sm:$0xff] }
0x4164   :  { %v3998_v14 = vsel %vm64_vm0, %v3992_v18, %v3996_v17 }
0x4165   :  { %v4439_v25 = vcombine.high %v4438_v63, %v4438_v63  ;;  %v4406_v30 = vcombine.high %v3998_v14, %v3998_v14  ;;  %v4446_v10 = vrot.slane %v4438_v63, %v6340_v0 }
0x4167   :  { %v4453_v47 = vrot.slane %v4439_v25, %v6340_v0  ;;  %v4413_v51 = vrot.slane %v4406_v30, %v6340_v0  ;;  %v4454_v4 = vcombine.high %v4446_v10, %v4446_v10  ;;  %v4697_v10 = vld [vmem:[%s7157_s3] sm:$0xff]  ;;  %s5681_s3 = smov [#allocation2]  }
0x4168   :  { %s4751_s14 = sshll.u32 %s5681_s3, 4  ;;  %s4752_s14 = int_to_ptr.vmem [resolvable:$true] %s4751_s14 }
0x4169   :  { %v4414_v12 = vcombine.high %v4413_v51, %v4413_v51  ;;  %v4421_v29 = vrot.slane %v4413_v51, %v6340_v0  ;;  %v4455_v8 = vcombine.high %v4453_v47, %v4453_v47  ;;  %v4509_v33 = vrot.slane %v4454_v4, %v5812_v19  ;;  %s5650_s16 = scalar_lea.vmem %s4752_s14, 16  ;;  %s5654_s17 = scalar_lea.vmem %s4752_s14, 32 }
0x416a   :  { %v4877_v51 = vsel %vm4712_vm8, 1.0, %v5678_v40  ;;  %p5651_p0 = scmp.ne.s32.totalorder %s4752_s14, %s5650_s16  ;;  %p5655_p1 = scmp.lt.s32.totalorder %s4752_s14, %s4752_s14 }
0x416b   :  { %v4428_v34 = vrot.slane %v4414_v12, %v6340_v0  ;;  %v4429_v46 = vcombine.high %v4421_v29, %v4421_v29  ;;  %v4513_v62 = vrot.slane %v4455_v8, %v5812_v19  ;;  %p5656_p2 = scmp.lt.s32.totalorder %s5654_s17, %s5650_s16 }
0x416d   :  { %v4499_v9 = vrot.slane %v4428_v34, %v5812_v19  ;;  %v4503_v39 = vrot.slane %v4429_v46, %v5812_v19  ;;  %v5224_v19 = vld [vmem:[%s7158_s4 + $0x1e0] ss:$8 sps:$4 sm:$0xff]   ;;  %p5657_p3 = por %p5656_p2, %p5655_p1 }
0x416e   :  { %5135 = vmatpush3.bf16.msra.mxu1 %v5224_v19 }
0x416f   :  { %v4524_v52 = vsel %vm2133_vm15, %v4522_v59, %v4499_v9  ;;  %v4525_v0 = vsel %vm2133_vm15, %v4523_v38, %v4503_v39  ;;  %5136 = vmatprep.subr.bf16.mxu1 %v5678_v40  ;;  %p5658_p4 = pnand %p5657_p3, %p5651_p0 }
0x4170   :  { %v4526_v5 = vsel %vm7166_vm4, %v4524_v52, %v4509_v33  ;;  %v4527_v48 = vsel %vm7167_vm5, %v4525_v0, %v4513_v62 }
0x4171   :  { %v4528_v24 = vsel %vm7168_vm6, %v4526_v5, 0.0  ;;  %v4529_v43 = vsel %vm7169_vm7, %v4527_v48, 0.0 }
0x4172   :  { %v4530_v21 = vpack.c.bf16 %v4529_v43, %v4528_v24  ;;  %5137 = vmatpush3.bf16.msra.mxu1 %v5225_v50 }
0x4174   :  { %5131 = vmatmul.mubr.msk.bf16.vlgmr.msra.gmra.mrb[56].mxu0 %vm160_vm2, %v4530_v21  ;;  %vm4672_vm2 = vcmp.lt.s32.totalorder %v6504_v42, 50 }
0x4247   :  { %v4601_v1 = vpop.f32.mrb[56].mxu0 }
0x4248   :  { %v4602_v16 = vadd.f32 %v4601_v1, %v4539_v13  ;;  %v5132_v20 = vpop.f32.mrb[57].mxu0 }
0x4249   :  { %v4604_v57 = vpop.f32.mrb[58].mxu0 }
0x424a   :  { %v4605_v54 = vadd.f32 %v4604_v57, %v4539_v13  ;;  %v5133_v44 = vpop.f32.mrb[59].mxu0  ;;  %5624 = vtanh.f32 %v4602_v16 }
0x424c   :  { %5626 = vtanh.f32 %v4605_v54 }
0x4254   :  { %v5625_v32 = vpop.eup %5624 }
0x4256   :  { %v5627_v6 = vpop.eup %5626 }
0x4257   :  { %v4610_v53 = vpack.c.bf16 %v5627_v6, %v5625_v32 }
0x4259   :  { %5139 = vmatmul.mubr.msk.bf16.vlgmr.msra.gmra.mrb[48].mxu1 %vm64_vm0, %v4610_v53  ;;  %vm4711_vm0 = vcmp.ne.s32.totalorder %v4697_v10, 0 }
0x425a   :  { %v4876_v47 = vsel %vm4711_vm0, 1.0, %v5678_v40 }
0x425b   :  { %v5169_v3 = vpack.i.bf16 %v4877_v51, %v4876_v47 }
0x432c   :  { %v4665_v49 = vpop.f32.mrb[48].mxu1 }
0x432d   :  { %v4666_v60 = vadd.f32 %v4665_v49, %v4615_v26  ;;  %v5140_v37 = vpop.f32.mrb[49].mxu1 }
0x432e   :  { %v4668_v35 = vpop.f32.mrb[50].mxu1 }
0x432f   :  { %v4669_v17 = vadd.f32 %v4668_v35, %v4615_v26  ;;  %v5141_v63 = vpop.f32.mrb[51].mxu1  ;;  %v4673_v18 = vsel %vm4672_vm2, %v4666_v60, -1e+30 }
0x4330   :  { %4675 = vmax.xlane.f32.xlu1 %v4673_v18 }
0x4331   :  { %v4674_v56 = vsel %vm4672_vm2, %v4669_v17, -1e+30 }
0x4332   :  { %4677 = vmax.xlane.f32.xlu0 %v4674_v56 }
0x4341   :  { %4703 = vperm.xlu1 %5168, %v4698_v15  }
0x43bd   :  { %v4676_v41 = vpop.xlane.xlu1 %4675 }
0x43be   :  { %v4679_v14 = vsub.f32 %v4673_v18, %v4676_v41 }
0x43bf   :  { %v4678_v11 = vpop.xlane.xlu0 %4677 }
0x43c0   :  { %v4681_v36 = vmul.f32 1.442695, %v4679_v14  ;;  %v4680_v25 = vsub.f32 %v4674_v56, %v4678_v11 }
0x43c1   :  { %v4704_v58 = vpop.permute.xlu1 %4703 }
0x43c2   :  { %5628 = vpow2.f32 %v4681_v36  ;;  %v4683_v30 = vmul.f32 1.442695, %v4680_v25  ;;  %vm4706_vm11 = vcmp.eq.s32.totalorder %v6504_v42, %v4704_v58 }
0x43c3   :  { %v4875_v9 = vsel %vm4706_vm11, 1.0, %v5678_v40 }
0x43c4   :  { %5630 = vpow2.f32 %v4683_v30 }
0x43cc   :  { %v5629_v55 = vpop.eup %5628 }
0x43cd   :  { %4685 = vadd.xlane.f32.xlu0 %v5629_v55 }
0x43ce   :  { %v5631_v61 = vpop.eup %5630 }
0x43cf   :  { %4687 = vadd.xlane.f32.xlu1 %v5631_v61 }
0x43e0   :  { %5170 = vperm.xlu1 %5168, %v5169_v3  }
0x43e3   :  { %4700 = vperm.xlu0 %5167, %v4697_v10  }
0x445a   :  { %v4686_v7 = vpop.xlane.xlu0 %4685 }
0x445b   :  { %5632 = vlog2.f32 %v4686_v7 }
0x445c   :  { %v4688_v22 = vpop.xlane.xlu1 %4687 }
0x445d   :  { %5634 = vlog2.f32 %v4688_v22 }
0x4460   :  { %v5171_v46 = vpop.permute.xlu1 %5170 }
0x4461   :  { %v5173_v59 = vunpack.i.h.bf16 %v5171_v46  ;;  %v5172_v33 = vunpack.i.l.bf16 %v5171_v46 }
0x4462   :  { %v4701_v23 = vpop.permute.xlu0 %4700 }
0x4463   :  { %vm4705_vm9 = vcmp.eq.s32.totalorder %v6504_v42, %v4701_v23 }
0x4464   :  { %v4874_v45 = vsel %vm4705_vm9, 1.0, %v5678_v40 }
0x4465   :  { %v5633_v2 = vpop.eup %5632 }
0x4466   :  { %v4690_v12 = vmul.f32 0.6931472, %v5633_v2 }
0x4467   :  { %v5635_v29 = vpop.eup %5634 }
0x4468   :  { %v4693_v4 = vadd.f32 %v4690_v12, %v4676_v41  ;;  %v4692_v8 = vmul.f32 0.6931472, %v5635_v29 }
0x446a   :  { %v4694_v31 = vadd.f32 %v4692_v8, %v4678_v11  ;;  %v4695_v34 = vsub.f32 %v4673_v18, %v4693_v4 }
0x446c   :  { %v4696_v28 = vsub.f32 %v4674_v56, %v4694_v31  ;;  %v4717_v27 = vmul.f32 %v4874_v45, %v4695_v34 }
0x446e   :  { %v4718_v39 = vmul.f32 %v4875_v9, %v4696_v28  ;;  %v4729_v38 = vmul.f32 %v5172_v33, %v4717_v27 }
0x4470   :  { %v4730_v62 = vmul.f32 %v5173_v59, %v4718_v39 }
0x4472   :  { %v4731_v52 = vadd.f32 %v4730_v62, %v4729_v38 }
0x4474   :  { %4732 = vadd.xlane.f32.xlu1 %v4731_v52 }
0x4501   :  { %v4733_v0 = vpop.xlane.xlu1 %4732 }
0x4502   :  { %v4734_v5 = vrot.slane %v4733_v0, 4 }
0x4504   :  { %v4735_v48 = vadd.f32 %v4734_v5, %v4733_v0 }
0x4506   :  { %v4736_v24 = vrot.slane %v4735_v48, 2 }
0x4508   :  { %v4737_v43 = vadd.f32 %v4736_v24, %v4735_v48 }
0x450a   :  { %v4738_v42 = vrot.slane %v4737_v43, 1 }
0x450c   :  { %v4739_v21 = vadd.f32 %v4738_v42, %v4737_v43 }
0x450e   :  { %5142 = vpush %v4739_v21 }
0x453f   :  { %s5143_s15 = spop %5142 }
0x4540   :  { %s4741_s1 = ssub.f32 0.0, %s5143_s15 }
0x4542   :  { %v4742_v40 = vstv %s4741_s1 }
0x4543   :  { %4744 = vst.msk [vmem:[#allocation2] sm:$0x1] %vm4743_vm12, %v4742_v40 }
0x4544   :  { %5661 = shalt.err (!%p5658_p4)
}
0x4545   :  { %s5662_s20 = scalar_lea.hbm %s7160_s6, 16 }
0x4546   :  { %p5663_p5 = scmp.ne.s32.totalorder %s7160_s6, %s5662_s20  ;;  %p5666_p6 = scmp.lt.u32.totalorder %s5662_s20, %s7160_s6 }
0x4548   :  { %p5668_p7 = pnand %p5666_p6, %p5663_p5 }
0x454a   :  { %5671 = shalt.err (!%p5668_p7)
}
0x454b   :  { %4754 = dma.vmem_to_hbm [thread:$0]  %s4752_s14, 16, %s7160_s6, [#allocation3]  }
0x454c   :  { %5672 = dma.done.wait [#allocation3], 16  }
0x454d   :  { %5673 = vsyncadd [#allocation3], 4294967280 }
0x454e   :  { %4758 = vsyncpa [#allocation3], 1 }

</bundles_post_ra>
